<compile_context>
chip_gen: v7x
topology: tpu7x:2x2x1
jax: 0.10.0
libtpu: 0.0.40
codegen_flags: <defaults>
</compile_context>

<pallas_src>
import jax
import jax.numpy as jnp
from jax import lax
from jax.experimental import pallas as pl
from jax.experimental.pallas import tpu as pltpu


def _conv3x3_frame(src, wk_ref, *, Wp, M, C, fold_k):
    """3x3 conv over a flattened, zero-embedded frame.

    src:    [Np, C] f32 frame (signal at frame rows [2, H+2), cols [0, W)).
    wk_ref: bf16 weights, [3, 3C, C] if fold_k else [9, C, C], tap-major (dy, dx).
    Returns [M, C] f32 = conv output for frame rows [2, H+2), all Wp columns
    (columns >= W are garbage; caller masks / drops them).
    """
    f32, bf16 = jnp.float32, jnp.bfloat16
    # dx = 0 / 2 taps need the frame shifted by -1 / +1 columns; in the flat
    # layout that is a +/-1 row shift.  Two shifted copies per conv replace the
    # old 18 slice+reshape retilings (slices are done on f32 values, which is
    # the proven/robust relayout path; bf16 cast happens right before the dot).
    sm1 = lax.slice(src, (Wp - 1, 0), (Wp - 1 + 2 * Wp + M, C))   # src[j + Wp - 1]
    sp1 = lax.slice(src, (Wp + 1, 0), (Wp + 1 + 2 * Wp + M, C))   # src[j + Wp + 1]

    acc = None
    for dy in range(3):                      # statically unrolled
        r0 = dy * Wp                         # aligned: Wp % 8 == 0
        a0 = lax.slice(sm1, (r0, 0), (r0 + M, C))            # tap (dy, dx=0)
        a1 = lax.slice(src, (r0 + Wp, 0), (r0 + Wp + M, C))   # tap (dy, dx=1)
        a2 = lax.slice(sp1, (r0, 0), (r0 + M, C))             # tap (dy, dx=2)
        if fold_k:
            # Lane-aligned C: fold the dx taps into K -> one [M,3C]@[3C,C] MXU
            # matmul per dy (better K-fill, 3x fewer accumulator RMWs).
            band = jnp.concatenate([a0, a1, a2], axis=1).astype(bf16)
            z = jnp.dot(band, wk_ref[dy], preferred_element_type=f32)
        else:
            # Lane-sparse C (e.g. the C=4 benchmark): keep per-tap K=C matmuls.
            z = jnp.dot(a0.astype(bf16), wk_ref[3 * dy + 0],
                        preferred_element_type=f32)
            z = z + jnp.dot(a1.astype(bf16), wk_ref[3 * dy + 1],
                            preferred_element_type=f32)
            z = z + jnp.dot(a2.astype(bf16), wk_ref[3 * dy + 2],
                            preferred_element_type=f32)
        acc = z if acc is None else acc + z   # init from first matmul (no zeros+add)
    return acc


def _make_kernel(H, W, Wp, C, fold_k):
    M = H * Wp
    Np = (H + 4) * Wp

    def kernel(x_ref, wk1_ref, s1_ref, b1_ref, wk2_ref, s2_ref, b2_ref,
               out_ref, h1f_ref):
        x = x_ref[0]                                    # [Np, C] f32 frame

        # ---- conv1 + folded BN1 + ReLU --------------------------------
        acc1 = _conv3x3_frame(x, wk1_ref, Wp=Wp, M=M, C=C, fold_k=fold_k)
        h1 = jnp.maximum(acc1 * s1_ref[...] + b1_ref[...], 0.0)

        # Zero the pad columns (q >= W) so they cannot leak into conv2.
        col = lax.broadcasted_iota(jnp.int32, (H, Wp, 1), 1).reshape(M, 1)
        h1 = jnp.where(col < W, h1, 0.0)

        # ---- conv1 -> conv2 handoff: zero-bordered frame scratch ------
        # Only the 4*Wp border rows are zeroed each step (cheap, and the
        # scratch carries no cross-step state, so it is megacore-safe); the
        # interior store is full-width and sublane-aligned (offset 2*Wp).
        zb = jnp.zeros((2 * Wp, C), jnp.float32)
        h1f_ref[0:2 * Wp, :] = zb
        h1f_ref[2 * Wp + M:Np, :] = zb
        h1f_ref[2 * Wp:2 * Wp + M, :] = h1

        # ---- conv2 + folded BN2 + residual + ReLU ----------------------
        acc2 = _conv3x3_frame(h1f_ref[...], wk2_ref, Wp=Wp, M=M, C=C,
                              fold_k=fold_k)
        resid = lax.slice(x, (2 * Wp, 0), (2 * Wp + M, C))   # aligned, exact f32
        y = jnp.maximum(acc2 * s2_ref[...] + b2_ref[...] + resid, 0.0)

        y = y.reshape(H, Wp, C)                                # free: Wp % 8 == 0
        out_ref[0] = lax.slice(y, (0, 0, 0), (H, W, C)).astype(out_ref.dtype)

    return kernel


def _fold_bn(gamma, beta, mean, var, eps=1e-5):
    scale = gamma / jnp.sqrt(var + eps)
    bias = beta - mean * scale
    return (scale.reshape(1, -1).astype(jnp.float32),
            bias.reshape(1, -1).astype(jnp.float32))


def _pick_vmem_limit(block_bytes):
    """Generation-aware scoped-VMEM limit: room for the blocks + headroom,
    capped at ~3/4 of physical VMEM (v5e/v6e: 128 MiB, v7x: 64 MiB/TC)."""
    cap = 96 * 1024 * 1024
    try:
        cap = int(pltpu.get_tpu_info().vmem_capacity_bytes * 3 // 4)
    except Exception:
        pass
    want = 4 * block_bytes + (8 << 20)
    return int(max(16 << 20, min(cap, want)))


def basic_block(x, params):
    """BasicBlock forward (eval-mode BN, identity residual).
    x: [B, C, H, W] float32 -> [B, C, H, W] float32."""
    B, C, H, W = x.shape
    Wp = ((W + 2 + 7) // 8) * 8          # padded width, multiple of 8 sublanes
    Np = (H + 4) * Wp                    # frame rows: 2 zero rows above/below
    M = H * Wp
    fold_k = (C % 128 == 0)              # lane-aligned channels -> fold dx into K

    # NCHW -> NHWC (channels on lanes), embed into the zero frame and flatten.
    x_nhwc = jnp.transpose(x, (0, 2, 3, 1))
    x_frame = jnp.pad(x_nhwc, ((0, 0), (2, 2), (0, Wp - W), (0, 0)))
    x_flat = x_frame.reshape(B, Np, C)   # free reshape (row-major)

    def conv_w(w):   # torch [Cout, Cin, 3, 3] -> bf16 taps, (dy, dx)-major
        wt = jnp.transpose(w, (2, 3, 1, 0)).astype(jnp.bfloat16)  # [3,3,Ci,Co]
        return wt.reshape(3, 3 * C, C) if fold_k else wt.reshape(9, C, C)

    wk1 = conv_w(params['conv1_w'])
    wk2 = conv_w(params['conv2_w'])
    s1, b1 = _fold_bn(params['bn1_g'], params['bn1_b'], params['bn1_m'], params['bn1_v'])
    s2, b2 = _fold_bn(params['bn2_g'], params['bn2_b'], params['bn2_m'], params['bn2_v'])

    wk_shape = wk1.shape
    w_kwargs = {}
    if C >= 128:
        # Grid-invariant weights: single-buffer so large-C stages do not pay
        # 2x VMEM for data that never changes across the grid.
        w_kwargs["pipeline_mode"] = pl.Buffered(1)

    block_bytes = (2 * Np * C * 4            # input frame block, double buffered
                   + 4 * int(wk1.size) * 2   # two bf16 weight tensors
                   + 2 * H * W * C * 4       # output block
                   + Np * C * 4              # frame scratch
                   + 8 * C * 4)              # scale / bias
    flops = 4 * B * M * 9 * C * C            # two 3x3 convs (2 flops / MAC)
    bytes_accessed = (4 * B * Np * C + 4 * B * H * W * C
                      + 2 * 2 * int(wk1.size) + 16 * C)

    kernel = _make_kernel(H, W, Wp, C, fold_k)

    out_nhwc = pl.pallas_call(
        kernel,
        out_shape=jax.ShapeDtypeStruct((B, H, W, C), x.dtype),
        grid_spec=pltpu.PrefetchScalarGridSpec(
            num_scalar_prefetch=0,
            grid=(B,),
            in_specs=[
                pl.BlockSpec((1, Np, C), lambda b: (b, 0, 0)),
                pl.BlockSpec(wk_shape, lambda b: (0, 0, 0), **w_kwargs),
                pl.BlockSpec((1, C), lambda b: (0, 0)),
                pl.BlockSpec((1, C), lambda b: (0, 0)),
                pl.BlockSpec(wk_shape, lambda b: (0, 0, 0), **w_kwargs),
                pl.BlockSpec((1, C), lambda b: (0, 0)),
                pl.BlockSpec((1, C), lambda b: (0, 0)),
            ],
            out_specs=pl.BlockSpec((1, H, W, C), lambda b: (b, 0, 0, 0)),
            scratch_shapes=[pltpu.VMEM((Np, C), jnp.float32)],
        ),
        compiler_params=pltpu.CompilerParams(
            dimension_semantics=("parallel",),      # images are independent
            vmem_limit_bytes=_pick_vmem_limit(block_bytes),
        ),
        cost_estimate=pl.CostEstimate(flops=flops, transcendentals=0,
                                      bytes_accessed=bytes_accessed),
    )(x_flat, wk1, s1, b1, wk2, s2, b2)

    return jnp.transpose(out_nhwc, (0, 3, 1, 2))


def init_params(key, C):
    """Deterministic synthetic params matching nn.Conv2d / nn.BatchNorm2d."""
    ks = jax.random.split(key, 10)
    return dict(
        conv1_w=0.1 * jax.random.normal(ks[0], (C, C, 3, 3), jnp.float32),
        conv2_w=0.1 * jax.random.normal(ks[1], (C, C, 3, 3), jnp.float32),
        bn1_g=jax.random.uniform(ks[2], (C,), jnp.float32, 0.5, 1.5),
        bn1_b=0.1 * jax.random.normal(ks[3], (C,), jnp.float32),
        bn1_m=0.1 * jax.random.normal(ks[4], (C,), jnp.float32),
        bn1_v=jax.random.uniform(ks[5], (C,), jnp.float32, 0.5, 1.5),
        bn2_g=jax.random.uniform(ks[6], (C,), jnp.float32, 0.5, 1.5),
        bn2_b=0.1 * jax.random.normal(ks[7], (C,), jnp.float32),
        bn2_m=0.1 * jax.random.normal(ks[8], (C,), jnp.float32),
        bn2_v=jax.random.uniform(ks[9], (C,), jnp.float32, 0.5, 1.5),
    )


def reference(x, params, eps=1e-5):
    """Pure-JAX/XLA reference of the PyTorch BasicBlock forward (eval mode)."""
    def conv3x3(y, w):
        return lax.conv_general_dilated(
            y, w, window_strides=(1, 1), padding=((1, 1), (1, 1)),
            dimension_numbers=('NCHW', 'OIHW', 'NCHW'))

    def bn(y, g, b, m, v):
        s = g / jnp.sqrt(v + eps)
        return y * s[None, :, None, None] + (b - m * s)[None, :, None, None]

    out = jax.nn.relu(bn(conv3x3(x, params['conv1_w']),
                         params['bn1_g'], params['bn1_b'],
                         params['bn1_m'], params['bn1_v']))
    out = bn(conv3x3(out, params['conv2_w']),
             params['bn2_g'], params['bn2_b'], params['bn2_m'], params['bn2_v'])
    return jax.nn.relu(out + x)


if __name__ == "__main__":
    B, C, H, W = 2, 4, 16, 16
    key = jax.random.PRNGKey(0)
    kx, kp = jax.random.split(key)

    x = jax.random.normal(kx, (B, C, H, W), jnp.float32)
    params = init_params(kp, C)

    out = jax.block_until_ready(basic_block(x, params))
    ref = reference(x, params)

    assert out.shape == (B, C, H, W), out.shape
    assert bool(jnp.all(jnp.isfinite(out))), "non-finite output"
    # bf16 matmul operands (f32 accumulation) vs the f32 reference: loosened
    # tolerance per the review; BN, residual add and ReLU are exact f32.
    err = float(jnp.max(jnp.abs(out - ref)))
    assert jnp.allclose(out, ref, atol=5e-2, rtol=5e-2), err
    print("KERNEL_OK")
</pallas_src>

<mosaic_0001>
module attributes {stable_mosaic.version = 11 : i64} {
  func.func @kernel(%arg0: i32, %arg1: memref<1x480x4xf32, #tpu.memory_space<vmem>>, %arg2: memref<9x4x4xbf16, #tpu.memory_space<vmem>>, %arg3: memref<1x4xf32, #tpu.memory_space<vmem>>, %arg4: memref<1x4xf32, #tpu.memory_space<vmem>>, %arg5: memref<9x4x4xbf16, #tpu.memory_space<vmem>>, %arg6: memref<1x4xf32, #tpu.memory_space<vmem>>, %arg7: memref<1x4xf32, #tpu.memory_space<vmem>>, %arg8: memref<1x16x16x4xf32, #tpu.memory_space<vmem>>, %arg9: memref<480x4xf32, #tpu.memory_space<vmem>>) attributes {dimension_semantics = [#tpu.dimension_semantics<parallel>], iteration_bounds = array<i64: 2>, scalar_prefetch = 0 : i64, scratch_operands = 1 : i64, tpu.core_type = #tpu.core_type<tc>, window_params = [{transform_indices = @transform_0, window_bounds = array<i64: 1, 480, 4>}, {pipeline_mode = #tpu.pipeline_mode<synchronous>, transform_indices = @transform_1, window_bounds = array<i64: 9, 4, 4>}, {pipeline_mode = #tpu.pipeline_mode<synchronous>, transform_indices = @transform_2, window_bounds = array<i64: 1, 4>}, {pipeline_mode = #tpu.pipeline_mode<synchronous>, transform_indices = @transform_3, window_bounds = array<i64: 1, 4>}, {pipeline_mode = #tpu.pipeline_mode<synchronous>, transform_indices = @transform_4, window_bounds = array<i64: 9, 4, 4>}, {pipeline_mode = #tpu.pipeline_mode<synchronous>, transform_indices = @transform_5, window_bounds = array<i64: 1, 4>}, {pipeline_mode = #tpu.pipeline_mode<synchronous>, transform_indices = @transform_6, window_bounds = array<i64: 1, 4>}, {transform_indices = @transform_7, window_bounds = array<i64: 1, 16, 16, 4>}]} {
    %c0 = arith.constant 0 : index
    %c0_0 = arith.constant 0 : index
    %c0_1 = arith.constant 0 : index
    %0 = vector.load %arg1[%c0, %c0_0, %c0_1] : memref<1x480x4xf32, #tpu.memory_space<vmem>>, vector<1x480x4xf32>
    %1 = vector.shape_cast %0 : vector<1x480x4xf32> to vector<480x4xf32>
    %2 = vector.extract_strided_slice %1 {offsets = [23, 0], sizes = [432, 4], strides = [1, 1]} : vector<480x4xf32> to vector<432x4xf32>
    %3 = vector.extract_strided_slice %1 {offsets = [25, 0], sizes = [432, 4], strides = [1, 1]} : vector<480x4xf32> to vector<432x4xf32>
    %4 = vector.extract_strided_slice %2 {offsets = [0, 0], sizes = [384, 4], strides = [1, 1]} : vector<432x4xf32> to vector<384x4xf32>
    %5 = vector.extract_strided_slice %1 {offsets = [24, 0], sizes = [384, 4], strides = [1, 1]} : vector<480x4xf32> to vector<384x4xf32>
    %6 = vector.extract_strided_slice %3 {offsets = [0, 0], sizes = [384, 4], strides = [1, 1]} : vector<432x4xf32> to vector<384x4xf32>
    %7 = arith.truncf %4 : vector<384x4xf32> to vector<384x4xbf16>
    %c0_2 = arith.constant 0 : index
    %c0_3 = arith.constant 0 : index
    %c0_4 = arith.constant 0 : index
    %8 = vector.load %arg2[%c0_2, %c0_3, %c0_4] : memref<9x4x4xbf16, #tpu.memory_space<vmem>>, vector<1x4x4xbf16>
    %9 = vector.shape_cast %8 : vector<1x4x4xbf16> to vector<4x4xbf16>
    %cst = arith.constant dense<0.000000e+00> : vector<384x4xf32>
    %10 = tpu.matmul %7, %9, %cst {dimension_numbers = #tpu.dot_dimension_numbers<[1], [0], [0], [1], [0, 0, 1, 1], [], []>} : vector<384x4xbf16>, vector<4x4xbf16>, vector<384x4xf32> -> vector<384x4xf32>
    %11 = arith.truncf %5 : vector<384x4xf32> to vector<384x4xbf16>
    %c1 = arith.constant 1 : index
    %c0_5 = arith.constant 0 : index
    %c0_6 = arith.constant 0 : index
    %12 = vector.load %arg2[%c1, %c0_5, %c0_6] : memref<9x4x4xbf16, #tpu.memory_space<vmem>>, vector<1x4x4xbf16>
    %13 = vector.shape_cast %12 : vector<1x4x4xbf16> to vector<4x4xbf16>
    %cst_7 = arith.constant dense<0.000000e+00> : vector<384x4xf32>
    %14 = tpu.matmul %11, %13, %cst_7 {dimension_numbers = #tpu.dot_dimension_numbers<[1], [0], [0], [1], [0, 0, 1, 1], [], []>} : vector<384x4xbf16>, vector<4x4xbf16>, vector<384x4xf32> -> vector<384x4xf32>
    %15 = arith.addf %10, %14 : vector<384x4xf32>
    %16 = arith.truncf %6 : vector<384x4xf32> to vector<384x4xbf16>
    %c2 = arith.constant 2 : index
    %c0_8 = arith.constant 0 : index
    %c0_9 = arith.constant 0 : index
    %17 = vector.load %arg2[%c2, %c0_8, %c0_9] : memref<9x4x4xbf16, #tpu.memory_space<vmem>>, vector<1x4x4xbf16>
    %18 = vector.shape_cast %17 : vector<1x4x4xbf16> to vector<4x4xbf16>
    %cst_10 = arith.constant dense<0.000000e+00> : vector<384x4xf32>
    %19 = tpu.matmul %16, %18, %cst_10 {dimension_numbers = #tpu.dot_dimension_numbers<[1], [0], [0], [1], [0, 0, 1, 1], [], []>} : vector<384x4xbf16>, vector<4x4xbf16>, vector<384x4xf32> -> vector<384x4xf32>
    %20 = arith.addf %15, %19 : vector<384x4xf32>
    %21 = vector.extract_strided_slice %2 {offsets = [24, 0], sizes = [384, 4], strides = [1, 1]} : vector<432x4xf32> to vector<384x4xf32>
    %22 = vector.extract_strided_slice %1 {offsets = [48, 0], sizes = [384, 4], strides = [1, 1]} : vector<480x4xf32> to vector<384x4xf32>
    %23 = vector.extract_strided_slice %3 {offsets = [24, 0], sizes = [384, 4], strides = [1, 1]} : vector<432x4xf32> to vector<384x4xf32>
    %24 = arith.truncf %21 : vector<384x4xf32> to vector<384x4xbf16>
    %c3 = arith.constant 3 : index
    %c0_11 = arith.constant 0 : index
    %c0_12 = arith.constant 0 : index
    %25 = vector.load %arg2[%c3, %c0_11, %c0_12] : memref<9x4x4xbf16, #tpu.memory_space<vmem>>, vector<1x4x4xbf16>
    %26 = vector.shape_cast %25 : vector<1x4x4xbf16> to vector<4x4xbf16>
    %cst_13 = arith.constant dense<0.000000e+00> : vector<384x4xf32>
    %27 = tpu.matmul %24, %26, %cst_13 {dimension_numbers = #tpu.dot_dimension_numbers<[1], [0], [0], [1], [0, 0, 1, 1], [], []>} : vector<384x4xbf16>, vector<4x4xbf16>, vector<384x4xf32> -> vector<384x4xf32>
    %28 = arith.truncf %22 : vector<384x4xf32> to vector<384x4xbf16>
    %c4 = arith.constant 4 : index
    %c0_14 = arith.constant 0 : index
    %c0_15 = arith.constant 0 : index
    %29 = vector.load %arg2[%c4, %c0_14, %c0_15] : memref<9x4x4xbf16, #tpu.memory_space<vmem>>, vector<1x4x4xbf16>
    %30 = vector.shape_cast %29 : vector<1x4x4xbf16> to vector<4x4xbf16>
    %cst_16 = arith.constant dense<0.000000e+00> : vector<384x4xf32>
    %31 = tpu.matmul %28, %30, %cst_16 {dimension_numbers = #tpu.dot_dimension_numbers<[1], [0], [0], [1], [0, 0, 1, 1], [], []>} : vector<384x4xbf16>, vector<4x4xbf16>, vector<384x4xf32> -> vector<384x4xf32>
    %32 = arith.addf %27, %31 : vector<384x4xf32>
    %33 = arith.truncf %23 : vector<384x4xf32> to vector<384x4xbf16>
    %c5 = arith.constant 5 : index
    %c0_17 = arith.constant 0 : index
    %c0_18 = arith.constant 0 : index
    %34 = vector.load %arg2[%c5, %c0_17, %c0_18] : memref<9x4x4xbf16, #tpu.memory_space<vmem>>, vector<1x4x4xbf16>
    %35 = vector.shape_cast %34 : vector<1x4x4xbf16> to vector<4x4xbf16>
    %cst_19 = arith.constant dense<0.000000e+00> : vector<384x4xf32>
    %36 = tpu.matmul %33, %35, %cst_19 {dimension_numbers = #tpu.dot_dimension_numbers<[1], [0], [0], [1], [0, 0, 1, 1], [], []>} : vector<384x4xbf16>, vector<4x4xbf16>, vector<384x4xf32> -> vector<384x4xf32>
    %37 = arith.addf %32, %36 : vector<384x4xf32>
    %38 = arith.addf %20, %37 : vector<384x4xf32>
    %39 = vector.extract_strided_slice %2 {offsets = [48, 0], sizes = [384, 4], strides = [1, 1]} : vector<432x4xf32> to vector<384x4xf32>
    %40 = vector.extract_strided_slice %1 {offsets = [72, 0], sizes = [384, 4], strides = [1, 1]} : vector<480x4xf32> to vector<384x4xf32>
    %41 = vector.extract_strided_slice %3 {offsets = [48, 0], sizes = [384, 4], strides = [1, 1]} : vector<432x4xf32> to vector<384x4xf32>
    %42 = arith.truncf %39 : vector<384x4xf32> to vector<384x4xbf16>
    %c6 = arith.constant 6 : index
    %c0_20 = arith.constant 0 : index
    %c0_21 = arith.constant 0 : index
    %43 = vector.load %arg2[%c6, %c0_20, %c0_21] : memref<9x4x4xbf16, #tpu.memory_space<vmem>>, vector<1x4x4xbf16>
    %44 = vector.shape_cast %43 : vector<1x4x4xbf16> to vector<4x4xbf16>
    %cst_22 = arith.constant dense<0.000000e+00> : vector<384x4xf32>
    %45 = tpu.matmul %42, %44, %cst_22 {dimension_numbers = #tpu.dot_dimension_numbers<[1], [0], [0], [1], [0, 0, 1, 1], [], []>} : vector<384x4xbf16>, vector<4x4xbf16>, vector<384x4xf32> -> vector<384x4xf32>
    %46 = arith.truncf %40 : vector<384x4xf32> to vector<384x4xbf16>
    %c7 = arith.constant 7 : index
    %c0_23 = arith.constant 0 : index
    %c0_24 = arith.constant 0 : index
    %47 = vector.load %arg2[%c7, %c0_23, %c0_24] : memref<9x4x4xbf16, #tpu.memory_space<vmem>>, vector<1x4x4xbf16>
    %48 = vector.shape_cast %47 : vector<1x4x4xbf16> to vector<4x4xbf16>
    %cst_25 = arith.constant dense<0.000000e+00> : vector<384x4xf32>
    %49 = tpu.matmul %46, %48, %cst_25 {dimension_numbers = #tpu.dot_dimension_numbers<[1], [0], [0], [1], [0, 0, 1, 1], [], []>} : vector<384x4xbf16>, vector<4x4xbf16>, vector<384x4xf32> -> vector<384x4xf32>
    %50 = arith.addf %45, %49 : vector<384x4xf32>
    %51 = arith.truncf %41 : vector<384x4xf32> to vector<384x4xbf16>
    %c8 = arith.constant 8 : index
    %c0_26 = arith.constant 0 : index
    %c0_27 = arith.constant 0 : index
    %52 = vector.load %arg2[%c8, %c0_26, %c0_27] : memref<9x4x4xbf16, #tpu.memory_space<vmem>>, vector<1x4x4xbf16>
    %53 = vector.shape_cast %52 : vector<1x4x4xbf16> to vector<4x4xbf16>
    %cst_28 = arith.constant dense<0.000000e+00> : vector<384x4xf32>
    %54 = tpu.matmul %51, %53, %cst_28 {dimension_numbers = #tpu.dot_dimension_numbers<[1], [0], [0], [1], [0, 0, 1, 1], [], []>} : vector<384x4xbf16>, vector<4x4xbf16>, vector<384x4xf32> -> vector<384x4xf32>
    %55 = arith.addf %50, %54 : vector<384x4xf32>
    %56 = arith.addf %38, %55 : vector<384x4xf32>
    %c0_29 = arith.constant 0 : index
    %c0_30 = arith.constant 0 : index
    %57 = vector.load %arg3[%c0_29, %c0_30] : memref<1x4xf32, #tpu.memory_space<vmem>>, vector<1x4xf32>
    %58 = vector.broadcast %57 : vector<1x4xf32> to vector<384x4xf32>
    %59 = arith.mulf %56, %58 : vector<384x4xf32>
    %c0_31 = arith.constant 0 : index
    %c0_32 = arith.constant 0 : index
    %60 = vector.load %arg4[%c0_31, %c0_32] : memref<1x4xf32, #tpu.memory_space<vmem>>, vector<1x4xf32>
    %61 = vector.broadcast %60 : vector<1x4xf32> to vector<384x4xf32>
    %62 = arith.addf %59, %61 : vector<384x4xf32>
    %cst_33 = arith.constant 0.000000e+00 : f32
    %63 = vector.broadcast %cst_33 : f32 to vector<384x4xf32>
    %64 = arith.maximumf %62, %63 : vector<384x4xf32>
    %65 = tpu.iota {dimensions = array<i32: 1>} : vector<16x24x1xi32>
    %66 = vector.shape_cast %65 : vector<16x24x1xi32> to vector<384x1xi32>
    %c16_i32 = arith.constant 16 : i32
    %67 = vector.broadcast %c16_i32 : i32 to vector<384x1xi32>
    %68 = arith.cmpi slt, %66, %67 : vector<384x1xi32>
    %cst_34 = arith.constant 0.000000e+00 : f32
    %69 = vector.shape_cast %68 : vector<384x1xi1> to vector<384x1xi1>
    %70 = vector.broadcast %69 : vector<384x1xi1> to vector<384x4xi1>
    %71 = vector.broadcast %cst_34 : f32 to vector<384x4xf32>
    %72 = arith.select %70, %64, %71 : vector<384x4xi1>, vector<384x4xf32>
    %cst_35 = arith.constant 0.000000e+00 : f32
    %73 = vector.broadcast %cst_35 : f32 to vector<48x4xf32>
    %c0_36 = arith.constant 0 : index
    %c0_37 = arith.constant 0 : index
    %74 = vector.load %arg9[%c0_36, %c0_37] : memref<480x4xf32, #tpu.memory_space<vmem>>, vector<48x4xf32>
    tpu.vector_store %arg9[%c0_36, %c0_37], %73 {strides = array<i32>} : memref<480x4xf32, #tpu.memory_space<vmem>>, vector<48x4xf32>,
    %c432 = arith.constant 432 : index
    %c0_38 = arith.constant 0 : index
    %75 = vector.load %arg9[%c432, %c0_38] : memref<480x4xf32, #tpu.memory_space<vmem>>, vector<48x4xf32>
    tpu.vector_store %arg9[%c432, %c0_38], %73 {strides = array<i32>} : memref<480x4xf32, #tpu.memory_space<vmem>>, vector<48x4xf32>,
    %c48 = arith.constant 48 : index
    %c0_39 = arith.constant 0 : index
    %76 = vector.load %arg9[%c48, %c0_39] : memref<480x4xf32, #tpu.memory_space<vmem>>, vector<384x4xf32>
    tpu.vector_store %arg9[%c48, %c0_39], %72 {strides = array<i32>} : memref<480x4xf32, #tpu.memory_space<vmem>>, vector<384x4xf32>,
    %c0_40 = arith.constant 0 : index
    %c0_41 = arith.constant 0 : index
    %77 = vector.load %arg9[%c0_40, %c0_41] : memref<480x4xf32, #tpu.memory_space<vmem>>, vector<480x4xf32>
    %78 = vector.extract_strided_slice %77 {offsets = [23, 0], sizes = [432, 4], strides = [1, 1]} : vector<480x4xf32> to vector<432x4xf32>
    %79 = vector.extract_strided_slice %77 {offsets = [25, 0], sizes = [432, 4], strides = [1, 1]} : vector<480x4xf32> to vector<432x4xf32>
    %80 = vector.extract_strided_slice %78 {offsets = [0, 0], sizes = [384, 4], strides = [1, 1]} : vector<432x4xf32> to vector<384x4xf32>
    %81 = vector.extract_strided_slice %77 {offsets = [24, 0], sizes = [384, 4], strides = [1, 1]} : vector<480x4xf32> to vector<384x4xf32>
    %82 = vector.extract_strided_slice %79 {offsets = [0, 0], sizes = [384, 4], strides = [1, 1]} : vector<432x4xf32> to vector<384x4xf32>
    %83 = arith.truncf %80 : vector<384x4xf32> to vector<384x4xbf16>
    %c0_42 = arith.constant 0 : index
    %c0_43 = arith.constant 0 : index
    %c0_44 = arith.constant 0 : index
    %84 = vector.load %arg5[%c0_42, %c0_43, %c0_44] : memref<9x4x4xbf16, #tpu.memory_space<vmem>>, vector<1x4x4xbf16>
    %85 = vector.shape_cast %84 : vector<1x4x4xbf16> to vector<4x4xbf16>
    %cst_45 = arith.constant dense<0.000000e+00> : vector<384x4xf32>
    %86 = tpu.matmul %83, %85, %cst_45 {dimension_numbers = #tpu.dot_dimension_numbers<[1], [0], [0], [1], [0, 0, 1, 1], [], []>} : vector<384x4xbf16>, vector<4x4xbf16>, vector<384x4xf32> -> vector<384x4xf32>
    %87 = arith.truncf %81 : vector<384x4xf32> to vector<384x4xbf16>
    %c1_46 = arith.constant 1 : index
    %c0_47 = arith.constant 0 : index
    %c0_48 = arith.constant 0 : index
    %88 = vector.load %arg5[%c1_46, %c0_47, %c0_48] : memref<9x4x4xbf16, #tpu.memory_space<vmem>>, vector<1x4x4xbf16>
    %89 = vector.shape_cast %88 : vector<1x4x4xbf16> to vector<4x4xbf16>
    %cst_49 = arith.constant dense<0.000000e+00> : vector<384x4xf32>
    %90 = tpu.matmul %87, %89, %cst_49 {dimension_numbers = #tpu.dot_dimension_numbers<[1], [0], [0], [1], [0, 0, 1, 1], [], []>} : vector<384x4xbf16>, vector<4x4xbf16>, vector<384x4xf32> -> vector<384x4xf32>
    %91 = arith.addf %86, %90 : vector<384x4xf32>
    %92 = arith.truncf %82 : vector<384x4xf32> to vector<384x4xbf16>
    %c2_50 = arith.constant 2 : index
    %c0_51 = arith.constant 0 : index
    %c0_52 = arith.constant 0 : index
    %93 = vector.load %arg5[%c2_50, %c0_51, %c0_52] : memref<9x4x4xbf16, #tpu.memory_space<vmem>>, vector<1x4x4xbf16>
    %94 = vector.shape_cast %93 : vector<1x4x4xbf16> to vector<4x4xbf16>
    %cst_53 = arith.constant dense<0.000000e+00> : vector<384x4xf32>
    %95 = tpu.matmul %92, %94, %cst_53 {dimension_numbers = #tpu.dot_dimension_numbers<[1], [0], [0], [1], [0, 0, 1, 1], [], []>} : vector<384x4xbf16>, vector<4x4xbf16>, vector<384x4xf32> -> vector<384x4xf32>
    %96 = arith.addf %91, %95 : vector<384x4xf32>
    %97 = vector.extract_strided_slice %78 {offsets = [24, 0], sizes = [384, 4], strides = [1, 1]} : vector<432x4xf32> to vector<384x4xf32>
    %98 = vector.extract_strided_slice %77 {offsets = [48, 0], sizes = [384, 4], strides = [1, 1]} : vector<480x4xf32> to vector<384x4xf32>
    %99 = vector.extract_strided_slice %79 {offsets = [24, 0], sizes = [384, 4], strides = [1, 1]} : vector<432x4xf32> to vector<384x4xf32>
    %100 = arith.truncf %97 : vector<384x4xf32> to vector<384x4xbf16>
    %c3_54 = arith.constant 3 : index
    %c0_55 = arith.constant 0 : index
    %c0_56 = arith.constant 0 : index
    %101 = vector.load %arg5[%c3_54, %c0_55, %c0_56] : memref<9x4x4xbf16, #tpu.memory_space<vmem>>, vector<1x4x4xbf16>
    %102 = vector.shape_cast %101 : vector<1x4x4xbf16> to vector<4x4xbf16>
    %cst_57 = arith.constant dense<0.000000e+00> : vector<384x4xf32>
    %103 = tpu.matmul %100, %102, %cst_57 {dimension_numbers = #tpu.dot_dimension_numbers<[1], [0], [0], [1], [0, 0, 1, 1], [], []>} : vector<384x4xbf16>, vector<4x4xbf16>, vector<384x4xf32> -> vector<384x4xf32>
    %104 = arith.truncf %98 : vector<384x4xf32> to vector<384x4xbf16>
    %c4_58 = arith.constant 4 : index
    %c0_59 = arith.constant 0 : index
    %c0_60 = arith.constant 0 : index
    %105 = vector.load %arg5[%c4_58, %c0_59, %c0_60] : memref<9x4x4xbf16, #tpu.memory_space<vmem>>, vector<1x4x4xbf16>
    %106 = vector.shape_cast %105 : vector<1x4x4xbf16> to vector<4x4xbf16>
    %cst_61 = arith.constant dense<0.000000e+00> : vector<384x4xf32>
    %107 = tpu.matmul %104, %106, %cst_61 {dimension_numbers = #tpu.dot_dimension_numbers<[1], [0], [0], [1], [0, 0, 1, 1], [], []>} : vector<384x4xbf16>, vector<4x4xbf16>, vector<384x4xf32> -> vector<384x4xf32>
    %108 = arith.addf %103, %107 : vector<384x4xf32>
    %109 = arith.truncf %99 : vector<384x4xf32> to vector<384x4xbf16>
    %c5_62 = arith.constant 5 : index
    %c0_63 = arith.constant 0 : index
    %c0_64 = arith.constant 0 : index
    %110 = vector.load %arg5[%c5_62, %c0_63, %c0_64] : memref<9x4x4xbf16, #tpu.memory_space<vmem>>, vector<1x4x4xbf16>
    %111 = vector.shape_cast %110 : vector<1x4x4xbf16> to vector<4x4xbf16>
    %cst_65 = arith.constant dense<0.000000e+00> : vector<384x4xf32>
    %112 = tpu.matmul %109, %111, %cst_65 {dimension_numbers = #tpu.dot_dimension_numbers<[1], [0], [0], [1], [0, 0, 1, 1], [], []>} : vector<384x4xbf16>, vector<4x4xbf16>, vector<384x4xf32> -> vector<384x4xf32>
    %113 = arith.addf %108, %112 : vector<384x4xf32>
    %114 = arith.addf %96, %113 : vector<384x4xf32>
    %115 = vector.extract_strided_slice %78 {offsets = [48, 0], sizes = [384, 4], strides = [1, 1]} : vector<432x4xf32> to vector<384x4xf32>
    %116 = vector.extract_strided_slice %77 {offsets = [72, 0], sizes = [384, 4], strides = [1, 1]} : vector<480x4xf32> to vector<384x4xf32>
    %117 = vector.extract_strided_slice %79 {offsets = [48, 0], sizes = [384, 4], strides = [1, 1]} : vector<432x4xf32> to vector<384x4xf32>
    %118 = arith.truncf %115 : vector<384x4xf32> to vector<384x4xbf16>
    %c6_66 = arith.constant 6 : index
    %c0_67 = arith.constant 0 : index
    %c0_68 = arith.constant 0 : index
    %119 = vector.load %arg5[%c6_66, %c0_67, %c0_68] : memref<9x4x4xbf16, #tpu.memory_space<vmem>>, vector<1x4x4xbf16>
    %120 = vector.shape_cast %119 : vector<1x4x4xbf16> to vector<4x4xbf16>
    %cst_69 = arith.constant dense<0.000000e+00> : vector<384x4xf32>
    %121 = tpu.matmul %118, %120, %cst_69 {dimension_numbers = #tpu.dot_dimension_numbers<[1], [0], [0], [1], [0, 0, 1, 1], [], []>} : vector<384x4xbf16>, vector<4x4xbf16>, vector<384x4xf32> -> vector<384x4xf32>
    %122 = arith.truncf %116 : vector<384x4xf32> to vector<384x4xbf16>
    %c7_70 = arith.constant 7 : index
    %c0_71 = arith.constant 0 : index
    %c0_72 = arith.constant 0 : index
    %123 = vector.load %arg5[%c7_70, %c0_71, %c0_72] : memref<9x4x4xbf16, #tpu.memory_space<vmem>>, vector<1x4x4xbf16>
    %124 = vector.shape_cast %123 : vector<1x4x4xbf16> to vector<4x4xbf16>
    %cst_73 = arith.constant dense<0.000000e+00> : vector<384x4xf32>
    %125 = tpu.matmul %122, %124, %cst_73 {dimension_numbers = #tpu.dot_dimension_numbers<[1], [0], [0], [1], [0, 0, 1, 1], [], []>} : vector<384x4xbf16>, vector<4x4xbf16>, vector<384x4xf32> -> vector<384x4xf32>
    %126 = arith.addf %121, %125 : vector<384x4xf32>
    %127 = arith.truncf %117 : vector<384x4xf32> to vector<384x4xbf16>
    %c8_74 = arith.constant 8 : index
    %c0_75 = arith.constant 0 : index
    %c0_76 = arith.constant 0 : index
    %128 = vector.load %arg5[%c8_74, %c0_75, %c0_76] : memref<9x4x4xbf16, #tpu.memory_space<vmem>>, vector<1x4x4xbf16>
    %129 = vector.shape_cast %128 : vector<1x4x4xbf16> to vector<4x4xbf16>
    %cst_77 = arith.constant dense<0.000000e+00> : vector<384x4xf32>
    %130 = tpu.matmul %127, %129, %cst_77 {dimension_numbers = #tpu.dot_dimension_numbers<[1], [0], [0], [1], [0, 0, 1, 1], [], []>} : vector<384x4xbf16>, vector<4x4xbf16>, vector<384x4xf32> -> vector<384x4xf32>
    %131 = arith.addf %126, %130 : vector<384x4xf32>
    %132 = arith.addf %114, %131 : vector<384x4xf32>
    %133 = vector.extract_strided_slice %1 {offsets = [48, 0], sizes = [384, 4], strides = [1, 1]} : vector<480x4xf32> to vector<384x4xf32>
    %c0_78 = arith.constant 0 : index
    %c0_79 = arith.constant 0 : index
    %134 = vector.load %arg6[%c0_78, %c0_79] : memref<1x4xf32, #tpu.memory_space<vmem>>, vector<1x4xf32>
    %135 = vector.broadcast %134 : vector<1x4xf32> to vector<384x4xf32>
    %136 = arith.mulf %132, %135 : vector<384x4xf32>
    %c0_80 = arith.constant 0 : index
    %c0_81 = arith.constant 0 : index
    %137 = vector.load %arg7[%c0_80, %c0_81] : memref<1x4xf32, #tpu.memory_space<vmem>>, vector<1x4xf32>
    %138 = vector.broadcast %137 : vector<1x4xf32> to vector<384x4xf32>
    %139 = arith.addf %136, %138 : vector<384x4xf32>
    %140 = arith.addf %139, %133 : vector<384x4xf32>
    %cst_82 = arith.constant 0.000000e+00 : f32
    %141 = vector.broadcast %cst_82 : f32 to vector<384x4xf32>
    %142 = arith.maximumf %140, %141 : vector<384x4xf32>
    %143 = vector.shape_cast %142 : vector<384x4xf32> to vector<16x24x4xf32>
    %144 = vector.extract_strided_slice %143 {offsets = [0, 0, 0], sizes = [16, 16, 4], strides = [1, 1, 1]} : vector<16x24x4xf32> to vector<16x16x4xf32>
    %c0_83 = arith.constant 0 : index
    %c0_84 = arith.constant 0 : index
    %c0_85 = arith.constant 0 : index
    %c0_86 = arith.constant 0 : index
    %145 = vector.load %arg8[%c0_83, %c0_84, %c0_85, %c0_86] : memref<1x16x16x4xf32, #tpu.memory_space<vmem>>, vector<1x16x16x4xf32>
    %146 = vector.shape_cast %145 : vector<1x16x16x4xf32> to vector<16x16x4xf32>
    %147 = vector.shape_cast %144 : vector<16x16x4xf32> to vector<1x16x16x4xf32>
    tpu.vector_store %arg8[%c0_83, %c0_84, %c0_85, %c0_86], %147 {strides = array<i32>} : memref<1x16x16x4xf32, #tpu.memory_space<vmem>>, vector<1x16x16x4xf32>,
    return
  }
  func.func @transform_0(%arg0: i32) -> (i32, i32, i32) {
    %c0_i32 = arith.constant 0 : i32
    %c0_i32_0 = arith.constant 0 : i32
    %c0_i32_1 = arith.constant 0 : i32
    return %arg0, %c0_i32, %c0_i32_0 : i32, i32, i32
  }
  func.func @transform_1(%arg0: i32) -> (i32, i32, i32) {
    %c0_i32 = arith.constant 0 : i32
    %c0_i32_0 = arith.constant 0 : i32
    %c0_i32_1 = arith.constant 0 : i32
    %c0_i32_2 = arith.constant 0 : i32
    return %c0_i32, %c0_i32_0, %c0_i32_1 : i32, i32, i32
  }
  func.func @transform_2(%arg0: i32) -> (i32, i32) {
    %c0_i32 = arith.constant 0 : i32
    %c0_i32_0 = arith.constant 0 : i32
    %c0_i32_1 = arith.constant 0 : i32
    return %c0_i32, %c0_i32_0 : i32, i32
  }
  func.func @transform_3(%arg0: i32) -> (i32, i32) {
    %c0_i32 = arith.constant 0 : i32
    %c0_i32_0 = arith.constant 0 : i32
    %c0_i32_1 = arith.constant 0 : i32
    return %c0_i32, %c0_i32_0 : i32, i32
  }
  func.func @transform_4(%arg0: i32) -> (i32, i32, i32) {
    %c0_i32 = arith.constant 0 : i32
    %c0_i32_0 = arith.constant 0 : i32
    %c0_i32_1 = arith.constant 0 : i32
    %c0_i32_2 = arith.constant 0 : i32
    return %c0_i32, %c0_i32_0, %c0_i32_1 : i32, i32, i32
  }
  func.func @transform_5(%arg0: i32) -> (i32, i32) {
    %c0_i32 = arith.constant 0 : i32
    %c0_i32_0 = arith.constant 0 : i32
    %c0_i32_1 = arith.constant 0 : i32
    return %c0_i32, %c0_i32_0 : i32, i32
  }
  func.func @transform_6(%arg0: i32) -> (i32, i32) {
    %c0_i32 = arith.constant 0 : i32
    %c0_i32_0 = arith.constant 0 : i32
    %c0_i32_1 = arith.constant 0 : i32
    return %c0_i32, %c0_i32_0 : i32, i32
  }
  func.func @transform_7(%arg0: i32) -> (i32, i32, i32, i32) {
    %c0_i32 = arith.constant 0 : i32
    %c0_i32_0 = arith.constant 0 : i32
    %c0_i32_1 = arith.constant 0 : i32
    %c0_i32_2 = arith.constant 0 : i32
    return %arg0, %c0_i32, %c0_i32_0, %c0_i32_1 : i32, i32, i32, i32
  }
}

</mosaic_0001>

<bundles_post_ra>
// kernel: tpu_custom_call.1
= control target key start
LH: loop header
LB: loop body
LE: loop exit
PB: predicated region body
PF: predicated region fallthrough
CT: control target
= control target key end

     0   :  { %s10266_s24 = smov 0   ;;  %s13421_s0 = inlined_call_operand.vmem [shape: f32[2,480,4], index: 0, kind: input, shape index: {}]   ;;  %s13422_s1 = inlined_call_operand.vmem [shape: bf16[9,4,4], index: 1, kind: input, shape index: {}]   ;;  %s13423_s2 = inlined_call_operand.vmem [shape: f32[1,4], index: 2, kind: input, shape index: {}]   ;;  %s13424_s3 = inlined_call_operand.vmem [shape: f32[1,4], index: 3, kind: input, shape index: {}]   ;;  %s13425_s4 = inlined_call_operand.vmem [shape: bf16[9,4,4], index: 4, kind: input, shape index: {}]   ;;  %s13426_s5 = inlined_call_operand.vmem [shape: f32[1,4], index: 5, kind: input, shape index: {}]   ;;  %s13427_s6 = inlined_call_operand.vmem [shape: f32[1,4], index: 6, kind: input, shape index: {}]   ;;  %s13428_s7 = inlined_call_operand.vmem [shape: f32[2,16,16,4], index: 7, kind: output, shape index: {}]  }
   0x1 LB: > { %s7576_s25 = sadd.s32 4294967295, %s10223_s24   ;;  %p7580_p0 = scmp.ge.s32.totalorder %s10223_s24, 1  ;;  %s10223_s24 = sphi %s10266_s24, %s17_s24  }
   0x2   : > { %p237_p1 = scmp.lt.s32.totalorder %s10223_s24, 3 }
   0x4   : > { %p238_p2 = pnand %p7580_p0, %p237_p1 }
   0x6   : > { %241 = sbr.rel (%p238_p2) target bundleno = 2100 (0x834), region = 48 }
   0xd   : > { %v7584_v0 = vld [vmem:[%s13422_s1 + $0x2] sm:$0x3]  ;;  %vm461_vm0 = vcmask 1041408   ;;  %p269_p3 = scmp.lt.s32.totalorder %s7576_s25, 1  ;;  %v361_v2 = vld [vmem:[%s13422_s1] sm:$0x3] }
   0xe   : > { %10157 = vmatprep.subr.msk.bf16.mxu0 %vm461_vm0, %v7584_v0  ;;  %v463_v1 = vsel %vm461_vm0, %v7584_v0, 0  ;;  %vm388_vm1 = vcmask 31744   ;;  %v988_v13 = vsel %vm461_vm0, %v361_v2, 0  ;;  %v10315_v15 = vld [vmem:[%s13422_s1 + $0x4] sm:$0x3] }
   0xf   : > { %8490 = vmatpush3.bf16.msra.mxu0 %v463_v1  ;;  %s14240_s25 = smov (!%p269_p3, %s7576_s25), 1  ;;  %vm690_vm2 = vsmask.f32 4352  ;;  %vm1218_vm3 = vsmask.f32 7424 }
  0x10   : > { %10158 = vmatprep.subr.msk.bf16.mxu0 %vm461_vm0, %v361_v2  ;;  %s10175_s30 = smul.u32 480, %s14240_s25  ;;  %s8038_s11 = sshll.u32 %s14240_s25, 8 }
  0x11   : > { %s13263_s14 = scalar_lea.vmem %s13428_s7, %s8038_s11 }
  0x12   : > { %s10289_s10 = scalar_lea.vmem %s13421_s0, %s10175_s30 }
  0x13   : > { %v280_v3 = vld [vmem:[%s10289_s10 + $0x10] sm:$0xff]  ;;  %v281_v4 = vld [vmem:[%s10289_s10 + $0x18] sm:$0xff]  ;;  %v282_v5 = vld [vmem:[%s10289_s10 + $0x20] sm:$0xff] }
  0x14   : > { %v283_v6 = vld [vmem:[%s10289_s10 + $0x28] sm:$0xff]  ;;  %v10295_v7 = vpack.c.bf16 %v282_v5, %v281_v4  ;;  %v10298_v8 = vld [vmem:[%s10289_s10 + $0x30] sm:$0xff]  ;;  %v10301_v9 = vld [vmem:[%s10289_s10 + $0x38] sm:$0xff]  ;;  %v336_v10 = vpack.c.bf16 %v281_v4, %v280_v3 }
  0x15   : > { %v337_v11 = vpack.c.bf16 %v283_v6, %v282_v5  ;;  %v10304_v12 = vpack.c.bf16 %v10298_v8, %v283_v6  ;;  %v10308_v14 = vld [vmem:[%s10289_s10 + $0x40] sm:$0xff]  ;;  %v10324_v17 = vld [vmem:[%s10289_s10 + $0x48] sm:$0xff]  ;;  %v10327_v18 = vld [vmem:[%s10289_s10 + $0x50] sm:$0xff] }
  0x16   : > { %8491 = vmatprep.mubr.msk.bf16.mxu0 %vm388_vm1, %v10295_v7  ;;  %v10321_v16 = vpack.c.bf16 %v10308_v14, %v10301_v9  ;;  %v692_v19 = vshrl.u32 %v336_v10, 16  ;;  %v695_v20 = vshll.u32 %v336_v10, 16  ;;  %v10332_v21 = vld [vmem:[%s10289_s10 + $0x58] sm:$0xff]  ;;  %v10335_v22 = vld [vmem:[%s10289_s10 + $0x60] sm:$0xff]  ;;  %v10341_v25 = vpack.c.bf16 %v10327_v18, %v10324_v17  ;;  %v10352_v31 = vld [vmem:[%s10289_s10 + $0x68] sm:$0xff] }
  0x17   : > { %8492 = vmatmul.mubr.msk.bf16.vlgmr.msra.gmra.mrb[0].mxu0 %vm388_vm1, %v10304_v12  ;;  %v700_v23 = vshrl.u32 %v337_v11, 16  ;;  %v703_v24 = vshll.u32 %v337_v11, 16  ;;  %v10345_v26 = vpack.c.bf16 %v10335_v22, %v10332_v21  ;;  %v10355_v32 = vld [vmem:[%s10289_s10 + $0x70] sm:$0xff]  ;;  %v10358_v33 = vld [vmem:[%s10289_s10 + $0x78] sm:$0xff]  ;;  %v10361_v34 = vld [vmem:[%s10289_s10 + $0x80] sm:$0xff] }
  0x18   : > { %8540 = vmatpush3.bf16.msra.mxu0 %v988_v13  ;;  %8495 = vmatprep.mubr.msk.bf16.mxu0 %vm388_vm1, %v10321_v16  ;;  %v694_v27 = vrot.slane %v692_v19, 3  ;;  %v697_v28 = vrot.slane %v695_v20, 4  ;;  %v10367_v37 = vpack.c.bf16 %v10355_v32, %v10352_v31  ;;  %v10371_v38 = vpack.c.bf16 %v10361_v34, %v10358_v33  ;;  %v10382_v40 = vld [vmem:[%s10289_s10 + $0x88] sm:$0xff]  ;;  %v10385_v41 = vld [vmem:[%s10289_s10 + $0x90] sm:$0xff]  ;;  %v10388_v42 = vld [vmem:[%s10289_s10 + $0x98] sm:$0xff] }
  0x19   : > { %10159 = vmatprep.subr.msk.bf16.mxu0 %vm461_vm0, %v10315_v15  ;;  %v702_v29 = vrot.slane %v700_v23, 3  ;;  %v705_v30 = vrot.slane %v703_v24, 4  ;;  %v10391_v43 = vld [vmem:[%s10289_s10 + $0xa0] sm:$0xff]  ;;  %v10395_v44 = vpack.c.bf16 %v10385_v41, %v10382_v40  ;;  %v10404_v46 = vld [vmem:[%s10289_s10 + $0xa8] sm:$0xff]  ;;  %v10409_v47 = vld [vmem:[%s10289_s10 + $0xb0] sm:$0xff] }
  0x1a   : > { %v698_v35 = vor.u32 %v697_v28, %v694_v27  ;;  %13707 = vst [vmem:[#allocation3_spill] sm:$0xff] %v10371_v38  ;;  %v10399_v45 = vpack.c.bf16 %v10391_v43, %v10388_v42  ;;  %v10412_v48 = vld [vmem:[%s10289_s10 + $0xb8] sm:$0xff]  ;;  %v10415_v49 = vld [vmem:[%s10289_s10 + $0xc0] sm:$0xff]  ;;  %v10419_v50 = vpack.c.bf16 %v10409_v47, %v10404_v46  ;;  %v10430_v52 = vld [vmem:[%s10289_s10 + $0xc8] sm:$0xff] }
  0x1b   : > { %v10363_v36 = vor.u32 %v705_v30, %v702_v29  ;;  %13708 = vst [vmem:[#allocation4_spill] sm:$0xff] %v10395_v44  ;;  %v10423_v51 = vpack.c.bf16 %v10415_v49, %v10412_v48  ;;  %v10433_v53 = vld [vmem:[%s10289_s10 + $0xd0] sm:$0xff]  ;;  %v10436_v54 = vld [vmem:[%s10289_s10 + $0xd8] sm:$0xff]  ;;  %v10439_v55 = vld [vmem:[%s10289_s10 + $0xe0] sm:$0xff] }
  0x1c   : > { %13709 = vst [vmem:[#allocation5_spill] sm:$0xff] %v10399_v45  ;;  %13710 = vst [vmem:[#allocation6_spill] sm:$0xff] %v10419_v50  ;;  %v10443_v56 = vpack.c.bf16 %v10433_v53, %v10430_v52  ;;  %v10447_v57 = vpack.c.bf16 %v10439_v55, %v10436_v54  ;;  %v10454_v58 = vld [vmem:[%s10289_s10 + $0xe8] sm:$0xff]  ;;  %v10457_v59 = vld [vmem:[%s10289_s10 + $0xf0] sm:$0xff] }
  0x1d   : > { %v10375_v39 = vsel %vm690_vm2, %v698_v35, %v10363_v36  ;;  %13711 = vst [vmem:[#allocation7_spill] sm:$0xff] %v10423_v51  ;;  %v10460_v60 = vld [vmem:[%s10289_s10 + $0xf8] sm:$0xff]  ;;  %v10463_v61 = vld [vmem:[%s10289_s10 + $0x100] sm:$0xff]  ;;  %v10467_v62 = vpack.c.bf16 %v10457_v59, %v10454_v58  ;;  %v10476_v0 = vld [vmem:[%s10289_s10 + $0x108] sm:$0xff] }
  0x1e   : > { %13712 = vst [vmem:[#allocation8_spill] sm:$0xff] %v10443_v56  ;;  %13713 = vst [vmem:[#allocation9_spill] sm:$0xff] %v10447_v57  ;;  %v10471_v63 = vpack.c.bf16 %v10463_v61, %v10460_v60  ;;  %v10481_v1 = vld [vmem:[%s10289_s10 + $0x110] sm:$0xff]  ;;  %v10484_v2 = vld [vmem:[%s10289_s10 + $0x118] sm:$0xff] }
  0x1f   : > { %8496 = vmatmul.mubr.msk.bf16.gmra.mrb[4].mxu0 %vm388_vm1, %v10341_v25  ;;  %13714 = vst [vmem:[#allocation10_spill] sm:$0xff] %v10467_v62  ;;  %v10487_v3 = vld [vmem:[%s10289_s10 + $0x120] sm:$0xff]  ;;  %v10491_v4 = vpack.c.bf16 %v10481_v1, %v10476_v0  ;;  %v10502_v6 = vld [vmem:[%s10289_s10 + $0x128] sm:$0xff]  ;;  %v10505_v10 = vld [vmem:[%s10289_s10 + $0x130] sm:$0xff] }
  0x20   : > { %8499 = vmatprep.mubr.msk.bf16.mxu0 %vm388_vm1, %v10345_v26  ;;  %13715 = vst [vmem:[#allocation11_spill] sm:$0xff] %v10471_v63  ;;  %v10495_v5 = vpack.c.bf16 %v10487_v3, %v10484_v2  ;;  %v10508_v11 = vld [vmem:[%s10289_s10 + $0x138] sm:$0xff]  ;;  %v10511_v13 = vld [vmem:[%s10289_s10 + $0x140] sm:$0xff]  ;;  %v10515_v19 = vpack.c.bf16 %v10505_v10, %v10502_v6  ;;  %v10526_v23 = vld [vmem:[%s10289_s10 + $0x148] sm:$0xff] }
  0x21   : > { %13716 = vst [vmem:[#allocation12_spill] sm:$0xff] %v10491_v4  ;;  %v10519_v20 = vpack.c.bf16 %v10511_v13, %v10508_v11  ;;  %v10529_v24 = vld [vmem:[%s10289_s10 + $0x150] sm:$0xff]  ;;  %v10532_v27 = vld [vmem:[%s10289_s10 + $0x158] sm:$0xff]  ;;  %v10535_v28 = vld [vmem:[%s10289_s10 + $0x160] sm:$0xff] }
  0x22   : > { %13717 = vst [vmem:[#allocation13_spill] sm:$0xff] %v10495_v5  ;;  %13718 = vst [vmem:[#allocation14_spill] sm:$0xff] %v10515_v19  ;;  %v10539_v29 = vpack.c.bf16 %v10529_v24, %v10526_v23  ;;  %v10543_v30 = vpack.c.bf16 %v10535_v28, %v10532_v27  ;;  %v10548_v35 = vld [vmem:[%s10289_s10 + $0x168] sm:$0xff] }
  0x23   : > { %13719 = vst [vmem:[#allocation15_spill] sm:$0xff] %v10519_v20 }
  0x24   : > { %13720 = vst [vmem:[#allocation16_spill] sm:$0xff] %v10539_v29  ;;  %13721 = vst [vmem:[#allocation17_spill] sm:$0xff] %v10543_v30 }
  0x27   : > { %8500 = vmatmul.mubr.msk.bf16.gmra.mrb[8].mxu0 %vm388_vm1, %v10367_v37 }
  0x28   : > { %8503 = vmatprep.mubr.msk.bf16.mxu0 %vm388_vm1, %v10371_v38 }
  0x2f   : > { %8504 = vmatmul.mubr.msk.bf16.gmra.mrb[12].mxu0 %vm388_vm1, %v10395_v44 }
  0x30   : > { %8507 = vmatprep.mubr.msk.bf16.mxu0 %vm388_vm1, %v10399_v45 }
  0x37   : > { %8508 = vmatmul.mubr.msk.bf16.gmra.mrb[16].mxu0 %vm388_vm1, %v10419_v50  ;;  %v10605_v50 = vpack.c.bf16 %v10352_v31, %v10335_v22 }
  0x38   : > { %8511 = vmatprep.mubr.msk.bf16.mxu0 %vm388_vm1, %v10423_v51 }
  0x39   : > { %v13463_v22 = vshrl.u32 %v10605_v50, 16  ;;  %v13464_v31 = vshll.u32 %v10605_v50, 16 }
  0x3f   : > { %8512 = vmatmul.mubr.msk.bf16.gmra.mrb[20].mxu0 %vm388_vm1, %v10443_v56 }
  0x40   : > { %8515 = vmatprep.mubr.msk.bf16.mxu0 %vm388_vm1, %v10447_v57 }
  0x47   : > { %8516 = vmatmul.mubr.msk.bf16.gmra.mrb[24].mxu0 %vm388_vm1, %v10467_v62 }
  0x48   : > { %8519 = vmatprep.mubr.msk.bf16.mxu0 %vm388_vm1, %v10471_v63  ;;  %v10567_v63 = vpack.c.bf16 %v10301_v9, %v10298_v8  ;;  %v10584_v8 = vld [vmem:[%s10289_s10 + $0x188] sm:$0xff]  ;;  %v10587_v9 = vld [vmem:[%s10289_s10 + $0x190] sm:$0xff] }
  0x4a   : > { %v13461_v62 = vshrl.u32 %v10567_v63, 16 }
  0x4c   : > { %v711_v57 = vrot.slane %v13461_v62, 3 }
  0x4f   : > { %8520 = vmatmul.mubr.msk.bf16.gmra.mrb[28].mxu0 %vm388_vm1, %v10491_v4 }
  0x50   : > { %8523 = vmatprep.mubr.msk.bf16.mxu0 %vm388_vm1, %v10495_v5  ;;  %v10559_v5 = vld [vmem:[%s10289_s10 + $0x180] sm:$0xff] }
  0x57   : > { %8524 = vmatmul.mubr.msk.bf16.gmra.mrb[32].mxu0 %vm388_vm1, %v10515_v19  ;;  %v10556_v19 = vld [vmem:[%s10289_s10 + $0x178] sm:$0xff] }
  0x58   : > { %8527 = vmatprep.mubr.msk.bf16.mxu0 %vm388_vm1, %v10519_v20  ;;  %v10553_v20 = vld [vmem:[%s10289_s10 + $0x170] sm:$0xff] }
  0x59   : > { %v10563_v4 = vpack.c.bf16 %v10553_v20, %v10548_v35 }
  0x5b   : > { %13722 = vst [vmem:[#allocation18_spill] sm:$0xff] %v10563_v4 }
  0x5f   : > { %8528 = vmatmul.mubr.msk.bf16.gmra.mrb[36].mxu0 %vm388_vm1, %v10539_v29  ;;  %v10571_v29 = vpack.c.bf16 %v10559_v5, %v10556_v19 }
  0x60   : > { %8531 = vmatprep.mubr.msk.bf16.mxu0 %vm388_vm1, %v10543_v30  ;;  %v10575_v30 = vpack.c.bf16 %v10324_v17, %v10308_v14  ;;  %v10593_v14 = vpack.c.bf16 %v10587_v9, %v10584_v8  ;;  %v10597_v17 = vpack.c.bf16 %v10332_v21, %v10327_v18 }
  0x61   : > { %13723 = vst [vmem:[#allocation19_spill] sm:$0xff] %v10571_v29 }
  0x62   : > { %v13462_v56 = vshrl.u32 %v10575_v30, 16  ;;  %v13725_v45 = vshll.u32 %v10575_v30, 16  ;;  %v13465_v21 = vshrl.u32 %v10597_v17, 16 }
  0x64   : > { %v720_v51 = vrot.slane %v13462_v56, 3  ;;  %v723_v44 = vrot.slane %v13725_v45, 4  ;;  %v1464_v56 = vsel %vm461_vm0, %v10315_v15, 0  ;;  %v10623_v45 = vpack.c.bf16 %v10358_v33, %v10355_v32  ;;  %v10643_v33 = vld [vmem:[%s13422_s1 + $0x8] sm:$0x3] }
  0x65   : > { %v738_v15 = vrot.slane %v13463_v22, 3  ;;  %v741_v32 = vrot.slane %v13464_v31, 4 }
  0x66   : > { %v724_v62 = vor.u32 %v723_v44, %v720_v51  ;;  %v10633_v51 = vpack.c.bf16 %v10382_v40, %v10361_v34  ;;  %v13498_v40 = vshll.u32 %v10623_v45, 16 }
  0x67   : > { %8532 = vmatmul.mubr.msk.bf16.gmra.mrb[40].mxu0 %vm388_vm1, %v10563_v4 }
  0x68   : > { %8535 = vmatprep.mubr.msk.bf16.mxu0 %vm388_vm1, %v10571_v29  ;;  %v13724_v29 = vshll.u32 %v10567_v63, 16  ;;  %v13466_v22 = vshrl.u32 %v10633_v51, 16  ;;  %v13467_v31 = vshll.u32 %v10633_v51, 16 }
  0x6a   : > { %v714_v4 = vrot.slane %v13724_v29, 4  ;;  %v13500_v29 = vshll.u32 %v10597_v17, 16 }
  0x6c   : > { %v715_v18 = vor.u32 %v714_v4, %v711_v57  ;;  %v729_v57 = vrot.slane %v13465_v21, 3  ;;  %v732_v44 = vrot.slane %v13500_v29, 4  ;;  %v10655_v21 = vpack.c.bf16 %v10388_v42, %v10385_v41 }
  0x6d   : > { %v756_v41 = vrot.slane %v13466_v22, 3  ;;  %v759_v42 = vrot.slane %v13467_v31, 4  ;;  %v10685_v22 = vpack.c.bf16 %v10412_v48, %v10409_v47 }
  0x6e   : > { %v725_v4 = vsel %vm690_vm2, %v715_v18, %v724_v62  ;;  %v733_v34 = vor.u32 %v732_v44, %v729_v57  ;;  %v750_v57 = vrot.slane %v13498_v40, 4  ;;  %v10666_v44 = vpack.c.bf16 %v10404_v46, %v10391_v43 }
  0x6f   : > { %8536 = vmatmul.mubr.msk.bf16.gmra.mrb[44].mxu0 %vm388_vm1, %v10593_v14  ;;  %v13472_v43 = vshll.u32 %v10655_v21, 16  ;;  %v760_v46 = vor.u32 %v759_v42, %v756_v41  ;;  %v13473_v42 = vshrl.u32 %v10685_v22, 16 }
  0x70   : > { %8541 = vmatprep.mubr.msk.bf16.mxu0 %vm388_vm1, %v10375_v39  ;;  %v716_v39 = vsel %vm690_vm2, %v10363_v36, %v715_v18  ;;  %v13468_v36 = vshrl.u32 %v10623_v45, 16  ;;  %v742_v18 = vor.u32 %v741_v32, %v738_v15  ;;  %v13469_v15 = vshrl.u32 %v10655_v21, 16 }
  0x71   : > { %v13470_v32 = vshrl.u32 %v10666_v44, 16 }
  0x73   : > { %v774_v47 = vrot.slane %v13470_v32, 3  ;;  %v10715_v32 = vpack.c.bf16 %v10436_v54, %v10433_v53 }
  0x77   : > { %8542 = vmatmul.mubr.msk.bf16.vlgmr.msra.gmra.mrb[0].mxu0 %vm388_vm1, %v716_v39  ;;  %v747_v39 = vrot.slane %v13468_v36, 3  ;;  %v765_v36 = vrot.slane %v13469_v15, 3 }
  0x78   : > { %8590 = vmatpush3.bf16.msra.mxu0 %v1464_v56  ;;  %8545 = vmatprep.mubr.msk.bf16.mxu0 %vm388_vm1, %v725_v4  ;;  %v10658_v56 = vsel %vm690_vm2, %v724_v62, %v733_v34  ;;  %v10669_v4 = vsel %vm690_vm2, %v733_v34, %v742_v18  ;;  %v13471_v34 = vshll.u32 %v10666_v44, 16 }
  0x79   : > { %10160 = vmatprep.subr.msk.bf16.mxu0 %vm461_vm0, %v10643_v33  ;;  %13726 = vst [vmem:[#allocation20_spill] sm:$0xff] %v10658_v56  ;;  %13727 = vst [vmem:[#allocation21_spill] sm:$0xff] %v10669_v4  ;;  %v751_v62 = vor.u32 %v750_v57, %v747_v39  ;;  %v768_v39 = vrot.slane %v13472_v43, 4  ;;  %v10696_v57 = vpack.c.bf16 %v10430_v52, %v10415_v49  ;;  %v13476_v49 = vshll.u32 %v10685_v22, 16 }
  0x7a   : > { %v777_v48 = vrot.slane %v13471_v34, 4  ;;  %v783_v43 = vrot.slane %v13473_v42, 3 }
  0x7b   : > { %v10688_v31 = vsel %vm690_vm2, %v742_v18, %v751_v62  ;;  %v10699_v41 = vsel %vm690_vm2, %v751_v62, %v760_v46  ;;  %v769_v18 = vor.u32 %v768_v39, %v765_v36  ;;  %v13474_v62 = vshrl.u32 %v10696_v57, 16 }
  0x7c   : > { %13728 = vst [vmem:[#allocation22_spill] sm:$0xff] %v10688_v31  ;;  %13729 = vst [vmem:[#allocation23_spill] sm:$0xff] %v10699_v41  ;;  %v778_v52 = vor.u32 %v777_v48, %v774_v47  ;;  %v13475_v15 = vshll.u32 %v10696_v57, 16  ;;  %v786_v36 = vrot.slane %v13476_v49, 4  ;;  %v10726_v39 = vpack.c.bf16 %v10454_v58, %v10439_v55 }
  0x7d   : > { %v10718_v34 = vsel %vm690_vm2, %v760_v46, %v769_v18  ;;  %v792_v53 = vrot.slane %v13474_v62, 3  ;;  %v13477_v48 = vshrl.u32 %v10715_v32, 16  ;;  %v13480_v55 = vshll.u32 %v10715_v32, 16 }
  0x7e   : > { %13730 = vst [vmem:[#allocation24_spill] sm:$0xff] %v10718_v34  ;;  %v10729_v47 = vsel %vm690_vm2, %v769_v18, %v778_v52  ;;  %v795_v54 = vrot.slane %v13475_v15, 4  ;;  %v787_v46 = vor.u32 %v786_v36, %v783_v43  ;;  %v13478_v18 = vshrl.u32 %v10726_v39, 16 }
  0x7f   : > { %8546 = vmatmul.mubr.msk.bf16.gmra.mrb[4].mxu0 %vm388_vm1, %v10658_v56  ;;  %13731 = vst [vmem:[#allocation25_spill] sm:$0xff] %v10729_v47  ;;  %v13479_v42 = vshll.u32 %v10726_v39, 16  ;;  %v10745_v62 = vpack.c.bf16 %v10460_v60, %v10457_v59  ;;  %v801_v49 = vrot.slane %v13477_v48, 3  ;;  %v804_v43 = vrot.slane %v13480_v55, 4 }
  0x80   : > { %8549 = vmatprep.mubr.msk.bf16.mxu0 %vm388_vm1, %v10669_v4  ;;  %v796_v58 = vor.u32 %v795_v54, %v792_v53  ;;  %v10748_v15 = vsel %vm690_vm2, %v778_v52, %v787_v46  ;;  %v10756_v36 = vpack.c.bf16 %v10476_v0, %v10463_v61  ;;  %v810_v59 = vrot.slane %v13478_v18, 3 }
  0x81   : > { %13732 = vst [vmem:[#allocation26_spill] sm:$0xff] %v10748_v15  ;;  %v813_v60 = vrot.slane %v13479_v42, 4  ;;  %v805_v52 = vor.u32 %v804_v43, %v801_v49  ;;  %v13481_v54 = vshrl.u32 %v10745_v62, 16  ;;  %v13484_v61 = vshll.u32 %v10745_v62, 16 }
  0x82   : > { %v10759_v53 = vsel %vm690_vm2, %v787_v46, %v796_v58  ;;  %v13482_v46 = vshrl.u32 %v10756_v36, 16  ;;  %v13483_v48 = vshll.u32 %v10756_v36, 16  ;;  %v10775_v18 = vpack.c.bf16 %v10484_v2, %v10481_v1 }
  0x83   : > { %13733 = vst [vmem:[#allocation27_spill] sm:$0xff] %v10759_v53  ;;  %v814_v0 = vor.u32 %v813_v60, %v810_v59  ;;  %v10778_v42 = vsel %vm690_vm2, %v796_v58, %v805_v52  ;;  %v819_v55 = vrot.slane %v13481_v54, 3  ;;  %v822_v49 = vrot.slane %v13484_v61, 4 }
  0x84   : > { %13734 = vst [vmem:[#allocation28_spill] sm:$0xff] %v10778_v42  ;;  %v10786_v43 = vpack.c.bf16 %v10502_v6, %v10487_v3  ;;  %v828_v1 = vrot.slane %v13482_v46, 3  ;;  %v831_v2 = vrot.slane %v13483_v48, 4  ;;  %v13485_v60 = vshrl.u32 %v10775_v18, 16 }
  0x85   : > { %v10789_v59 = vsel %vm690_vm2, %v805_v52, %v814_v0  ;;  %v823_v58 = vor.u32 %v822_v49, %v819_v55  ;;  %v13488_v3 = vshll.u32 %v10775_v18, 16  ;;  %v10805_v46 = vpack.c.bf16 %v10508_v11, %v10505_v10 }
  0x86   : > { %13735 = vst [vmem:[#allocation29_spill] sm:$0xff] %v10789_v59  ;;  %v832_v6 = vor.u32 %v831_v2, %v828_v1  ;;  %v13486_v52 = vshrl.u32 %v10786_v43, 16  ;;  %v13487_v54 = vshll.u32 %v10786_v43, 16  ;;  %v837_v61 = vrot.slane %v13485_v60, 3 }
  0x87   : > { %8550 = vmatmul.mubr.msk.bf16.gmra.mrb[8].mxu0 %vm388_vm1, %v10688_v31  ;;  %v10808_v48 = vsel %vm690_vm2, %v814_v0, %v823_v58  ;;  %v840_v55 = vrot.slane %v13488_v3, 4  ;;  %v10816_v49 = vpack.c.bf16 %v10526_v23, %v10511_v13  ;;  %v13489_v2 = vshrl.u32 %v10805_v46, 16 }
  0x88   : > { %8553 = vmatprep.mubr.msk.bf16.mxu0 %vm388_vm1, %v10699_v41  ;;  %13736 = vst [vmem:[#allocation30_spill] sm:$0xff] %v10808_v48  ;;  %v10819_v1 = vsel %vm690_vm2, %v823_v58, %v832_v6  ;;  %v846_v10 = vrot.slane %v13486_v52, 3  ;;  %v849_v11 = vrot.slane %v13487_v54, 4  ;;  %v13492_v13 = vshll.u32 %v10805_v46, 16 }
  0x89   : > { %13737 = vst [vmem:[#allocation31_spill] sm:$0xff] %v10819_v1  ;;  %v841_v0 = vor.u32 %v840_v55, %v837_v61  ;;  %v13490_v58 = vshrl.u32 %v10816_v49, 16  ;;  %v13491_v60 = vshll.u32 %v10816_v49, 16  ;;  %v10835_v52 = vpack.c.bf16 %v10532_v27, %v10529_v24 }
  0x8a   : > { %v850_v23 = vor.u32 %v849_v11, %v846_v10  ;;  %v855_v3 = vrot.slane %v13489_v2, 3  ;;  %v858_v61 = vrot.slane %v13492_v13, 4  ;;  %v10846_v55 = vpack.c.bf16 %v10548_v35, %v10535_v28 }
  0x8b   : > { %v10838_v54 = vsel %vm690_vm2, %v832_v6, %v841_v0  ;;  %v864_v24 = vrot.slane %v13490_v58, 3  ;;  %v867_v27 = vrot.slane %v13491_v60, 4  ;;  %v13493_v11 = vshrl.u32 %v10835_v52, 16 }
  0x8c   : > { %13738 = vst [vmem:[#allocation32_spill] sm:$0xff] %v10838_v54  ;;  %v10849_v10 = vsel %vm690_vm2, %v841_v0, %v850_v23  ;;  %v859_v6 = vor.u32 %v858_v61, %v855_v3  ;;  %v13496_v28 = vshll.u32 %v10835_v52, 16  ;;  %v13494_v0 = vshrl.u32 %v10846_v55, 16 }
  0x8d   : > { %13739 = vst [vmem:[#allocation33_spill] sm:$0xff] %v10849_v10  ;;  %v868_v35 = vor.u32 %v867_v27, %v864_v24  ;;  %v13495_v2 = vshll.u32 %v10846_v55, 16  ;;  %v10865_v58 = vpack.c.bf16 %v10556_v19, %v10553_v20  ;;  %v873_v13 = vrot.slane %v13493_v11, 3 }
  0x8e   : > { %v10868_v60 = vsel %vm690_vm2, %v850_v23, %v859_v6  ;;  %v876_v3 = vrot.slane %v13496_v28, 4  ;;  %v10876_v61 = vpack.c.bf16 %v10584_v8, %v10559_v5  ;;  %v882_v19 = vrot.slane %v13494_v0, 3 }
  0x8f   : > { %8554 = vmatmul.mubr.msk.bf16.gmra.mrb[12].mxu0 %vm388_vm1, %v10718_v34  ;;  %13740 = vst [vmem:[#allocation34_spill] sm:$0xff] %v10868_v60  ;;  %v10879_v24 = vsel %vm690_vm2, %v859_v6, %v868_v35  ;;  %v885_v20 = vrot.slane %v13495_v2, 4  ;;  %v13497_v27 = vshrl.u32 %v10865_v58, 16  ;;  %v13499_v5 = vshll.u32 %v10865_v58, 16 }
  0x90   : > { %8557 = vmatprep.mubr.msk.bf16.mxu0 %vm388_vm1, %v10729_v47  ;;  %13741 = vst [vmem:[#allocation35_spill] sm:$0xff] %v10879_v24  ;;  %v877_v23 = vor.u32 %v876_v3, %v873_v13  ;;  %v13501_v6 = vshrl.u32 %v10876_v61, 16  ;;  %v13503_v11 = vshll.u32 %v10876_v61, 16  ;;  %v360_v0 = vpack.c.bf16 %v10587_v9, %v10587_v9  ;;  %v13776_v47 = vld [vmem:[#allocation17_spill] sm:$0xff] }
  0x91   : > { %v886_v8 = vor.u32 %v885_v20, %v882_v19  ;;  %v891_v28 = vrot.slane %v13497_v27, 3  ;;  %v894_v13 = vrot.slane %v13499_v5, 4  ;;  %v1221_v5 = vshll.u32 %v10295_v7, 16 }
  0x92   : > { %v10896_v2 = vsel %vm690_vm2, %v868_v35, %v877_v23  ;;  %v900_v19 = vrot.slane %v13501_v6, 3  ;;  %v903_v20 = vrot.slane %v13503_v11, 4  ;;  %v907_v27 = vshrl.u32 %v360_v0, 16 }
  0x93   : > { %13742 = vst [vmem:[#allocation36_spill] sm:$0xff] %v10896_v2  ;;  %v10903_v3 = vsel %vm690_vm2, %v877_v23, %v886_v8  ;;  %v895_v35 = vor.u32 %v894_v13, %v891_v28  ;;  %v910_v40 = vshll.u32 %v360_v0, 16  ;;  %v1219_v11 = vshrl.u32 %v10295_v7, 16 }
  0x94   : > { %13743 = vst [vmem:[#allocation37_spill] sm:$0xff] %v10903_v3  ;;  %v10914_v29 = vor.u32 %v903_v20, %v900_v19  ;;  %v909_v6 = vrot.slane %v907_v27, 3  ;;  %v13508_v28 = vshll.u32 %v10304_v12, 16  ;;  %v13506_v7 = vshll.u32 %v10321_v16, 16 }
  0x95   : > { %v10917_v23 = vsel %vm690_vm2, %v886_v8, %v895_v35  ;;  %v13507_v19 = vshrl.u32 %v10321_v16, 16  ;;  %v13514_v20 = vshll.u32 %v10341_v25, 16  ;;  %v13573_v34 = vshll.u32 %v13776_v47, 16 }
  0x96   : > { %13744 = vst [vmem:[#allocation38_spill] sm:$0xff] %v10914_v29  ;;  %13745 = vst [vmem:[#allocation39_spill] sm:$0xff] %v10917_v23  ;;  %v13794_v4 = vshrl.u32 %v10371_v38, 16 }
  0x97   : > { %8558 = vmatmul.mubr.msk.bf16.gmra.mrb[16].mxu0 %vm388_vm1, %v10748_v15 }
  0x98   : > { %8561 = vmatprep.mubr.msk.bf16.mxu0 %vm388_vm1, %v10759_v53  ;;  %v13772_v53 = vshrl.u32 %v10341_v25, 16  ;;  %v2044_v56 = vrot.slane %v13794_v4, 3 }
  0x9f   : > { %8562 = vmatmul.mubr.msk.bf16.gmra.mrb[20].mxu0 %vm388_vm1, %v10778_v42  ;;  %v13771_v42 = vshll.u32 %v10341_v25, 16 }
  0xa0   : > { %8565 = vmatprep.mubr.msk.bf16.mxu0 %vm388_vm1, %v10789_v59  ;;  %v13769_v59 = vld [vmem:[#allocation14_spill] sm:$0xff] }
  0xa7   : > { %8566 = vmatmul.mubr.msk.bf16.gmra.mrb[24].mxu0 %vm388_vm1, %v10808_v48 }
  0xa8   : > { %8569 = vmatprep.mubr.msk.bf16.mxu0 %vm388_vm1, %v10819_v1  ;;  %v13765_v1 = vld [vmem:[#allocation12_spill] sm:$0xff] }
  0xaf   : > { %8570 = vmatmul.mubr.msk.bf16.gmra.mrb[28].mxu0 %vm388_vm1, %v10838_v54 }
  0xb0   : > { %8573 = vmatprep.mubr.msk.bf16.mxu0 %vm388_vm1, %v10849_v10  ;;  %v13761_v10 = vld [vmem:[#allocation10_spill] sm:$0xff] }
  0xb7   : > { %8574 = vmatmul.mubr.msk.bf16.gmra.mrb[32].mxu0 %vm388_vm1, %v10868_v60  ;;  %v1223_v60 = vrot.slane %v1221_v5, 1  ;;  %v13512_v5 = vshrl.u32 %v10304_v12, 16 }
  0xb8   : > { %8577 = vmatprep.mubr.msk.bf16.mxu0 %vm388_vm1, %v10879_v24  ;;  %v912_v24 = vrot.slane %v910_v40, 4  ;;  %v1227_v40 = vrot.slane %v13508_v28, 1 }
  0xb9   : > { %v1224_v8 = vor.u32 %v1223_v60, %v1219_v11  ;;  %v1234_v60 = vrot.slane %v13506_v7, 1 }
  0xba   : > { %v913_v0 = vor.u32 %v912_v24, %v909_v6  ;;  %v1231_v11 = vor.u32 %v13512_v5, %v1227_v40  ;;  %v1241_v6 = vrot.slane %v13514_v20, 1  ;;  %v13750_v5 = vld [vmem:[#allocation5_spill] sm:$0xff] }
  0xbb   : > { %v1228_v13 = vsel %vm1218_vm3, %v1224_v8, %v1227_v40  ;;  %v1238_v24 = vor.u32 %v13507_v19, %v1234_v60  ;;  %v13513_v8 = vshrl.u32 %v10341_v25, 16  ;;  %v13510_v40 = vshrl.u32 %v10345_v26, 16  ;;  %v10959_v19 = vld [vmem:[%s13422_s1 + $0x6] sm:$0x3] }
  0xbc   : > { %v914_v27 = vsel %vm690_vm2, %v10914_v29, %v913_v0  ;;  %v1235_v0 = vsel %vm1218_vm3, %v1231_v11, %v1234_v60 }
  0xbd   : > { %v1242_v7 = vsel %vm1218_vm3, %v1238_v24, %v1241_v6 }
  0xbf   : > { %8578 = vmatmul.mubr.msk.bf16.gmra.mrb[36].mxu0 %vm388_vm1, %v10896_v2  ;;  %v10922_v2 = vsel %vm690_vm2, %v895_v35, %v10914_v29  ;;  %v13509_v35 = vshll.u32 %v10345_v26, 16 }
  0xc0   : > { %8581 = vmatprep.mubr.msk.bf16.mxu0 %vm388_vm1, %v10903_v3  ;;  %13746 = vst [vmem:[#allocation40_spill] sm:$0xff] %v10922_v2 }
  0xc1   : > { %v1248_v60 = vrot.slane %v13509_v35, 1  ;;  %v13749_v35 = vld [vmem:[#allocation4_spill] sm:$0xff] }
  0xc3   : > { %v1252_v11 = vor.u32 %v13510_v40, %v1248_v60  ;;  %v13519_v40 = vshll.u32 %v13749_v35, 16 }
  0xc7   : > { %8582 = vmatmul.mubr.msk.bf16.gmra.mrb[40].mxu0 %vm388_vm1, %v10917_v23  ;;  %v13757_v23 = vld [vmem:[#allocation8_spill] sm:$0xff] }
  0xc8   : > { %8585 = vmatprep.mubr.msk.bf16.mxu0 %vm388_vm1, %v10922_v2  ;;  %v13753_v2 = vld [vmem:[#allocation6_spill] sm:$0xff] }
  0xcf   : > { %8586 = vmatmul.mubr.msk.bf16.gmra.mrb[44].mxu0 %vm388_vm1, %v914_v27  ;;  %v1798_v27 = vsel %vm461_vm0, %v10643_v33, 0  ;;  %v1245_v33 = vor.u32 %v13513_v8, %v1241_v6  ;;  %v13520_v6 = vshrl.u32 %v10371_v38, 16  ;;  %v13524_v8 = vshll.u32 %v13750_v5, 16 }
  0xd0   : > { %8591 = vmatprep.mubr.msk.bf16.mxu0 %vm388_vm1, %v1228_v13  ;;  %v13511_v13 = vshll.u32 %v10367_v37, 16 }
  0xd1   : > { %v10975_v28 = vsel %vm1218_vm3, %v1245_v33, %v1248_v60 }
  0xd2   : > { %v1255_v24 = vrot.slane %v13511_v13, 1  ;;  %13747 = vst [vmem:[#allocation41_spill] sm:$0xff] %v10975_v28 }
  0xd7   : > { %8592 = vmatmul.mubr.msk.bf16.vlgmr.msra.gmra.mrb[0].mxu0 %vm388_vm1, %v1235_v0  ;;  %v13516_v0 = vshll.u32 %v10371_v38, 16 }
  0xd8   : > { %8640 = vmatpush3.bf16.msra.mxu0 %v1798_v27  ;;  %8595 = vmatprep.mubr.msk.bf16.mxu0 %vm388_vm1, %v1242_v7  ;;  %v13521_v27 = vshrl.u32 %v10367_v37, 16  ;;  %v10979_v7 = vsel %vm1218_vm3, %v1252_v11, %v1255_v24  ;;  %v1269_v11 = vrot.slane %v13519_v40, 1  ;;  %v1276_v40 = vrot.slane %v13524_v8, 1 }
  0xd9   : > { %10161 = vmatprep.subr.msk.bf16.mxu0 %vm461_vm0, %v10959_v19  ;;  %13748 = vst [vmem:[#allocation42_spill] sm:$0xff] %v10979_v7  ;;  %v1262_v13 = vrot.slane %v13516_v0, 1 }
  0xda   : > { %v1259_v60 = vor.u32 %v13521_v27, %v1255_v24  ;;  %v13527_v24 = vshll.u32 %v13753_v2, 16 }
  0xdb   : > { %v1266_v33 = vor.u32 %v13520_v6, %v1262_v13  ;;  %v13754_v6 = vld [vmem:[#allocation7_spill] sm:$0xff] }
  0xdc   : > { %v10997_v20 = vsel %vm1218_vm3, %v1259_v60, %v1262_v13  ;;  %v13532_v27 = vshll.u32 %v13754_v6, 16 }
  0xdd   : > { %13751 = vst [vmem:[#allocation43_spill] sm:$0xff] %v10997_v20  ;;  %v11001_v0 = vsel %vm1218_vm3, %v1266_v33, %v1269_v11  ;;  %v1283_v33 = vrot.slane %v13527_v24, 1 }
  0xde   : > { %13752 = vst [vmem:[#allocation44_spill] sm:$0xff] %v11001_v0  ;;  %v1290_v24 = vrot.slane %v13532_v27, 1 }
  0xdf   : > { %8596 = vmatmul.mubr.msk.bf16.gmra.mrb[4].mxu0 %vm388_vm1, %v10975_v28  ;;  %v13529_v28 = vshrl.u32 %v13749_v35, 16 }
  0xe0   : > { %8599 = vmatprep.mubr.msk.bf16.mxu0 %vm388_vm1, %v10979_v7  ;;  %v13528_v7 = vshrl.u32 %v13750_v5, 16 }
  0xe1   : > { %v1273_v13 = vor.u32 %v13529_v28, %v1269_v11  ;;  %v13535_v11 = vshll.u32 %v13757_v23, 16 }
  0xe2   : > { %v1280_v60 = vor.u32 %v13528_v7, %v1276_v40  ;;  %v13758_v7 = vld [vmem:[#allocation9_spill] sm:$0xff] }
  0xe3   : > { %v11019_v29 = vsel %vm1218_vm3, %v1273_v13, %v1276_v40  ;;  %v13540_v28 = vshll.u32 %v13758_v7, 16 }
  0xe4   : > { %13755 = vst [vmem:[#allocation6_spill] sm:$0xff] %v11019_v29  ;;  %v11023_v8 = vsel %vm1218_vm3, %v1280_v60, %v1283_v33  ;;  %v1297_v60 = vrot.slane %v13535_v11, 1 }
  0xe5   : > { %13756 = vst [vmem:[#allocation7_spill] sm:$0xff] %v11023_v8  ;;  %v1304_v11 = vrot.slane %v13540_v28, 1 }
  0xe7   : > { %8600 = vmatmul.mubr.msk.bf16.gmra.mrb[8].mxu0 %vm388_vm1, %v10997_v20  ;;  %v13537_v20 = vshrl.u32 %v13753_v2, 16 }
  0xe8   : > { %8603 = vmatprep.mubr.msk.bf16.mxu0 %vm388_vm1, %v11001_v0  ;;  %v13536_v0 = vshrl.u32 %v13754_v6, 16 }
  0xe9   : > { %v1287_v40 = vor.u32 %v13537_v20, %v1283_v33  ;;  %v13543_v33 = vshll.u32 %v13761_v10, 16 }
  0xea   : > { %v1294_v13 = vor.u32 %v13536_v0, %v1290_v24  ;;  %v13762_v0 = vld [vmem:[#allocation11_spill] sm:$0xff] }
  0xeb   : > { %v11041_v3 = vsel %vm1218_vm3, %v1287_v40, %v1290_v24  ;;  %v13548_v20 = vshll.u32 %v13762_v0, 16 }
  0xec   : > { %13759 = vst [vmem:[#allocation8_spill] sm:$0xff] %v11041_v3  ;;  %v11045_v27 = vsel %vm1218_vm3, %v1294_v13, %v1297_v60  ;;  %v1311_v13 = vrot.slane %v13543_v33, 1 }
  0xed   : > { %13760 = vst [vmem:[#allocation9_spill] sm:$0xff] %v11045_v27  ;;  %v1318_v33 = vrot.slane %v13548_v20, 1 }
  0xef   : > { %8604 = vmatmul.mubr.msk.bf16.gmra.mrb[12].mxu0 %vm388_vm1, %v11019_v29  ;;  %v13545_v29 = vshrl.u32 %v13757_v23, 16 }
  0xf0   : > { %8607 = vmatprep.mubr.msk.bf16.mxu0 %vm388_vm1, %v11023_v8  ;;  %v13544_v8 = vshrl.u32 %v13758_v7, 16 }
  0xf1   : > { %v1301_v24 = vor.u32 %v13545_v29, %v1297_v60  ;;  %v13551_v60 = vshll.u32 %v13765_v1, 16 }
  0xf2   : > { %v1308_v40 = vor.u32 %v13544_v8, %v1304_v11  ;;  %v13766_v8 = vld [vmem:[#allocation13_spill] sm:$0xff] }
  0xf3   : > { %v11063_v54 = vsel %vm1218_vm3, %v1301_v24, %v1304_v11  ;;  %v13557_v29 = vshll.u32 %v13766_v8, 16 }
  0xf4   : > { %13763 = vst [vmem:[#allocation10_spill] sm:$0xff] %v11063_v54  ;;  %v11067_v28 = vsel %vm1218_vm3, %v1308_v40, %v1311_v13  ;;  %v1325_v40 = vrot.slane %v13551_v60, 1 }
  0xf5   : > { %13764 = vst [vmem:[#allocation11_spill] sm:$0xff] %v11067_v28  ;;  %v1332_v60 = vrot.slane %v13557_v29, 1  ;;  %v2032_v29 = vrot.slane %v13772_v53, 3 }
  0xf7   : > { %8608 = vmatmul.mubr.msk.bf16.gmra.mrb[16].mxu0 %vm388_vm1, %v11041_v3  ;;  %v13553_v3 = vshrl.u32 %v13761_v10, 16 }
  0xf8   : > { %8611 = vmatprep.mubr.msk.bf16.mxu0 %vm388_vm1, %v11045_v27  ;;  %v13552_v27 = vshrl.u32 %v13762_v0, 16 }
  0xf9   : > { %v1315_v11 = vor.u32 %v13553_v3, %v1311_v13  ;;  %v13562_v13 = vshll.u32 %v13769_v59, 16 }
  0xfa   : > { %v1322_v24 = vor.u32 %v13552_v27, %v1318_v33  ;;  %v13770_v27 = vld [vmem:[#allocation15_spill] sm:$0xff] }
  0xfb   : > { %v11085_v48 = vsel %vm1218_vm3, %v1315_v11, %v1318_v33  ;;  %v13566_v3 = vshll.u32 %v13770_v27, 16 }
  0xfc   : > { %13767 = vst [vmem:[#allocation12_spill] sm:$0xff] %v11085_v48  ;;  %v11089_v20 = vsel %vm1218_vm3, %v1322_v24, %v1325_v40  ;;  %v1339_v24 = vrot.slane %v13562_v13, 1 }
  0xfd   : > { %13768 = vst [vmem:[#allocation13_spill] sm:$0xff] %v11089_v20 }
  0xff   : > { %8612 = vmatmul.mubr.msk.bf16.gmra.mrb[20].mxu0 %vm388_vm1, %v11063_v54  ;;  %v13561_v54 = vshrl.u32 %v13765_v1, 16 }
 0x100   : > { %8615 = vmatprep.mubr.msk.bf16.mxu0 %vm388_vm1, %v11067_v28  ;;  %v13560_v28 = vshrl.u32 %v13766_v8, 16 }
 0x101   : > { %v1329_v33 = vor.u32 %v13561_v54, %v1325_v40  ;;  %v13775_v54 = vld [vmem:[#allocation16_spill] sm:$0xff] }
 0x102   : > { %v1336_v11 = vor.u32 %v13560_v28, %v1332_v60  ;;  %v13569_v28 = vshrl.u32 %v13770_v27, 16  ;;  %v13568_v13 = vshll.u32 %v13775_v54, 16 }
 0x103   : > { %v11111_v15 = vsel %vm1218_vm3, %v1329_v33, %v1332_v60 }
 0x104   : > { %13773 = vst [vmem:[#allocation14_spill] sm:$0xff] %v11111_v15  ;;  %v11115_v40 = vsel %vm1218_vm3, %v1336_v11, %v1339_v24  ;;  %v1353_v11 = vrot.slane %v13568_v13, 1  ;;  %v1360_v13 = vrot.slane %v13573_v34, 1 }
 0x105   : > { %13774 = vst [vmem:[#allocation15_spill] sm:$0xff] %v11115_v40 }
 0x107   : > { %8616 = vmatmul.mubr.msk.bf16.gmra.mrb[24].mxu0 %vm388_vm1, %v11085_v48  ;;  %v2033_v48 = vrot.slane %v13771_v42, 4  ;;  %v1346_v42 = vrot.slane %v13566_v3, 1  ;;  %v13575_v3 = vshrl.u32 %v13775_v54, 16 }
 0x108   : > { %8619 = vmatprep.mubr.msk.bf16.mxu0 %vm388_vm1, %v11089_v20  ;;  %v13570_v20 = vshrl.u32 %v13769_v59, 16 }
 0x109   : > { %v11127_v60 = vor.u32 %v2033_v48, %v2032_v29  ;;  %v1350_v33 = vor.u32 %v13569_v28, %v1346_v42  ;;  %v13577_v29 = vshrl.u32 %v13776_v47, 16  ;;  %v13779_v48 = vld [vmem:[#allocation18_spill] sm:$0xff]  ;;  %v13780_v28 = vld [vmem:[#allocation19_spill] sm:$0xff] }
 0x10a   : > { %v1343_v53 = vor.u32 %v13570_v20, %v1339_v24  ;;  %v13576_v24 = vshll.u32 %v13779_v48, 16  ;;  %v13579_v20 = vshll.u32 %v13780_v28, 16 }
 0x10f   : > { %8620 = vmatmul.mubr.msk.bf16.gmra.mrb[28].mxu0 %vm388_vm1, %v11111_v15  ;;  %v11135_v15 = vsel %vm1218_vm3, %v1343_v53, %v1346_v42  ;;  %v1357_v42 = vor.u32 %v13575_v3, %v1353_v11  ;;  %v1364_v53 = vor.u32 %v13577_v29, %v1360_v13  ;;  %v11166_v3 = vld [vmem:[%s10289_s10 + $0x198] sm:$0xff] }
 0x110   : > { %8623 = vmatprep.mubr.msk.bf16.mxu0 %vm388_vm1, %v11115_v40  ;;  %13777 = vst [vmem:[#allocation16_spill] sm:$0xff] %v11135_v15  ;;  %v11139_v40 = vsel %vm1218_vm3, %v1350_v33, %v1353_v11  ;;  %v1367_v33 = vrot.slane %v13576_v24, 1  ;;  %v13582_v11 = vshll.u32 %v10593_v14, 16  ;;  %v1374_v24 = vrot.slane %v13579_v20, 1 }
 0x111   : > { %13778 = vst [vmem:[#allocation17_spill] sm:$0xff] %v11139_v40  ;;  %v11157_v41 = vsel %vm1218_vm3, %v1357_v42, %v1360_v13  ;;  %v1215_v42 = vpack.c.bf16 %v11166_v3, %v11166_v3  ;;  %v13583_v20 = vshrl.u32 %v10593_v14, 16 }
 0x112   : > { %13781 = vst [vmem:[#allocation18_spill] sm:$0xff] %v11157_v41  ;;  %v11161_v34 = vsel %vm1218_vm3, %v1364_v53, %v1367_v33  ;;  %v1381_v29 = vrot.slane %v13582_v11, 1 }
 0x113   : > { %13782 = vst [vmem:[#allocation19_spill] sm:$0xff] %v11161_v34  ;;  %v1387_v31 = vshll.u32 %v1215_v42, 16  ;;  %v7708_v42 = vld [vmem:[%s13422_s1 + $0xa] sm:$0x3] }
 0x115   : > { %v1389_v11 = vrot.slane %v1387_v31, 1  ;;  %v11250_v31 = vpack.c.bf16 %v11166_v3, %v10587_v9  ;;  %v11265_v9 = vld [vmem:[%s10289_s10 + $0x1a0] sm:$0xff] }
 0x117   : > { %8624 = vmatmul.mubr.msk.bf16.gmra.mrb[32].mxu0 %vm388_vm1, %v11135_v15  ;;  %v13585_v15 = vshrl.u32 %v13779_v48, 16 }
 0x118   : > { %8627 = vmatprep.mubr.msk.bf16.mxu0 %vm388_vm1, %v11139_v40  ;;  %v13584_v40 = vshrl.u32 %v13780_v28, 16 }
 0x119   : > { %v1371_v13 = vor.u32 %v13585_v15, %v1367_v33  ;;  %v11195_v33 = vor.u32 %v13583_v20, %v1381_v29  ;;  %v13789_v20 = vshll.u32 %v10321_v16, 16  ;;  %v11268_v15 = vld [vmem:[%s10289_s10 + $0x1a8] sm:$0xff] }
 0x11a   : > { %v1378_v53 = vor.u32 %v13584_v40, %v1374_v24 }
 0x11b   : > { %13785 = vst [vmem:[#allocation47_spill] sm:$0xff] %v11195_v33  ;;  %v2029_v40 = vrot.slane %v13789_v20, 4 }
 0x11f   : > { %8628 = vmatmul.mubr.msk.bf16.gmra.mrb[36].mxu0 %vm388_vm1, %v11157_v41  ;;  %v11183_v41 = vsel %vm1218_vm3, %v1371_v13, %v1374_v24  ;;  %v1390_v24 = vsel %vm1218_vm3, %v11195_v33, %v1389_v11  ;;  %v2207_v13 = vsel %vm461_vm0, %v10959_v19, 0  ;;  %v13786_v19 = vshrl.u32 %v10304_v12, 16 }
 0x120   : > { %8631 = vmatprep.mubr.msk.bf16.mxu0 %vm388_vm1, %v11161_v34  ;;  %13783 = vst [vmem:[#allocation45_spill] sm:$0xff] %v11183_v41  ;;  %v11187_v34 = vsel %vm1218_vm3, %v1378_v53, %v1381_v29  ;;  %v13787_v11 = vshll.u32 %v10304_v12, 16  ;;  %v11272_v12 = vpack.c.bf16 %v11268_v15, %v11265_v9 }
 0x121   : > { %13784 = vst [vmem:[#allocation46_spill] sm:$0xff] %v11187_v34  ;;  %v2025_v29 = vrot.slane %v13786_v19, 3 }
 0x122   : > { %v2026_v53 = vrot.slane %v13787_v11, 4 }
 0x124   : > { %v2027_v19 = vor.u32 %v2026_v53, %v2025_v29  ;;  %v13792_v29 = vshrl.u32 %v10367_v37, 16 }
 0x126   : > { %v2040_v53 = vrot.slane %v13792_v29, 3 }
 0x127   : > { %8632 = vmatmul.mubr.msk.bf16.gmra.mrb[40].mxu0 %vm388_vm1, %v11183_v41 }
 0x128   : > { %8635 = vmatprep.mubr.msk.bf16.mxu0 %vm388_vm1, %v11187_v34 }
 0x12f   : > { %8636 = vmatmul.mubr.msk.bf16.gmra.mrb[44].mxu0 %vm388_vm1, %v1390_v24  ;;  %v13788_v24 = vshrl.u32 %v10321_v16, 16  ;;  %v13790_v16 = vshrl.u32 %v10345_v26, 16 }
 0x130   : > { %8641 = vmatprep.mubr.msk.bf16.mxu0 %vm388_vm1, %v10567_v63 }
 0x131   : > { %v2036_v20 = vrot.slane %v13790_v16, 3  ;;  %v2594_v16 = vsel %vm461_vm0, %v7708_v42, 0 }
 0x137   : > { %8642 = vmatmul.mubr.msk.bf16.vlgmr.msra.gmra.mrb[0].mxu0 %vm388_vm1, %v10575_v30 }
 0x138   : > { %8690 = vmatpush3.bf16.msra.mxu0 %v2207_v13  ;;  %8645 = vmatprep.mubr.msk.bf16.mxu0 %vm388_vm1, %v10597_v17  ;;  %v2028_v13 = vrot.slane %v13788_v24, 3  ;;  %v13791_v24 = vshll.u32 %v10345_v26, 16 }
 0x139   : > { %10162 = vmatprep.subr.msk.bf16.mxu0 %vm461_vm0, %v7708_v42 }
 0x13a   : > { %v2030_v34 = vor.u32 %v2029_v40, %v2028_v13  ;;  %v2037_v33 = vrot.slane %v13791_v24, 4  ;;  %v13793_v13 = vshll.u32 %v10367_v37, 16 }
 0x13c   : > { %v2031_v11 = vsel %vm690_vm2, %v2027_v19, %v2030_v34  ;;  %v2038_v41 = vor.u32 %v2037_v33, %v2036_v20  ;;  %v2035_v40 = vsel %vm690_vm2, %v2030_v34, %v11127_v60  ;;  %v2041_v19 = vrot.slane %v13793_v13, 4  ;;  %v11298_v34 = vld [vmem:[%s13422_s1 + $0xe] sm:$0x3] }
 0x13d   : > { %v13797_v13 = vshll.u32 %v13749_v35, 16 }
 0x13e   : > { %v2039_v24 = vsel %vm690_vm2, %v11127_v60, %v2038_v41  ;;  %v2042_v42 = vor.u32 %v2041_v19, %v2040_v53  ;;  %v13796_v60 = vshrl.u32 %v13749_v35, 16 }
 0x13f   : > { %8646 = vmatmul.mubr.msk.bf16.gmra.mrb[4].mxu0 %vm388_vm1, %v10605_v50 }
 0x140   : > { %8649 = vmatprep.mubr.msk.bf16.mxu0 %vm388_vm1, %v10623_v45  ;;  %v2043_v4 = vsel %vm690_vm2, %v2038_v41, %v2042_v42  ;;  %v2048_v29 = vrot.slane %v13796_v60, 3 }
 0x147   : > { %8650 = vmatmul.mubr.msk.bf16.gmra.mrb[8].mxu0 %vm388_vm1, %v10633_v51 }
 0x148   : > { %8653 = vmatprep.mubr.msk.bf16.mxu0 %vm388_vm1, %v10655_v21 }
 0x14f   : > { %8654 = vmatmul.mubr.msk.bf16.gmra.mrb[12].mxu0 %vm388_vm1, %v10666_v44 }
 0x150   : > { %8657 = vmatprep.mubr.msk.bf16.mxu0 %vm388_vm1, %v10685_v22 }
 0x157   : > { %8658 = vmatmul.mubr.msk.bf16.gmra.mrb[16].mxu0 %vm388_vm1, %v10696_v57 }
 0x158   : > { %8661 = vmatprep.mubr.msk.bf16.mxu0 %vm388_vm1, %v10715_v32 }
 0x15f   : > { %8662 = vmatmul.mubr.msk.bf16.gmra.mrb[20].mxu0 %vm388_vm1, %v10726_v39 }
 0x160   : > { %8665 = vmatprep.mubr.msk.bf16.mxu0 %vm388_vm1, %v10745_v62 }
 0x167   : > { %8666 = vmatmul.mubr.msk.bf16.gmra.mrb[24].mxu0 %vm388_vm1, %v10756_v36 }
 0x168   : > { %8669 = vmatprep.mubr.msk.bf16.mxu0 %vm388_vm1, %v10775_v18 }
 0x16f   : > { %8670 = vmatmul.mubr.msk.bf16.gmra.mrb[28].mxu0 %vm388_vm1, %v10786_v43 }
 0x170   : > { %8673 = vmatprep.mubr.msk.bf16.mxu0 %vm388_vm1, %v10805_v46 }
 0x177   : > { %8674 = vmatmul.mubr.msk.bf16.gmra.mrb[32].mxu0 %vm388_vm1, %v10816_v49 }
 0x178   : > { %8677 = vmatprep.mubr.msk.bf16.mxu0 %vm388_vm1, %v10835_v52 }
 0x17f   : > { %8678 = vmatmul.mubr.msk.bf16.gmra.mrb[36].mxu0 %vm388_vm1, %v10846_v55 }
 0x180   : > { %8681 = vmatprep.mubr.msk.bf16.mxu0 %vm388_vm1, %v10865_v58 }
 0x187   : > { %8682 = vmatmul.mubr.msk.bf16.gmra.mrb[40].mxu0 %vm388_vm1, %v10876_v61 }
 0x188   : > { %8685 = vmatprep.mubr.msk.bf16.mxu0 %vm388_vm1, %v11250_v31 }
 0x18f   : > { %8686 = vmatmul.mubr.msk.bf16.gmra.mrb[44].mxu0 %vm388_vm1, %v11272_v12 }
 0x190   : > { %8691 = vmatprep.mubr.msk.bf16.mxu0 %vm388_vm1, %v2031_v11  ;;  %v13795_v11 = vshll.u32 %v10371_v38, 16 }
 0x192   : > { %v2045_v33 = vrot.slane %v13795_v11, 4  ;;  %v2049_v11 = vrot.slane %v13797_v13, 4  ;;  %v13801_v13 = vshll.u32 %v13753_v2, 16 }
 0x194   : > { %v2046_v20 = vor.u32 %v2045_v33, %v2044_v56  ;;  %v2050_v56 = vor.u32 %v2049_v11, %v2048_v29  ;;  %v13800_v33 = vshrl.u32 %v13753_v2, 16  ;;  %v13804_v11 = vshrl.u32 %v13757_v23, 16 }
 0x196   : > { %v2047_v38 = vsel %vm690_vm2, %v2042_v42, %v2046_v20  ;;  %v2051_v19 = vsel %vm690_vm2, %v2046_v20, %v2050_v56  ;;  %v2056_v60 = vrot.slane %v13800_v33, 3  ;;  %v2057_v42 = vrot.slane %v13801_v13, 4 }
 0x197   : > { %8692 = vmatmul.mubr.msk.bf16.vlgmr.msra.gmra.mrb[0].mxu0 %vm388_vm1, %v2035_v40  ;;  %v13798_v40 = vshrl.u32 %v13750_v5, 16  ;;  %v13806_v13 = vshrl.u32 %v13758_v7, 16 }
 0x198   : > { %8740 = vmatpush3.bf16.msra.mxu0 %v2594_v16  ;;  %8695 = vmatprep.mubr.msk.bf16.mxu0 %vm388_vm1, %v2039_v24  ;;  %v13799_v24 = vshll.u32 %v13750_v5, 16 }
 0x199   : > { %10163 = vmatprep.subr.msk.bf16.mxu0 %vm461_vm0, %v11298_v34  ;;  %v2052_v16 = vrot.slane %v13798_v40, 3  ;;  %v13802_v40 = vshrl.u32 %v13754_v6, 16 }
 0x19a   : > { %v2053_v53 = vrot.slane %v13799_v24, 4  ;;  %v13803_v24 = vshll.u32 %v13754_v6, 16 }
 0x19b   : > { %v2060_v5 = vrot.slane %v13802_v40, 3  ;;  %v2068_v40 = vrot.slane %v13806_v13, 3 }
 0x19c   : > { %v2054_v41 = vor.u32 %v2053_v53, %v2052_v16  ;;  %v2064_v16 = vrot.slane %v13804_v11, 3  ;;  %v13805_v53 = vshll.u32 %v13757_v23, 16 }
 0x19e   : > { %v2055_v35 = vsel %vm690_vm2, %v2050_v56, %v2054_v41  ;;  %v2065_v56 = vrot.slane %v13805_v53, 4  ;;  %v13810_v53 = vshrl.u32 %v13762_v0, 16 }
 0x19f   : > { %8696 = vmatmul.mubr.msk.bf16.gmra.mrb[4].mxu0 %vm388_vm1, %v2043_v4  ;;  %v2061_v4 = vrot.slane %v13803_v24, 4  ;;  %v13807_v24 = vshll.u32 %v13758_v7, 16 }
 0x1a0   : > { %8699 = vmatprep.mubr.msk.bf16.mxu0 %vm388_vm1, %v2047_v38  ;;  %v2058_v38 = vor.u32 %v2057_v42, %v2056_v60  ;;  %v13808_v60 = vshrl.u32 %v13761_v10, 16  ;;  %v2076_v13 = vrot.slane %v13810_v53, 3 }
 0x1a1   : > { %v2062_v20 = vor.u32 %v2061_v4, %v2060_v5  ;;  %v2066_v5 = vor.u32 %v2065_v56, %v2064_v16  ;;  %v13809_v4 = vshll.u32 %v13761_v10, 16 }
 0x1a2   : > { %v2059_v29 = vsel %vm690_vm2, %v2054_v41, %v2058_v38  ;;  %v2072_v42 = vrot.slane %v13808_v60, 3 }
 0x1a3   : > { %v2063_v33 = vsel %vm690_vm2, %v2058_v38, %v2062_v20  ;;  %v2067_v41 = vsel %vm690_vm2, %v2062_v20, %v2066_v5  ;;  %v2073_v38 = vrot.slane %v13809_v4, 4  ;;  %v13814_v4 = vshrl.u32 %v13766_v8, 16 }
 0x1a5   : > { %v2074_v16 = vor.u32 %v2073_v38, %v2072_v42  ;;  %v2084_v53 = vrot.slane %v13814_v4, 3 }
 0x1a7   : > { %8700 = vmatmul.mubr.msk.bf16.gmra.mrb[8].mxu0 %vm388_vm1, %v2051_v19  ;;  %v2069_v19 = vrot.slane %v13807_v24, 4  ;;  %v13811_v24 = vshll.u32 %v13762_v0, 16 }
 0x1a8   : > { %8703 = vmatprep.mubr.msk.bf16.mxu0 %vm388_vm1, %v2055_v35 }
 0x1a9   : > { %v2070_v35 = vor.u32 %v2069_v19, %v2068_v40  ;;  %v13813_v19 = vshll.u32 %v13765_v1, 16 }
 0x1ab   : > { %v2071_v11 = vsel %vm690_vm2, %v2066_v5, %v2070_v35  ;;  %v2075_v56 = vsel %vm690_vm2, %v2070_v35, %v2074_v16  ;;  %v2081_v5 = vrot.slane %v13813_v19, 4  ;;  %v13818_v19 = vshrl.u32 %v13770_v27, 16 }
 0x1ad   : > { %v2092_v4 = vrot.slane %v13818_v19, 3 }
 0x1af   : > { %8704 = vmatmul.mubr.msk.bf16.gmra.mrb[12].mxu0 %vm388_vm1, %v2059_v29  ;;  %v2077_v29 = vrot.slane %v13811_v24, 4  ;;  %v13815_v24 = vshll.u32 %v13766_v8, 16 }
 0x1b0   : > { %8707 = vmatprep.mubr.msk.bf16.mxu0 %vm388_vm1, %v2063_v33  ;;  %v13812_v33 = vshrl.u32 %v13765_v1, 16 }
 0x1b1   : > { %v2078_v20 = vor.u32 %v2077_v29, %v2076_v13  ;;  %v13817_v29 = vshll.u32 %v13769_v59, 16 }
 0x1b2   : > { %v2080_v40 = vrot.slane %v13812_v33, 3 }
 0x1b3   : > { %v2079_v60 = vsel %vm690_vm2, %v2074_v16, %v2078_v20  ;;  %v2089_v16 = vrot.slane %v13817_v29, 4  ;;  %v13822_v29 = vshrl.u32 %v13776_v47, 16 }
 0x1b4   : > { %v2082_v42 = vor.u32 %v2081_v5, %v2080_v40 }
 0x1b5   : > { %v2100_v19 = vrot.slane %v13822_v29, 3 }
 0x1b6   : > { %v2083_v38 = vsel %vm690_vm2, %v2078_v20, %v2082_v42 }
 0x1b7   : > { %8708 = vmatmul.mubr.msk.bf16.gmra.mrb[16].mxu0 %vm388_vm1, %v2067_v41  ;;  %v2085_v41 = vrot.slane %v13815_v24, 4  ;;  %v13819_v24 = vshll.u32 %v13770_v27, 16 }
 0x1b8   : > { %8711 = vmatprep.mubr.msk.bf16.mxu0 %vm388_vm1, %v2071_v11  ;;  %v13816_v11 = vshrl.u32 %v13769_v59, 16 }
 0x1b9   : > { %v2086_v35 = vor.u32 %v2085_v41, %v2084_v53  ;;  %v13821_v41 = vshll.u32 %v13775_v54, 16 }
 0x1ba   : > { %v2088_v13 = vrot.slane %v13816_v11, 3 }
 0x1bb   : > { %v2087_v33 = vsel %vm690_vm2, %v2082_v42, %v2086_v35  ;;  %v2097_v42 = vrot.slane %v13821_v41, 4 }
 0x1bc   : > { %v2090_v40 = vor.u32 %v2089_v16, %v2088_v13 }
 0x1be   : > { %v2091_v5 = vsel %vm690_vm2, %v2086_v35, %v2090_v40 }
 0x1bf   : > { %8712 = vmatmul.mubr.msk.bf16.gmra.mrb[20].mxu0 %vm388_vm1, %v2075_v56  ;;  %v2093_v56 = vrot.slane %v13819_v24, 4  ;;  %v13823_v24 = vshll.u32 %v13776_v47, 16 }
 0x1c0   : > { %8715 = vmatprep.mubr.msk.bf16.mxu0 %vm388_vm1, %v2079_v60  ;;  %v13820_v60 = vshrl.u32 %v13775_v54, 16 }
 0x1c1   : > { %v2094_v20 = vor.u32 %v2093_v56, %v2092_v4  ;;  %v13825_v56 = vshll.u32 %v13779_v48, 16 }
 0x1c2   : > { %v2096_v53 = vrot.slane %v13820_v60, 3  ;;  %v11395_v60 = vpack.c.bf16 %v11265_v9, %v11166_v3  ;;  %v1740_v3 = vpack.c.bf16 %v11268_v15, %v11268_v15 }
 0x1c3   : > { %v2095_v11 = vsel %vm690_vm2, %v2090_v40, %v2094_v20  ;;  %v2105_v40 = vrot.slane %v13825_v56, 4 }
 0x1c4   : > { %v2098_v13 = vor.u32 %v2097_v42, %v2096_v53  ;;  %v13827_v53 = vshll.u32 %v13780_v28, 16 }
 0x1c6   : > { %v2099_v16 = vsel %vm690_vm2, %v2094_v20, %v2098_v13  ;;  %v2109_v42 = vrot.slane %v13827_v53, 4 }
 0x1c7   : > { %8716 = vmatmul.mubr.msk.bf16.gmra.mrb[24].mxu0 %vm388_vm1, %v2083_v38  ;;  %v2101_v38 = vrot.slane %v13823_v24, 4  ;;  %v2120_v24 = vshll.u32 %v11395_v60, 16 }
 0x1c8   : > { %8719 = vmatprep.mubr.msk.bf16.mxu0 %vm388_vm1, %v2087_v33  ;;  %v13824_v33 = vshrl.u32 %v13779_v48, 16 }
 0x1c9   : > { %v2102_v35 = vor.u32 %v2101_v38, %v2100_v19  ;;  %v13594_v19 = vshrl.u32 %v11395_v60, 16  ;;  %v13828_v38 = vshrl.u32 %v10593_v14, 16 }
 0x1ca   : > { %v2104_v4 = vrot.slane %v13824_v33, 3  ;;  %v13829_v33 = vshll.u32 %v10593_v14, 16 }
 0x1cb   : > { %v2103_v41 = vsel %vm690_vm2, %v2098_v13, %v2102_v35  ;;  %v2112_v13 = vrot.slane %v13828_v38, 3 }
 0x1cc   : > { %v2106_v20 = vor.u32 %v2105_v40, %v2104_v4  ;;  %v2113_v56 = vrot.slane %v13829_v33, 4  ;;  %v2119_v4 = vrot.slane %v13594_v19, 3  ;;  %v2122_v40 = vrot.slane %v2120_v24, 4 }
 0x1cd   : > { %v13830_v33 = vshll.u32 %v10567_v63, 16 }
 0x1ce   : > { %v2107_v9 = vsel %vm690_vm2, %v2102_v35, %v2106_v20  ;;  %v2126_v35 = vshrl.u32 %v1740_v3, 16 }
 0x1cf   : > { %8720 = vmatmul.mubr.msk.bf16.gmra.mrb[28].mxu0 %vm388_vm1, %v2091_v5  ;;  %v13826_v5 = vshrl.u32 %v13780_v28, 16  ;;  %v2437_v19 = vrot.slane %v13830_v33, 1 }
 0x1d0   : > { %8723 = vmatprep.mubr.msk.bf16.mxu0 %vm388_vm1, %v2095_v11 }
 0x1d1   : > { %v2108_v29 = vrot.slane %v13826_v5, 3  ;;  %v2129_v5 = vshll.u32 %v1740_v3, 16  ;;  %v13832_v3 = vshll.u32 %v10575_v30, 16 }
 0x1d3   : > { %v2110_v11 = vor.u32 %v2109_v42, %v2108_v29  ;;  %v2123_v29 = vor.u32 %v2122_v40, %v2119_v4  ;;  %v2128_v42 = vrot.slane %v2126_v35, 3  ;;  %v2131_v38 = vrot.slane %v2129_v5, 4 }
 0x1d4   : > { %v13833_v40 = vshll.u32 %v10597_v17, 16  ;;  %v13834_v35 = vshrl.u32 %v10575_v30, 16  ;;  %v11449_v30 = vld [vmem:[%s13422_s1 + $0xc] sm:$0x3] }
 0x1d7   : > { %8724 = vmatmul.mubr.msk.bf16.gmra.mrb[32].mxu0 %vm388_vm1, %v2099_v16  ;;  %v2111_v16 = vsel %vm690_vm2, %v2106_v20, %v2110_v11 }
 0x1d8   : > { %8727 = vmatprep.mubr.msk.bf16.mxu0 %vm388_vm1, %v2103_v41  ;;  %v2114_v41 = vor.u32 %v2113_v56, %v2112_v13  ;;  %v2439_v56 = vrot.slane %v13832_v3, 1  ;;  %v13840_v3 = vshll.u32 %v10633_v51, 16 }
 0x1da   : > { %v2115_v53 = vsel %vm690_vm2, %v2110_v11, %v2114_v41  ;;  %v2124_v20 = vsel %vm690_vm2, %v2114_v41, %v2123_v29  ;;  %v2442_v41 = vrot.slane %v13833_v40, 1  ;;  %v2441_v5 = vor.u32 %v2439_v56, %v13834_v35 }
 0x1db   : > { %v13841_v40 = vshll.u32 %v10655_v21, 16  ;;  %v13843_v35 = vshrl.u32 %v10655_v21, 16  ;;  %v13847_v21 = vshrl.u32 %v10685_v22, 16 }
 0x1df   : > { %8728 = vmatmul.mubr.msk.bf16.gmra.mrb[36].mxu0 %vm388_vm1, %v2107_v9  ;;  %v2132_v9 = vor.u32 %v2131_v38, %v2128_v42  ;;  %v2934_v38 = vsel %vm461_vm0, %v11298_v34, 0  ;;  %v13839_v34 = vshrl.u32 %v10623_v45, 16 }
 0x1e0   : > { %8731 = vmatprep.mubr.msk.bf16.mxu0 %vm388_vm1, %v2111_v16  ;;  %v13831_v16 = vshrl.u32 %v10567_v63, 16  ;;  %v13835_v63 = vshrl.u32 %v10597_v17, 16  ;;  %v13837_v17 = vshll.u32 %v10623_v45, 16 }
 0x1e1   : > { %v2133_v11 = vsel %vm690_vm2, %v2123_v29, %v2132_v9  ;;  %v2443_v29 = vsel %vm1218_vm3, %v2441_v5, %v2442_v41  ;;  %v13838_v9 = vshrl.u32 %v10605_v50, 16 }
 0x1e2   : > { %v2438_v13 = vor.u32 %v2437_v19, %v13831_v16  ;;  %v2444_v19 = vor.u32 %v2442_v41, %v13835_v63  ;;  %v2448_v33 = vrot.slane %v13837_v17, 1  ;;  %v2454_v41 = vrot.slane %v13841_v40, 1 }
 0x1e3   : > { %v13844_v63 = vshll.u32 %v10666_v44, 16 }
 0x1e4   : > { %v2440_v4 = vsel %vm1218_vm3, %v2438_v13, %v2439_v56  ;;  %v2450_v13 = vor.u32 %v2448_v33, %v13839_v34  ;;  %v2451_v56 = vrot.slane %v13840_v3, 1  ;;  %v2456_v5 = vor.u32 %v2454_v41, %v13843_v35 }
 0x1e7   : > { %8732 = vmatmul.mubr.msk.bf16.gmra.mrb[40].mxu0 %vm388_vm1, %v2115_v53  ;;  %v13836_v53 = vshll.u32 %v10605_v50, 16  ;;  %v13842_v50 = vshrl.u32 %v10633_v51, 16  ;;  %v13846_v51 = vshrl.u32 %v10666_v44, 16  ;;  %v13850_v44 = vshrl.u32 %v10696_v57, 16 }
 0x1e8   : > { %8735 = vmatprep.mubr.msk.bf16.mxu0 %vm388_vm1, %v2124_v20 }
 0x1e9   : > { %v2445_v42 = vrot.slane %v13836_v53, 1  ;;  %v2453_v45 = vor.u32 %v2451_v56, %v13842_v50 }
 0x1eb   : > { %v2446_v20 = vsel %vm1218_vm3, %v2444_v19, %v2445_v42  ;;  %v2447_v16 = vor.u32 %v2445_v42, %v13838_v9  ;;  %v2457_v19 = vrot.slane %v13844_v63, 1  ;;  %v2455_v53 = vsel %vm1218_vm3, %v2453_v45, %v2454_v41 }
 0x1ec   : > { %v13853_v45 = vshll.u32 %v10745_v62, 16 }
 0x1ed   : > { %v2458_v42 = vsel %vm1218_vm3, %v2456_v5, %v2457_v19 }
 0x1ee   : > { %v2472_v35 = vrot.slane %v13853_v45, 1 }
 0x1ef   : > { %8736 = vmatmul.mubr.msk.bf16.gmra.mrb[44].mxu0 %vm388_vm1, %v2133_v11  ;;  %v2449_v11 = vsel %vm1218_vm3, %v2447_v16, %v2448_v33  ;;  %v13848_v33 = vshll.u32 %v10696_v57, 16  ;;  %v13854_v57 = vshrl.u32 %v10726_v39, 16 }
 0x1f0   : > { %8741 = vmatprep.mubr.msk.bf16.mxu0 %vm388_vm1, %v2440_v4  ;;  %v2452_v4 = vsel %vm1218_vm3, %v2450_v13, %v2451_v56  ;;  %v13849_v13 = vshll.u32 %v10715_v32, 16 }
 0x1f1   : > { %v2463_v9 = vrot.slane %v13848_v33, 1 }
 0x1f2   : > { %v2466_v3 = vrot.slane %v13849_v13, 1 }
 0x1f3   : > { %v2465_v56 = vor.u32 %v2463_v9, %v13850_v44 }
 0x1f5   : > { %v2467_v41 = vsel %vm1218_vm3, %v2465_v56, %v2466_v3  ;;  %v13864_v56 = vshll.u32 %v10816_v49, 16 }
 0x1f7   : > { %8742 = vmatmul.mubr.msk.bf16.vlgmr.msra.gmra.mrb[0].mxu0 %vm388_vm1, %v2443_v29  ;;  %v13845_v29 = vshll.u32 %v10685_v22, 16  ;;  %v13851_v22 = vshrl.u32 %v10715_v32, 16  ;;  %v13855_v32 = vshrl.u32 %v10745_v62, 16  ;;  %v13859_v62 = vshrl.u32 %v10775_v18, 16 }
 0x1f8   : > { %8790 = vmatpush3.bf16.msra.mxu0 %v2934_v38  ;;  %8745 = vmatprep.mubr.msk.bf16.mxu0 %vm388_vm1, %v2446_v20  ;;  %v2459_v20 = vor.u32 %v2457_v19, %v13846_v51  ;;  %v13856_v19 = vshll.u32 %v10756_v36, 16 }
 0x1f9   : > { %10164 = vmatprep.subr.msk.bf16.mxu0 %vm461_vm0, %v11449_v30  ;;  %v2460_v38 = vrot.slane %v13845_v29, 1  ;;  %v2474_v63 = vor.u32 %v2472_v35, %v13855_v32 }
 0x1fb   : > { %v2462_v17 = vor.u32 %v2460_v38, %v13847_v21  ;;  %v2461_v16 = vsel %vm1218_vm3, %v2459_v20, %v2460_v38  ;;  %v13857_v38 = vshll.u32 %v10775_v18, 16  ;;  %v13863_v18 = vshrl.u32 %v10805_v46, 16 }
 0x1fd   : > { %v2464_v34 = vsel %vm1218_vm3, %v2462_v17, %v2463_v9  ;;  %v2478_v51 = vrot.slane %v13857_v38, 1  ;;  %v13860_v17 = vshll.u32 %v10786_v43, 16 }
 0x1ff   : > { %8746 = vmatmul.mubr.msk.bf16.gmra.mrb[4].mxu0 %vm388_vm1, %v2449_v11  ;;  %v2468_v11 = vor.u32 %v2466_v3, %v13851_v22  ;;  %v2480_v21 = vor.u32 %v2478_v51, %v13859_v62  ;;  %v2481_v33 = vrot.slane %v13860_v17, 1  ;;  %v2487_v22 = vrot.slane %v13864_v56, 1  ;;  %v332_v17 = vld [vmem:[%s10289_s10 + $0x1b0] sm:$0xff] }
 0x200   : > { %8749 = vmatprep.mubr.msk.bf16.mxu0 %vm388_vm1, %v2452_v4  ;;  %v13852_v4 = vshll.u32 %v10726_v39, 16  ;;  %v13858_v39 = vshrl.u32 %v10756_v36, 16  ;;  %v13862_v36 = vshrl.u32 %v10786_v43, 16  ;;  %v13866_v43 = vshrl.u32 %v10816_v49, 16 }
 0x201   : > { %v13870_v49 = vshrl.u32 %v10846_v55, 16  ;;  %v2506_v62 = vshrl.u32 %v11250_v31, 16 }
 0x202   : > { %v2469_v40 = vrot.slane %v13852_v4, 1  ;;  %v2483_v3 = vor.u32 %v2481_v33, %v13862_v36  ;;  %v2513_v36 = vshrl.u32 %v11272_v12, 16 }
 0x204   : > { %v2470_v50 = vsel %vm1218_vm3, %v2468_v11, %v2469_v40  ;;  %v2471_v5 = vor.u32 %v2469_v40, %v13854_v57  ;;  %v13865_v40 = vshll.u32 %v10835_v52, 16 }
 0x207   : > { %8750 = vmatmul.mubr.msk.bf16.gmra.mrb[8].mxu0 %vm388_vm1, %v2455_v53  ;;  %v2475_v53 = vrot.slane %v13856_v19, 1 }
 0x208   : > { %8753 = vmatprep.mubr.msk.bf16.mxu0 %vm388_vm1, %v2458_v42  ;;  %v2473_v42 = vsel %vm1218_vm3, %v2471_v5, %v2472_v35  ;;  %v13868_v35 = vshll.u32 %v10846_v55, 16  ;;  %v13873_v55 = vshrl.u32 %v10876_v61, 16 }
 0x209   : > { %v2476_v29 = vsel %vm1218_vm3, %v2474_v63, %v2475_v53  ;;  %v2477_v20 = vor.u32 %v2475_v53, %v13858_v39  ;;  %v13869_v63 = vshll.u32 %v10865_v58, 16 }
 0x20a   : > { %v2493_v57 = vrot.slane %v13868_v35, 1  ;;  %v13883_v35 = vld [vmem:[#allocation26_spill] sm:$0xff] }
 0x20b   : > { %v2479_v9 = vsel %vm1218_vm3, %v2477_v20, %v2478_v51  ;;  %v2496_v19 = vrot.slane %v13869_v63, 1  ;;  %v2502_v51 = vshll.u32 %v11250_v31, 16  ;;  %v13887_v63 = vld [vmem:[#allocation30_spill] sm:$0xff] }
 0x20c   : > { %v2495_v53 = vor.u32 %v2493_v57, %v13870_v49  ;;  %v13889_v49 = vld [vmem:[#allocation32_spill] sm:$0xff] }
 0x20e   : > { %v2497_v39 = vsel %vm1218_vm3, %v2495_v53, %v2496_v19 }
 0x20f   : > { %8754 = vmatmul.mubr.msk.bf16.gmra.mrb[12].mxu0 %vm388_vm1, %v2461_v16  ;;  %v2482_v16 = vsel %vm1218_vm3, %v2480_v21, %v2481_v33  ;;  %v2509_v21 = vshll.u32 %v11272_v12, 16  ;;  %v13898_v12 = vld [vmem:[#allocation41_spill] sm:$0xff] }
 0x210   : > { %8757 = vmatprep.mubr.msk.bf16.mxu0 %vm388_vm1, %v2464_v34  ;;  %v13861_v34 = vshll.u32 %v10805_v46, 16  ;;  %v13867_v46 = vshrl.u32 %v10835_v52, 16  ;;  %v13871_v52 = vshrl.u32 %v10865_v58, 16  ;;  %v2504_v58 = vrot.slane %v2502_v51, 1 }
 0x212   : > { %v2484_v13 = vrot.slane %v13861_v34, 1  ;;  %v2511_v34 = vrot.slane %v2509_v21, 1 }
 0x214   : > { %v2486_v44 = vor.u32 %v2484_v13, %v13863_v18  ;;  %v2485_v11 = vsel %vm1218_vm3, %v2483_v3, %v2484_v13 }
 0x216   : > { %v2488_v4 = vsel %vm1218_vm3, %v2486_v44, %v2487_v22 }
 0x217   : > { %8758 = vmatmul.mubr.msk.bf16.gmra.mrb[16].mxu0 %vm388_vm1, %v2467_v41  ;;  %v2490_v41 = vrot.slane %v13865_v40, 1 }
 0x218   : > { %8761 = vmatprep.mubr.msk.bf16.mxu0 %vm388_vm1, %v2470_v50  ;;  %v2489_v50 = vor.u32 %v2487_v22, %v13866_v43  ;;  %v3200_v22 = vsel %vm461_vm0, %v11449_v30, 0  ;;  %v13876_v30 = vld [vmem:[#allocation5_spill] sm:$0xff] }
 0x219   : > { %v2492_v45 = vor.u32 %v2490_v41, %v13867_v46 }
 0x21a   : > { %v2491_v5 = vsel %vm1218_vm3, %v2489_v50, %v2490_v41 }
 0x21b   : > { %v2494_v32 = vsel %vm1218_vm3, %v2492_v45, %v2493_v57  ;;  %v13884_v57 = vld [vmem:[#allocation27_spill] sm:$0xff] }
 0x21f   : > { %8762 = vmatmul.mubr.msk.bf16.gmra.mrb[20].mxu0 %vm388_vm1, %v2473_v42  ;;  %v2498_v42 = vor.u32 %v2496_v19, %v13871_v52  ;;  %v13888_v19 = vld [vmem:[#allocation31_spill] sm:$0xff]  ;;  %v13890_v52 = vld [vmem:[#allocation33_spill] sm:$0xff] }
 0x220   : > { %8765 = vmatprep.mubr.msk.bf16.mxu0 %vm388_vm1, %v2476_v29  ;;  %v13872_v29 = vshll.u32 %v10876_v61, 16  ;;  %v2515_v61 = vor.u32 %v2513_v36, %v2511_v34 }
 0x222   : > { %v2499_v38 = vrot.slane %v13872_v29, 1 }
 0x224   : > { %v2500_v20 = vsel %vm1218_vm3, %v2498_v42, %v2499_v38  ;;  %v2501_v33 = vor.u32 %v2499_v38, %v13873_v55  ;;  %v13892_v55 = vld [vmem:[#allocation35_spill] sm:$0xff] }
 0x226   : > { %v2505_v13 = vsel %vm1218_vm3, %v2501_v33, %v2504_v58  ;;  %v13893_v33 = vld [vmem:[#allocation36_spill] sm:$0xff] }
 0x227   : > { %8766 = vmatmul.mubr.msk.bf16.gmra.mrb[24].mxu0 %vm388_vm1, %v2479_v9  ;;  %v2434_v9 = vpack.c.bf16 %v332_v17, %v332_v17 }
 0x228   : > { %8769 = vmatprep.mubr.msk.bf16.mxu0 %vm388_vm1, %v2482_v16  ;;  %v2508_v16 = vor.u32 %v2506_v62, %v2504_v58 }
 0x229   : > { %v2517_v3 = vshll.u32 %v2434_v9, 16  ;;  %v3161_v9 = vrot.slane %v2506_v62, 3  ;;  %v13897_v62 = vld [vmem:[#allocation40_spill] sm:$0xff] }
 0x22a   : > { %v2512_v18 = vsel %vm1218_vm3, %v2508_v16, %v2511_v34  ;;  %v3162_v16 = vrot.slane %v2502_v51, 4  ;;  %v13894_v34 = vld [vmem:[#allocation37_spill] sm:$0xff] }
 0x22b   : > { %v2519_v44 = vrot.slane %v2517_v3, 1 }
 0x22c   : > { %v3163_v3 = vor.u32 %v3162_v16, %v3161_v9 }
 0x22d   : > { %v2520_v56 = vsel %vm1218_vm3, %v2515_v61, %v2519_v44  ;;  %v3166_v61 = vrot.slane %v2509_v21, 4  ;;  %v13896_v44 = vld [vmem:[#allocation38_spill] sm:$0xff] }
 0x22e   : > { %v13899_v21 = vld [vmem:[#allocation42_spill] sm:$0xff] }
 0x22f   : > { %8770 = vmatmul.mubr.msk.bf16.gmra.mrb[28].mxu0 %vm388_vm1, %v2485_v11  ;;  %v7783_v11 = vld [vmem:[%s13422_s1 + $0x10] sm:$0x3] }
 0x230   : > { %8773 = vmatprep.mubr.msk.bf16.mxu0 %vm388_vm1, %v2488_v4  ;;  %v13874_v4 = vld [vmem:[#allocation3_spill] sm:$0xff] }
 0x237   : > { %8774 = vmatmul.mubr.msk.bf16.gmra.mrb[32].mxu0 %vm388_vm1, %v2491_v5  ;;  %v13885_v5 = vld [vmem:[#allocation28_spill] sm:$0xff] }
 0x238   : > { %8777 = vmatprep.mubr.msk.bf16.mxu0 %vm388_vm1, %v2494_v32  ;;  %v13886_v32 = vld [vmem:[#allocation29_spill] sm:$0xff] }
 0x23f   : > { %8778 = vmatmul.mubr.msk.bf16.gmra.mrb[36].mxu0 %vm388_vm1, %v2497_v39  ;;  %v13891_v39 = vld [vmem:[#allocation34_spill] sm:$0xff] }
 0x240   : > { %8781 = vmatprep.mubr.msk.bf16.mxu0 %vm388_vm1, %v2500_v20 }
 0x247   : > { %8782 = vmatmul.mubr.msk.bf16.gmra.mrb[40].mxu0 %vm388_vm1, %v2505_v13  ;;  %v13895_v13 = vld [vmem:[#allocation39_spill] sm:$0xff] }
 0x248   : > { %8785 = vmatprep.mubr.msk.bf16.mxu0 %vm388_vm1, %v2512_v18  ;;  %v3165_v18 = vrot.slane %v2513_v36, 3  ;;  %v13900_v36 = vld [vmem:[#allocation43_spill] sm:$0xff] }
 0x24a   : > { %v3167_v31 = vor.u32 %v3166_v61, %v3165_v18 }
 0x24c   : > { %v3168_v51 = vsel %vm690_vm2, %v3163_v3, %v3167_v31 }
 0x24f   : > { %8786 = vmatmul.mubr.msk.bf16.gmra.mrb[44].mxu0 %vm388_vm1, %v2520_v56  ;;  %v3164_v56 = vsel %vm690_vm2, %v13896_v44, %v3163_v3  ;;  %v11802_v3 = vld [vmem:[%s13423_s2] ss:$0 sm:$0xff] }
 0x250   : > { %8791 = vmatprep.mubr.msk.bf16.mxu0 %vm388_vm1, %v10341_v25  ;;  %v13875_v25 = vld [vmem:[#allocation4_spill] sm:$0xff]  ;;  %v11807_v44 = vld [vmem:[%s13424_s3] ss:$0 sm:$0xff] }
 0x257   : > { %8792 = vmatmul.mubr.msk.bf16.vlgmr.msra.gmra.mrb[0].mxu0 %vm388_vm1, %v10345_v26  ;;  %v333_v26 = vld [vmem:[%s10289_s10 + $0x1b8] sm:$0xff] }
 0x258   : > { %8840 = vmatpush3.bf16.msra.mxu0 %v3200_v22  ;;  %8795 = vmatprep.mubr.msk.bf16.mxu0 %vm388_vm1, %v10367_v37  ;;  %v334_v37 = vld [vmem:[%s10289_s10 + $0x1c0] sm:$0xff] }
 0x259   : > { %10165 = vmatprep.subr.msk.bf16.mxu0 %vm461_vm0, %v7783_v11  ;;  %v2918_v40 = vpack.c.bf16 %v334_v37, %v334_v37 }
 0x25f   : > { %8796 = vmatmul.mubr.msk.bf16.gmra.mrb[4].mxu0 %vm388_vm1, %v13874_v4  ;;  %v13902_v4 = vld [vmem:[#allocation6_spill] sm:$0xff] }
 0x260   : > { %8799 = vmatprep.mubr.msk.bf16.mxu0 %vm388_vm1, %v13875_v25  ;;  %v13903_v25 = vld [vmem:[#allocation7_spill] sm:$0xff] }
 0x267   : > { %8800 = vmatmul.mubr.msk.bf16.gmra.mrb[8].mxu0 %vm388_vm1, %v13876_v30  ;;  %v13904_v30 = vld [vmem:[#allocation8_spill] sm:$0xff] }
 0x268   : > { %8803 = vmatprep.mubr.msk.bf16.mxu0 %vm388_vm1, %v13753_v2  ;;  %v2917_v2 = vpack.c.bf16 %v333_v26, %v332_v17 }
 0x26f   : > { %8804 = vmatmul.mubr.msk.bf16.gmra.mrb[12].mxu0 %vm388_vm1, %v13754_v6  ;;  %v3173_v6 = vshll.u32 %v2917_v2, 16 }
 0x270   : > { %8807 = vmatprep.mubr.msk.bf16.mxu0 %vm388_vm1, %v13757_v23  ;;  %v3170_v23 = vshrl.u32 %v2917_v2, 16  ;;  %v13907_v2 = vld [vmem:[#allocation11_spill] sm:$0xff] }
 0x271   : > { %v3175_v43 = vrot.slane %v3173_v6, 4  ;;  %v13910_v6 = vld [vmem:[#allocation14_spill] sm:$0xff] }
 0x272   : > { %v3172_v41 = vrot.slane %v3170_v23, 3  ;;  %v13909_v23 = vld [vmem:[#allocation13_spill] sm:$0xff] }
 0x274   : > { %v3176_v46 = vor.u32 %v3175_v43, %v3172_v41  ;;  %v13913_v41 = vld [vmem:[#allocation17_spill] sm:$0xff]  ;;  %v13914_v43 = vld [vmem:[#allocation18_spill] sm:$0xff] }
 0x276   : > { %v3177_v22 = vsel %vm690_vm2, %v3167_v31, %v3176_v46 }
 0x277   : > { %8808 = vmatmul.mubr.msk.bf16.gmra.mrb[16].mxu0 %vm388_vm1, %v13758_v7  ;;  %v3179_v7 = vshrl.u32 %v2918_v40, 16 }
 0x278   : > { %8811 = vmatprep.mubr.msk.bf16.mxu0 %vm388_vm1, %v13761_v10  ;;  %v3182_v10 = vshll.u32 %v2918_v40, 16  ;;  %v13908_v40 = vld [vmem:[#allocation12_spill] sm:$0xff] }
 0x27a   : > { %v3184_v50 = vrot.slane %v3182_v10, 4  ;;  %v13912_v10 = vld [vmem:[#allocation16_spill] sm:$0xff] }
 0x27f   : > { %8812 = vmatmul.mubr.msk.bf16.gmra.mrb[20].mxu0 %vm388_vm1, %v13762_v0  ;;  %v3181_v0 = vrot.slane %v3179_v7, 3  ;;  %v13911_v7 = vld [vmem:[#allocation15_spill] sm:$0xff] }
 0x280   : > { %8815 = vmatprep.mubr.msk.bf16.mxu0 %vm388_vm1, %v13765_v1 }
 0x281   : > { %v3185_v1 = vor.u32 %v3184_v50, %v3181_v0  ;;  %v13915_v0 = vld [vmem:[#allocation19_spill] sm:$0xff]  ;;  %v13916_v50 = vld [vmem:[#allocation45_spill] sm:$0xff] }
 0x283   : > { %v3186_v45 = vsel %vm690_vm2, %v3176_v46, %v3185_v1  ;;  %v3430_v46 = vrot.slane %v2120_v24, 1  ;;  %v13917_v1 = vld [vmem:[#allocation47_spill] sm:$0xff] }
 0x287   : > { %8816 = vmatmul.mubr.msk.bf16.gmra.mrb[24].mxu0 %vm388_vm1, %v13766_v8  ;;  %v13878_v8 = vld [vmem:[#allocation21_spill] sm:$0xff] }
 0x288   : > { %8819 = vmatprep.mubr.msk.bf16.mxu0 %vm388_vm1, %v13769_v59  ;;  %v2921_v59 = vpack.c.bf16 %v332_v17, %v11268_v15  ;;  %v13880_v15 = vld [vmem:[#allocation23_spill] sm:$0xff] }
 0x28a   : > { %v3433_v53 = vshll.u32 %v2921_v59, 16  ;;  %v3437_v29 = vshrl.u32 %v2921_v59, 16 }
 0x28c   : > { %v3435_v42 = vrot.slane %v3433_v53, 1 }
 0x28e   : > { %v3439_v20 = vor.u32 %v3437_v29, %v3435_v42 }
 0x28f   : > { %8820 = vmatmul.mubr.msk.bf16.gmra.mrb[28].mxu0 %vm388_vm1, %v13770_v27  ;;  %v13881_v27 = vld [vmem:[#allocation24_spill] sm:$0xff] }
 0x290   : > { %8823 = vmatprep.mubr.msk.bf16.mxu0 %vm388_vm1, %v13775_v54  ;;  %v11639_v54 = vpack.c.bf16 %v334_v37, %v333_v26  ;;  %v13905_v26 = vld [vmem:[#allocation9_spill] sm:$0xff]  ;;  %v13906_v37 = vld [vmem:[#allocation10_spill] sm:$0xff] }
 0x292   : > { %v3440_v38 = vshll.u32 %v11639_v54, 16 }
 0x294   : > { %v3442_v17 = vrot.slane %v3440_v38, 1 }
 0x296   : > { %v3443_v58 = vsel %vm1218_vm3, %v3439_v20, %v3442_v17 }
 0x297   : > { %8824 = vmatmul.mubr.msk.bf16.gmra.mrb[32].mxu0 %vm388_vm1, %v13776_v47  ;;  %v13877_v47 = vld [vmem:[#allocation20_spill] sm:$0xff] }
 0x298   : > { %8827 = vmatprep.mubr.msk.bf16.mxu0 %vm388_vm1, %v13779_v48  ;;  %v13882_v48 = vld [vmem:[#allocation25_spill] sm:$0xff] }
 0x29f   : > { %8828 = vmatmul.mubr.msk.bf16.gmra.mrb[36].mxu0 %vm388_vm1, %v13780_v28  ;;  %v3465_v28 = vsel %vm461_vm0, %v7783_v11, 0  ;;  %v13901_v11 = vld [vmem:[#allocation44_spill] sm:$0xff] }
 0x2a0   : > { %8831 = vmatprep.mubr.msk.bf16.mxu0 %vm388_vm1, %v10593_v14  ;;  %v13879_v14 = vld [vmem:[#allocation22_spill] sm:$0xff] }
 0x2a7   : > { %8832 = vmatmul.mubr.msk.bf16.gmra.mrb[40].mxu0 %vm388_vm1, %v11395_v60 }
 0x2a8   : > { %8835 = vmatprep.mubr.msk.bf16.mxu0 %vm388_vm1, %v2921_v59  ;;  %v335_v59 = vld [vmem:[%s10289_s10 + $0x1c8] sm:$0xff] }
 0x2af   : > { %8836 = vmatmul.mubr.msk.bf16.gmra.mrb[44].mxu0 %vm388_vm1, %v11639_v54 }
 0x2b0   : > { %8841 = vmatprep.mubr.msk.bf16.mxu0 %vm388_vm1, %v13877_v47  ;;  %v13918_v47 = vld [vmem:[#allocation46_spill] sm:$0xff] }
 0x2b7   : > { %8842 = vmatmul.mubr.msk.bf16.vlgmr.msra.gmra.mrb[0].mxu0 %vm388_vm1, %v13878_v8 }
 0x2b8   : > { %8890 = vmatpush3.bf16.msra.mxu0 %v3465_v28  ;;  %8845 = vmatprep.mubr.msk.bf16.mxu0 %vm388_vm1, %v13879_v14  ;;  %v13919_v28 = vshrl.u32 %v11395_v60, 16  ;;  %v3427_v14 = vpack.c.bf16 %v335_v59, %v335_v59  ;;  %v7810_v60 = vld [vmem:[%s13425_s4 + $0x2] sm:$0x3] }
 0x2b9   : > { %10166 = vmatprep.subr.msk.bf16.mxu1 %vm461_vm0, %v7810_v60 }
 0x2ba   : > { %v3432_v8 = vor.u32 %v3430_v46, %v13919_v28 }
 0x2bf   : > { %8846 = vmatmul.mubr.msk.bf16.gmra.mrb[4].mxu0 %vm388_vm1, %v13880_v15  ;;  %v3436_v15 = vsel %vm1218_vm3, %v3432_v8, %v3435_v42 }
 0x2c0   : > { %8849 = vmatprep.mubr.msk.bf16.mxu0 %vm388_vm1, %v13881_v27  ;;  %v3444_v27 = vshrl.u32 %v11639_v54, 16 }
 0x2c2   : > { %v3446_v24 = vor.u32 %v3444_v27, %v3442_v17 }
 0x2c7   : > { %8850 = vmatmul.mubr.msk.bf16.gmra.mrb[8].mxu0 %vm388_vm1, %v13882_v48  ;;  %v3448_v48 = vshll.u32 %v3427_v14, 16 }
 0x2c8   : > { %8853 = vmatprep.mubr.msk.bf16.mxu0 %vm388_vm1, %v13883_v35 }
 0x2c9   : > { %v3450_v35 = vrot.slane %v3448_v48, 1  ;;  %v11836_v48 = vld [vmem:[%s13425_s4 + $0x4] sm:$0x3] }
 0x2cf   : > { %8854 = vmatmul.mubr.msk.bf16.gmra.mrb[12].mxu0 %vm388_vm1, %v13884_v57  ;;  %v3451_v57 = vsel %vm1218_vm3, %v3446_v24, %v3450_v35 }
 0x2d0   : > { %8857 = vmatprep.mubr.msk.bf16.mxu0 %vm388_vm1, %v13885_v5  ;;  %v10225_v5 = vmov 0.0  }
 0x2d1   : > { %4009 = vst.msk [vmem:[#allocation2 + $0x10] sm:$0xff] %vm388_vm1, %v10225_v5  ;;  %4010 = vst.msk [vmem:[#allocation2 + $0x18] sm:$0xff] %vm388_vm1, %v10225_v5 }
 0x2d2   : > { %4011 = vst.msk [vmem:[#allocation2 + $0x20] sm:$0xff] %vm388_vm1, %v10225_v5  ;;  %4012 = vst.msk [vmem:[#allocation2 + $0x28] sm:$0xff] %vm388_vm1, %v10225_v5 }
 0x2d3   : > { %4013 = vst.msk [vmem:[#allocation2 + $0x1b0] sm:$0xff] %vm388_vm1, %v10225_v5  ;;  %4014 = vst.msk [vmem:[#allocation2 + $0x1b8] sm:$0xff] %vm388_vm1, %v10225_v5 }
 0x2d4   : > { %4015 = vst.msk [vmem:[#allocation2 + $0x1c0] sm:$0xff] %vm388_vm1, %v10225_v5  ;;  %4016 = vst.msk [vmem:[#allocation2 + $0x1c8] sm:$0xff] %vm388_vm1, %v10225_v5 }
 0x2d5   : > { %4021 = vst.msk [vmem:[#allocation2 + $0x40] sm:$0xff] %vm388_vm1, %v10225_v5  ;;  %4024 = vst.msk [vmem:[#allocation2 + $0x58] sm:$0xff] %vm388_vm1, %v10225_v5 }
 0x2d6   : > { %4027 = vst.msk [vmem:[#allocation2 + $0x70] sm:$0xff] %vm388_vm1, %v10225_v5  ;;  %4030 = vst.msk [vmem:[#allocation2 + $0x88] sm:$0xff] %vm388_vm1, %v10225_v5 }
 0x2d7   : > { %8858 = vmatmul.mubr.msk.bf16.gmra.mrb[16].mxu0 %vm388_vm1, %v13886_v32  ;;  %4033 = vst.msk [vmem:[#allocation2 + $0xa0] sm:$0xff] %vm388_vm1, %v10225_v5  ;;  %4036 = vst.msk [vmem:[#allocation2 + $0xb8] sm:$0xff] %vm388_vm1, %v10225_v5 }
 0x2d8   : > { %8861 = vmatprep.mubr.msk.bf16.mxu0 %vm388_vm1, %v13887_v63  ;;  %4039 = vst.msk [vmem:[#allocation2 + $0xd0] sm:$0xff] %vm388_vm1, %v10225_v5  ;;  %4042 = vst.msk [vmem:[#allocation2 + $0xe8] sm:$0xff] %vm388_vm1, %v10225_v5  ;;  %v4068_v54 = vld [vmem:[#allocation2 + $0x18] sm:$0xff]  ;;  %v4248_v63 = vsel %vm461_vm0, %v7810_v60, 0  ;;  %v4067_v53 = vld [vmem:[#allocation2 + $0x10] sm:$0xff] }
 0x2d9   : > { %4045 = vst.msk [vmem:[#allocation2 + $0x100] sm:$0xff] %vm388_vm1, %v10225_v5  ;;  %4048 = vst.msk [vmem:[#allocation2 + $0x118] sm:$0xff] %vm388_vm1, %v10225_v5  ;;  %v4069_v32 = vld [vmem:[#allocation2 + $0x20] sm:$0xff]  ;;  %8940 = vmatpush3.bf16.msra.mxu1 %v4248_v63  ;;  %v4123_v42 = vpack.c.bf16 %v4068_v54, %v4067_v53 }
 0x2da   : > { %4051 = vst.msk [vmem:[#allocation2 + $0x130] sm:$0xff] %vm388_vm1, %v10225_v5  ;;  %4054 = vst.msk [vmem:[#allocation2 + $0x148] sm:$0xff] %vm388_vm1, %v10225_v5 }
 0x2db   : > { %4057 = vst.msk [vmem:[#allocation2 + $0x160] sm:$0xff] %vm388_vm1, %v10225_v5  ;;  %4060 = vst.msk [vmem:[#allocation2 + $0x178] sm:$0xff] %vm388_vm1, %v10225_v5  ;;  %v4460_v38 = vshrl.u32 %v4123_v42, 16 }
 0x2dc   : > { %4063 = vst.msk [vmem:[#allocation2 + $0x190] sm:$0xff] %vm388_vm1, %v10225_v5  ;;  %4066 = vst.msk [vmem:[#allocation2 + $0x1a8] sm:$0xff] %vm388_vm1, %v10225_v5  ;;  %v4076_v63 = vld [vmem:[#allocation2 + $0x58] sm:$0xff] }
 0x2df   : > { %8862 = vmatmul.mubr.msk.bf16.gmra.mrb[20].mxu0 %vm388_vm1, %v13888_v19  ;;  %v11785_v19 = vpack.c.bf16 %v4069_v32, %v4068_v54 }
 0x2e0   : > { %8865 = vmatprep.mubr.msk.bf16.mxu0 %vm388_vm1, %v13889_v49  ;;  %v4148_v49 = vld [vmem:[%s13425_s4] sm:$0x3] }
 0x2e1   : > { %8941 = vmatprep.mubr.msk.bf16.mxu1 %vm388_vm1, %v11785_v19  ;;  %10167 = vmatprep.subr.msk.bf16.mxu1 %vm461_vm0, %v4148_v49 }
 0x2e7   : > { %8866 = vmatmul.mubr.msk.bf16.gmra.mrb[24].mxu0 %vm388_vm1, %v13890_v52  ;;  %v4070_v52 = vld [vmem:[#allocation2 + $0x28] sm:$0xff] }
 0x2e8   : > { %8869 = vmatprep.mubr.msk.bf16.mxu0 %vm388_vm1, %v13891_v39  ;;  %v4124_v29 = vpack.c.bf16 %v4070_v52, %v4069_v32  ;;  %v4463_v39 = vshll.u32 %v4123_v42, 16 }
 0x2ea   : > { %v4468_v20 = vshrl.u32 %v4124_v29, 16  ;;  %v4471_v17 = vshll.u32 %v4124_v29, 16 }
 0x2ec   : > { %v4473_v9 = vrot.slane %v4471_v17, 4 }
 0x2ef   : > { %8870 = vmatmul.mubr.msk.bf16.gmra.mrb[28].mxu0 %vm388_vm1, %v13892_v55  ;;  %v4465_v55 = vrot.slane %v4463_v39, 4 }
 0x2f0   : > { %8873 = vmatprep.mubr.msk.bf16.mxu0 %vm388_vm1, %v13893_v33  ;;  %v4470_v33 = vrot.slane %v4468_v20, 3 }
 0x2f7   : > { %8874 = vmatmul.mubr.msk.bf16.gmra.mrb[32].mxu0 %vm388_vm1, %v13894_v34  ;;  %v11793_v34 = vor.u32 %v4473_v9, %v4470_v33 }
 0x2f8   : > { %8877 = vmatprep.mubr.msk.bf16.mxu0 %vm388_vm1, %v13895_v13 }
 0x2ff   : > { %8878 = vmatmul.mubr.msk.bf16.gmra.mrb[36].mxu0 %vm388_vm1, %v13897_v62 }
 0x300   : > { %8881 = vmatprep.mubr.msk.bf16.mxu0 %vm388_vm1, %v3164_v56 }
 0x307   : > { %8882 = vmatmul.mubr.msk.bf16.gmra.mrb[40].mxu0 %vm388_vm1, %v3168_v51 }
 0x308   : > { %8885 = vmatprep.mubr.msk.bf16.mxu0 %vm388_vm1, %v3177_v22 }
 0x30f   : > { %8886 = vmatmul.mubr.msk.bf16.gmra.mrb[44].mxu0 %vm388_vm1, %v3186_v45  ;;  %v3431_v45 = vsel %vm1218_vm3, %v13917_v1, %v3430_v46 }
 0x310   : > { %8891 = vmatprep.mubr.msk.bf16.mxu0 %vm388_vm1, %v13898_v12 }
 0x317   : > { %8892 = vmatmul.mubr.msk.bf16.vlgmr.msra.gmra.mrb[0].mxu0 %vm388_vm1, %v13899_v21 }
 0x318   : > { %8895 = vmatprep.mubr.msk.bf16.mxu0 %vm388_vm1, %v13900_v36 }
 0x31f   : > { %8896 = vmatmul.mubr.msk.bf16.gmra.mrb[4].mxu0 %vm388_vm1, %v13901_v11 }
 0x320   : > { %8899 = vmatprep.mubr.msk.bf16.mxu0 %vm388_vm1, %v13902_v4 }
 0x327   : > { %8900 = vmatmul.mubr.msk.bf16.gmra.mrb[8].mxu0 %vm388_vm1, %v13903_v25 }
 0x328   : > { %8903 = vmatprep.mubr.msk.bf16.mxu0 %vm388_vm1, %v13904_v30 }
 0x32f   : > { %8904 = vmatmul.mubr.msk.bf16.gmra.mrb[12].mxu0 %vm388_vm1, %v13905_v26 }
 0x330   : > { %8907 = vmatprep.mubr.msk.bf16.mxu0 %vm388_vm1, %v13906_v37 }
 0x337   : > { %8908 = vmatmul.mubr.msk.bf16.gmra.mrb[16].mxu0 %vm388_vm1, %v13907_v2 }
 0x338   : > { %8911 = vmatprep.mubr.msk.bf16.mxu0 %vm388_vm1, %v13908_v40 }
 0x33f   : > { %8912 = vmatmul.mubr.msk.bf16.gmra.mrb[20].mxu0 %vm388_vm1, %v13909_v23 }
 0x340   : > { %8915 = vmatprep.mubr.msk.bf16.mxu0 %vm388_vm1, %v13910_v6 }
 0x347   : > { %8916 = vmatmul.mubr.msk.bf16.gmra.mrb[24].mxu0 %vm388_vm1, %v13911_v7 }
 0x348   : > { %8919 = vmatprep.mubr.msk.bf16.mxu0 %vm388_vm1, %v13912_v10 }
 0x34f   : > { %8920 = vmatmul.mubr.msk.bf16.gmra.mrb[28].mxu0 %vm388_vm1, %v13913_v41 }
 0x350   : > { %8923 = vmatprep.mubr.msk.bf16.mxu0 %vm388_vm1, %v13914_v43 }
 0x357   : > { %8924 = vmatmul.mubr.msk.bf16.gmra.mrb[32].mxu0 %vm388_vm1, %v13915_v0 }
 0x358   : > { %8927 = vmatprep.mubr.msk.bf16.mxu0 %vm388_vm1, %v13916_v50  ;;  %v4073_v50 = vld [vmem:[#allocation2 + $0x40] sm:$0xff] }
 0x35f   : > { %8928 = vmatmul.mubr.msk.bf16.gmra.mrb[36].mxu0 %vm388_vm1, %v13918_v47  ;;  %v4756_v47 = vsel %vm461_vm0, %v4148_v49, 0 }
 0x360   : > { %8931 = vmatprep.mubr.msk.bf16.mxu0 %vm388_vm1, %v3431_v45 }
 0x367   : > { %8932 = vmatmul.mubr.msk.bf16.gmra.mrb[40].mxu0 %vm388_vm1, %v3436_v15 }
 0x368   : > { %8935 = vmatprep.mubr.msk.bf16.mxu0 %vm388_vm1, %v3443_v58  ;;  %v4462_v58 = vrot.slane %v4460_v38, 3 }
 0x36a   : > { %v4466_v16 = vor.u32 %v4465_v55, %v4462_v58 }
 0x36c   : > { %v11797_v13 = vsel %vm690_vm2, %v4466_v16, %v11793_v34 }
 0x36f   : > { %8936 = vmatmul.mubr.msk.bf16.gmra.mrb[44].mxu0 %vm388_vm1, %v3451_v57 }
 0x3ea   : > { %v8893_v18 = vpop.f32.mrb[0].mxu0 }
 0x3eb   : > { %v3501_v61 = vpop.f32.mrb[1].mxu0 }
 0x3ec   : > { %v3795_v56 = vmul.f32 %v11802_v3, %v3501_v61  ;;  %v8894_v62 = vpop.f32.mrb[2].mxu0 }
 0x3ed   : > { %v3798_v31 = vmul.f32 %v8894_v62, %v11802_v3  ;;  %v3504_v51 = vpop.f32.mrb[3].mxu0  ;;  %v4082_v62 = vld [vmem:[#allocation2 + $0x88] sm:$0xff] }
 0x3ee   : > { %v3850_v22 = vadd.f32 %v11807_v44, %v3795_v56  ;;  %v3796_v12 = vmul.f32 %v11802_v3, %v3504_v51  ;;  %v4079_v51 = vld [vmem:[#allocation2 + $0x70] sm:$0xff] }
 0x3ef   : > { %v3853_v21 = vadd.f32 %v11807_v44, %v3798_v31 }
 0x3f0   : > { %v3898_v36 = vmax.f32 %v3850_v22, 0.0  ;;  %v3851_v11 = vadd.f32 %v11807_v44, %v3796_v12 }
 0x3f1   : > { %v3901_v4 = vmax.f32 %v3853_v21, 0.0 }
 0x3f2   : > { %4019 = vst.msk [vmem:[#allocation2 + $0x30] sm:$0xff] %vm388_vm1, %v3898_v36  ;;  %v3899_v25 = vmax.f32 %v3851_v11, 0.0  ;;  %v8897_v30 = vpop.f32.mrb[4].mxu0 }
 0x3f3   : > { %4022 = vst.msk [vmem:[#allocation2 + $0x48] sm:$0xff] %vm388_vm1, %v3901_v4  ;;  %v3801_v26 = vmul.f32 %v8897_v30, %v11802_v3  ;;  %v3517_v37 = vpop.f32.mrb[5].mxu0 }
 0x3f4   : > { %4020 = vst.msk [vmem:[#allocation2 + $0x38] sm:$0xff] %vm388_vm1, %v3899_v25  ;;  %v3799_v2 = vmul.f32 %v11802_v3, %v3517_v37  ;;  %v8898_v40 = vpop.f32.mrb[6].mxu0 }
 0x3f5   : > { %v3856_v23 = vadd.f32 %v11807_v44, %v3801_v26  ;;  %v3802_v6 = vmul.f32 %v8898_v40, %v11802_v3  ;;  %v3520_v7 = vpop.f32.mrb[7].mxu0 }
 0x3f6   : > { %v3854_v10 = vadd.f32 %v11807_v44, %v3799_v2 }
 0x3f7   : > { %v3904_v41 = vmax.f32 %v3856_v23, 0.0  ;;  %v3857_v43 = vadd.f32 %v11807_v44, %v3802_v6 }
 0x3f8   : > { %v3902_v0 = vmax.f32 %v3854_v10, 0.0 }
 0x3f9   : > { %4025 = vst.msk [vmem:[#allocation2 + $0x60] sm:$0xff] %vm388_vm1, %v3904_v41  ;;  %v3905_v46 = vmax.f32 %v3857_v43, 0.0  ;;  %v4071_v1 = vld [vmem:[#allocation2 + $0x30] sm:$0xff] }
 0x3fa   : > { %4023 = vst.msk [vmem:[#allocation2 + $0x50] sm:$0xff] %vm388_vm1, %v3902_v0  ;;  %v8901_v45 = vpop.f32.mrb[8].mxu0  ;;  %v11826_v59 = vpack.c.bf16 %v4071_v1, %v4070_v52  ;;  %v4074_v28 = vld [vmem:[#allocation2 + $0x48] sm:$0xff] }
 0x3fb   : > { %4026 = vst.msk [vmem:[#allocation2 + $0x68] sm:$0xff] %vm388_vm1, %v3905_v46  ;;  %v3805_v8 = vmul.f32 %v8901_v45, %v11802_v3  ;;  %v3533_v14 = vpop.f32.mrb[9].mxu0  ;;  %v4072_v15 = vld [vmem:[#allocation2 + $0x38] sm:$0xff]  ;;  %v11831_v27 = vpack.c.bf16 %v4074_v28, %v4073_v50  ;;  %v4085_v45 = vld [vmem:[#allocation2 + $0xa0] sm:$0xff] }
 0x3fc   : > { %v8902_v24 = vpop.f32.mrb[10].mxu0  ;;  %8942 = vmatmul.mubr.msk.bf16.vlgmr.msra.gmra.mrb[0].mxu1 %vm388_vm1, %v11826_v59  ;;  %v11840_v35 = vpack.c.bf16 %v4072_v15, %v4071_v1  ;;  %v11842_v57 = vpack.c.bf16 %v4073_v50, %v4072_v15 }
 0x3fd   : > { %13920 = vst [vmem:[#allocation3_spill] sm:$0xff] %v11831_v27  ;;  %v3860_v5 = vadd.f32 %v11807_v44, %v3805_v8  ;;  %8990 = vmatpush3.bf16.msra.mxu1 %v4756_v47  ;;  %v3536_v60 = vpop.f32.mrb[11].mxu0 }
 0x3fe   : > { %13921 = vst [vmem:[#allocation4_spill] sm:$0xff] %v11840_v35  ;;  %13922 = vst [vmem:[#allocation5_spill] sm:$0xff] %v11842_v57  ;;  %v3804_v54 = vmul.f32 %v11802_v3, %v3536_v60  ;;  %8945 = vmatprep.mubr.msk.bf16.mxu1 %vm388_vm1, %v11842_v57  ;;  %10168 = vmatprep.subr.msk.bf16.mxu1 %vm461_vm0, %v11836_v48 }
 0x3ff   : > { %v3908_v32 = vmax.f32 %v3860_v5, 0.0 }
 0x400   : > { %v3859_v49 = vadd.f32 %v11807_v44, %v3804_v54  ;;  %v4077_v53 = vld [vmem:[#allocation2 + $0x60] sm:$0xff] }
 0x401   : > { %4029 = vst.msk [vmem:[#allocation2 + $0x80] sm:$0xff] %vm388_vm1, %v3908_v32  ;;  %v4075_v52 = vld [vmem:[#allocation2 + $0x50] sm:$0xff]  ;;  %v11856_v58 = vpack.c.bf16 %v4077_v53, %v4076_v63 }
 0x402   : > { %v3907_v42 = vmax.f32 %v3859_v49, 0.0  ;;  %v8905_v29 = vpop.f32.mrb[12].mxu0  ;;  %v11852_v38 = vpack.c.bf16 %v4075_v52, %v4074_v28  ;;  %v11854_v39 = vpack.c.bf16 %v4076_v63, %v4075_v52  ;;  %v4078_v20 = vld [vmem:[#allocation2 + $0x68] sm:$0xff] }
 0x403   : > { %v3549_v17 = vpop.f32.mrb[13].mxu0  ;;  %13924 = vst [vmem:[#allocation21_spill] sm:$0xff] %v11856_v58  ;;  %v11858_v55 = vpack.c.bf16 %v4078_v20, %v4077_v53  ;;  %v11874_v30 = vpack.c.bf16 %v4079_v51, %v4078_v20  ;;  %v4088_v20 = vld [vmem:[#allocation2 + $0xb8] sm:$0xff] }
 0x404   : > { %13923 = vst [vmem:[#allocation20_spill] sm:$0xff] %v11854_v39  ;;  %4028 = vst.msk [vmem:[#allocation2 + $0x78] sm:$0xff] %vm388_vm1, %v3907_v42  ;;  %v3807_v33 = vmul.f32 %v11802_v3, %v3549_v17  ;;  %v8906_v9 = vpop.f32.mrb[14].mxu0  ;;  %8946 = vmatmul.mubr.msk.bf16.gmra.mrb[4].mxu1 %vm388_vm1, %v11852_v38 }
 0x405   : > { %13925 = vst [vmem:[#allocation22_spill] sm:$0xff] %v11858_v55  ;;  %v3810_v16 = vmul.f32 %v8906_v9, %v11802_v3  ;;  %v3552_v18 = vpop.f32.mrb[15].mxu0  ;;  %8949 = vmatprep.mubr.msk.bf16.mxu1 %vm388_vm1, %v11856_v58  ;;  %13927 = vst [vmem:[#allocation24_spill] sm:$0xff] %v11874_v30 }
 0x406   : > { %v3862_v61 = vadd.f32 %v11807_v44, %v3807_v33  ;;  %v3808_v56 = vmul.f32 %v11802_v3, %v3552_v18 }
 0x407   : > { %v3865_v31 = vadd.f32 %v11807_v44, %v3810_v16 }
 0x408   : > { %v3910_v22 = vmax.f32 %v3862_v61, 0.0  ;;  %v3863_v12 = vadd.f32 %v11807_v44, %v3808_v56  ;;  %v4081_v21 = vld [vmem:[#allocation2 + $0x80] sm:$0xff] }
 0x409   : > { %v3913_v36 = vmax.f32 %v3865_v31, 0.0  ;;  %v11871_v11 = vpack.c.bf16 %v4082_v62, %v4081_v21 }
 0x40a   : > { %4031 = vst.msk [vmem:[#allocation2 + $0x90] sm:$0xff] %vm388_vm1, %v3910_v22  ;;  %v3911_v4 = vmax.f32 %v3863_v12, 0.0  ;;  %v8909_v25 = vpop.f32.mrb[16].mxu0 }
 0x40b   : > { %13926 = vst [vmem:[#allocation23_spill] sm:$0xff] %v11871_v11  ;;  %4034 = vst.msk [vmem:[#allocation2 + $0xa8] sm:$0xff] %vm388_vm1, %v3913_v36  ;;  %v3813_v26 = vmul.f32 %v8909_v25, %v11802_v3  ;;  %v3565_v37 = vpop.f32.mrb[17].mxu0  ;;  %v4080_v2 = vld [vmem:[#allocation2 + $0x78] sm:$0xff] }
 0x40c   : > { %4032 = vst.msk [vmem:[#allocation2 + $0x98] sm:$0xff] %vm388_vm1, %v3911_v4  ;;  %v3811_v40 = vmul.f32 %v11802_v3, %v3565_v37  ;;  %v8910_v23 = vpop.f32.mrb[18].mxu0  ;;  %8950 = vmatmul.mubr.msk.bf16.gmra.mrb[8].mxu1 %vm388_vm1, %v11874_v30  ;;  %v11882_v6 = vpack.c.bf16 %v4080_v2, %v4079_v51  ;;  %v11884_v7 = vpack.c.bf16 %v4081_v21, %v4080_v2  ;;  %v4094_v37 = vld [vmem:[#allocation2 + $0xe8] sm:$0xff] }
 0x40d   : > { %v3868_v10 = vadd.f32 %v11807_v44, %v3813_v26  ;;  %v3814_v41 = vmul.f32 %v8910_v23, %v11802_v3  ;;  %v3568_v43 = vpop.f32.mrb[19].mxu0 }
 0x40e   : > { %13928 = vst [vmem:[#allocation25_spill] sm:$0xff] %v11882_v6  ;;  %13929 = vst [vmem:[#allocation26_spill] sm:$0xff] %v11884_v7  ;;  %v3866_v0 = vadd.f32 %v11807_v44, %v3811_v40  ;;  %8953 = vmatprep.mubr.msk.bf16.mxu1 %vm388_vm1, %v11884_v7  ;;  %v4091_v40 = vld [vmem:[#allocation2 + $0xd0] sm:$0xff] }
 0x40f   : > { %v3916_v50 = vmax.f32 %v3868_v10, 0.0  ;;  %v3869_v46 = vadd.f32 %v11807_v44, %v3814_v41 }
 0x410   : > { %v3914_v1 = vmax.f32 %v3866_v0, 0.0 }
 0x411   : > { %4037 = vst.msk [vmem:[#allocation2 + $0xc0] sm:$0xff] %vm388_vm1, %v3916_v50  ;;  %v3917_v47 = vmax.f32 %v3869_v46, 0.0  ;;  %v4083_v28 = vld [vmem:[#allocation2 + $0x90] sm:$0xff] }
 0x412   : > { %4035 = vst.msk [vmem:[#allocation2 + $0xb0] sm:$0xff] %vm388_vm1, %v3914_v1  ;;  %v8913_v8 = vpop.f32.mrb[20].mxu0  ;;  %v11894_v14 = vpack.c.bf16 %v4083_v28, %v4082_v62  ;;  %v4086_v15 = vld [vmem:[#allocation2 + $0xa8] sm:$0xff] }
 0x413   : > { %4038 = vst.msk [vmem:[#allocation2 + $0xc8] sm:$0xff] %vm388_vm1, %v3917_v47  ;;  %v3817_v24 = vmul.f32 %v8913_v8, %v11802_v3  ;;  %v3581_v5 = vpop.f32.mrb[21].mxu0  ;;  %v4084_v60 = vld [vmem:[#allocation2 + $0x98] sm:$0xff]  ;;  %v11898_v54 = vpack.c.bf16 %v4086_v15, %v4085_v45 }
 0x414   : > { %13930 = vst [vmem:[#allocation27_spill] sm:$0xff] %v11894_v14  ;;  %v8914_v32 = vpop.f32.mrb[22].mxu0  ;;  %8954 = vmatmul.mubr.msk.bf16.gmra.mrb[12].mxu1 %vm388_vm1, %v11894_v14  ;;  %v11902_v63 = vpack.c.bf16 %v4084_v60, %v4083_v28  ;;  %v11904_v49 = vpack.c.bf16 %v4085_v45, %v4084_v60 }
 0x415   : > { %13931 = vst [vmem:[#allocation28_spill] sm:$0xff] %v11898_v54  ;;  %v3872_v53 = vadd.f32 %v11807_v44, %v3817_v24  ;;  %v3584_v52 = vpop.f32.mrb[23].mxu0 }
 0x416   : > { %13932 = vst [vmem:[#allocation29_spill] sm:$0xff] %v11902_v63  ;;  %13933 = vst [vmem:[#allocation30_spill] sm:$0xff] %v11904_v49  ;;  %v3816_v42 = vmul.f32 %v11802_v3, %v3584_v52  ;;  %8957 = vmatprep.mubr.msk.bf16.mxu1 %vm388_vm1, %v11904_v49 }
 0x417   : > { %v3920_v29 = vmax.f32 %v3872_v53, 0.0 }
 0x418   : > { %v3871_v17 = vadd.f32 %v11807_v44, %v3816_v42  ;;  %v4089_v33 = vld [vmem:[#allocation2 + $0xc0] sm:$0xff] }
 0x419   : > { %4041 = vst.msk [vmem:[#allocation2 + $0xe0] sm:$0xff] %vm388_vm1, %v3920_v29  ;;  %v4087_v9 = vld [vmem:[#allocation2 + $0xb0] sm:$0xff]  ;;  %v11916_v51 = vpack.c.bf16 %v4089_v33, %v4088_v20 }
 0x41a   : > { %v3919_v16 = vmax.f32 %v3871_v17, 0.0  ;;  %v8917_v18 = vpop.f32.mrb[24].mxu0  ;;  %v11912_v61 = vpack.c.bf16 %v4087_v9, %v4086_v15  ;;  %v11914_v56 = vpack.c.bf16 %v4088_v20, %v4087_v9  ;;  %v4090_v62 = vld [vmem:[#allocation2 + $0xc8] sm:$0xff]  ;;  %v4097_v17 = vld [vmem:[#allocation2 + $0x100] sm:$0xff] }
 0x41b   : > { %v3597_v31 = vpop.f32.mrb[25].mxu0  ;;  %v11918_v22 = vpack.c.bf16 %v4090_v62, %v4089_v33  ;;  %v11934_v1 = vpack.c.bf16 %v4091_v40, %v4090_v62 }
 0x41c   : > { %13934 = vst [vmem:[#allocation31_spill] sm:$0xff] %v11912_v61  ;;  %4040 = vst.msk [vmem:[#allocation2 + $0xd8] sm:$0xff] %vm388_vm1, %v3919_v16  ;;  %v3819_v12 = vmul.f32 %v11802_v3, %v3597_v31  ;;  %v8918_v21 = vpop.f32.mrb[26].mxu0  ;;  %8958 = vmatmul.mubr.msk.bf16.gmra.mrb[16].mxu1 %vm388_vm1, %v11912_v61 }
 0x41d   : > { %v3822_v36 = vmul.f32 %v8918_v21, %v11802_v3  ;;  %v3600_v4 = vpop.f32.mrb[27].mxu0  ;;  %8961 = vmatprep.mubr.msk.bf16.mxu1 %vm388_vm1, %v11916_v51 }
 0x41e   : > { %v3874_v25 = vadd.f32 %v11807_v44, %v3819_v12  ;;  %v3820_v26 = vmul.f32 %v11802_v3, %v3600_v4 }
 0x41f   : > { %v3877_v2 = vadd.f32 %v11807_v44, %v3822_v36 }
 0x420   : > { %v3922_v23 = vmax.f32 %v3874_v25, 0.0  ;;  %v3875_v10 = vadd.f32 %v11807_v44, %v3820_v26  ;;  %v4093_v41 = vld [vmem:[#allocation2 + $0xe0] sm:$0xff] }
 0x421   : > { %v3925_v43 = vmax.f32 %v3877_v2, 0.0  ;;  %v11931_v0 = vpack.c.bf16 %v4094_v37, %v4093_v41 }
 0x422   : > { %4043 = vst.msk [vmem:[#allocation2 + $0xf0] sm:$0xff] %vm388_vm1, %v3922_v23  ;;  %v3923_v50 = vmax.f32 %v3875_v10, 0.0  ;;  %v8921_v46 = vpop.f32.mrb[28].mxu0  ;;  %v4100_v10 = vld [vmem:[#allocation2 + $0x118] sm:$0xff] }
 0x423   : > { %4046 = vst.msk [vmem:[#allocation2 + $0x108] sm:$0xff] %vm388_vm1, %v3925_v43  ;;  %v3825_v45 = vmul.f32 %v8921_v46, %v11802_v3  ;;  %v3613_v47 = vpop.f32.mrb[29].mxu0  ;;  %v4092_v28 = vld [vmem:[#allocation2 + $0xd8] sm:$0xff] }
 0x424   : > { %4044 = vst.msk [vmem:[#allocation2 + $0xf8] sm:$0xff] %vm388_vm1, %v3923_v50  ;;  %v3823_v8 = vmul.f32 %v11802_v3, %v3613_v47  ;;  %v8922_v15 = vpop.f32.mrb[30].mxu0  ;;  %8962 = vmatmul.mubr.msk.bf16.gmra.mrb[20].mxu1 %vm388_vm1, %v11934_v1  ;;  %v11942_v24 = vpack.c.bf16 %v4092_v28, %v4091_v40  ;;  %v11944_v5 = vpack.c.bf16 %v4093_v41, %v4092_v28 }
 0x425   : > { %v3880_v60 = vadd.f32 %v11807_v44, %v3825_v45  ;;  %v3826_v32 = vmul.f32 %v8922_v15, %v11802_v3  ;;  %v3616_v53 = vpop.f32.mrb[31].mxu0 }
 0x426   : > { %v3878_v52 = vadd.f32 %v11807_v44, %v3823_v8  ;;  %8965 = vmatprep.mubr.msk.bf16.mxu1 %vm388_vm1, %v11944_v5 }
 0x427   : > { %v3928_v42 = vmax.f32 %v3880_v60, 0.0  ;;  %v3881_v29 = vadd.f32 %v11807_v44, %v3826_v32 }
 0x428   : > { %v3926_v20 = vmax.f32 %v3878_v52, 0.0 }
 0x429   : > { %4049 = vst.msk [vmem:[#allocation2 + $0x120] sm:$0xff] %vm388_vm1, %v3928_v42  ;;  %v3929_v33 = vmax.f32 %v3881_v29, 0.0  ;;  %v4095_v9 = vld [vmem:[#allocation2 + $0xf0] sm:$0xff] }
 0x42a   : > { %4047 = vst.msk [vmem:[#allocation2 + $0x110] sm:$0xff] %vm388_vm1, %v3926_v20  ;;  %v8925_v16 = vpop.f32.mrb[32].mxu0  ;;  %v11954_v18 = vpack.c.bf16 %v4095_v9, %v4094_v37  ;;  %v4098_v62 = vld [vmem:[#allocation2 + $0x108] sm:$0xff] }
 0x42b   : > { %4050 = vst.msk [vmem:[#allocation2 + $0x128] sm:$0xff] %vm388_vm1, %v3929_v33  ;;  %v3829_v31 = vmul.f32 %v8925_v16, %v11802_v3  ;;  %v3629_v12 = vpop.f32.mrb[33].mxu0  ;;  %v4096_v21 = vld [vmem:[#allocation2 + $0xf8] sm:$0xff]  ;;  %v11958_v36 = vpack.c.bf16 %v4098_v62, %v4097_v17  ;;  %v4106_v33 = vld [vmem:[#allocation2 + $0x148] sm:$0xff]  ;;  %v4103_v16 = vld [vmem:[#allocation2 + $0x130] sm:$0xff] }
 0x42c   : > { %v8926_v4 = vpop.f32.mrb[34].mxu0  ;;  %8966 = vmatmul.mubr.msk.bf16.gmra.mrb[24].mxu1 %vm388_vm1, %v11954_v18  ;;  %v11962_v25 = vpack.c.bf16 %v4096_v21, %v4095_v9  ;;  %v11964_v26 = vpack.c.bf16 %v4097_v17, %v4096_v21 }
 0x42d   : > { %v3884_v37 = vadd.f32 %v11807_v44, %v3829_v31  ;;  %v3632_v2 = vpop.f32.mrb[35].mxu0 }
 0x42e   : > { %v3828_v40 = vmul.f32 %v11802_v3, %v3632_v2  ;;  %8969 = vmatprep.mubr.msk.bf16.mxu1 %vm388_vm1, %v11964_v26 }
 0x42f   : > { %v3932_v23 = vmax.f32 %v3884_v37, 0.0 }
 0x430   : > { %v3883_v41 = vadd.f32 %v11807_v44, %v3828_v40  ;;  %v4101_v43 = vld [vmem:[#allocation2 + $0x120] sm:$0xff] }
 0x431   : > { %4053 = vst.msk [vmem:[#allocation2 + $0x140] sm:$0xff] %vm388_vm1, %v3932_v23  ;;  %v4099_v50 = vld [vmem:[#allocation2 + $0x110] sm:$0xff]  ;;  %v11976_v60 = vpack.c.bf16 %v4101_v43, %v4100_v10 }
 0x432   : > { %v3931_v46 = vmax.f32 %v3883_v41, 0.0  ;;  %v8929_v45 = vpop.f32.mrb[36].mxu0  ;;  %v11972_v47 = vpack.c.bf16 %v4099_v50, %v4098_v62  ;;  %v11974_v28 = vpack.c.bf16 %v4100_v10, %v4099_v50  ;;  %v4102_v8 = vld [vmem:[#allocation2 + $0x128] sm:$0xff] }
 0x433   : > { %v3645_v15 = vpop.f32.mrb[37].mxu0  ;;  %v11978_v32 = vpack.c.bf16 %v4102_v8, %v4101_v43  ;;  %v11994_v40 = vpack.c.bf16 %v4103_v16, %v4102_v8 }
 0x434   : > { %4052 = vst.msk [vmem:[#allocation2 + $0x138] sm:$0xff] %vm388_vm1, %v3931_v46  ;;  %v3831_v53 = vmul.f32 %v11802_v3, %v3645_v15  ;;  %v8930_v52 = vpop.f32.mrb[38].mxu0  ;;  %8970 = vmatmul.mubr.msk.bf16.gmra.mrb[28].mxu1 %vm388_vm1, %v11972_v47 }
 0x435   : > { %v3834_v42 = vmul.f32 %v8930_v52, %v11802_v3  ;;  %v3648_v29 = vpop.f32.mrb[39].mxu0  ;;  %8973 = vmatprep.mubr.msk.bf16.mxu1 %vm388_vm1, %v11976_v60 }
 0x436   : > { %v3886_v20 = vadd.f32 %v11807_v44, %v3831_v53  ;;  %v3832_v17 = vmul.f32 %v11802_v3, %v3648_v29 }
 0x437   : > { %v3889_v9 = vadd.f32 %v11807_v44, %v3834_v42 }
 0x438   : > { %v3934_v62 = vmax.f32 %v3886_v20, 0.0  ;;  %v3887_v31 = vadd.f32 %v11807_v44, %v3832_v17  ;;  %v4105_v12 = vld [vmem:[#allocation2 + $0x140] sm:$0xff] }
 0x439   : > { %v3937_v21 = vmax.f32 %v3889_v9, 0.0  ;;  %v11991_v4 = vpack.c.bf16 %v4106_v33, %v4105_v12  ;;  %v4109_v17 = vld [vmem:[#allocation2 + $0x160] sm:$0xff] }
 0x43a   : > { %4055 = vst.msk [vmem:[#allocation2 + $0x150] sm:$0xff] %vm388_vm1, %v3934_v62  ;;  %v3935_v37 = vmax.f32 %v3887_v31, 0.0  ;;  %v8933_v2 = vpop.f32.mrb[40].mxu0 }
 0x43b   : > { %4058 = vst.msk [vmem:[#allocation2 + $0x168] sm:$0xff] %vm388_vm1, %v3937_v21  ;;  %v3837_v23 = vmul.f32 %v8933_v2, %v11802_v3  ;;  %v3661_v10 = vpop.f32.mrb[41].mxu0  ;;  %v4104_v41 = vld [vmem:[#allocation2 + $0x138] sm:$0xff] }
 0x43c   : > { %4056 = vst.msk [vmem:[#allocation2 + $0x158] sm:$0xff] %vm388_vm1, %v3935_v37  ;;  %v3835_v43 = vmul.f32 %v11802_v3, %v3661_v10  ;;  %v8934_v50 = vpop.f32.mrb[42].mxu0  ;;  %8974 = vmatmul.mubr.msk.bf16.gmra.mrb[32].mxu1 %vm388_vm1, %v11994_v40  ;;  %v12002_v46 = vpack.c.bf16 %v4104_v41, %v4103_v16  ;;  %v12004_v45 = vpack.c.bf16 %v4105_v12, %v4104_v41  ;;  %v13595_v10 = vshrl.u32 %v11831_v27, 16 }
 0x43d   : > { %v3892_v8 = vadd.f32 %v11807_v44, %v3837_v23  ;;  %v3838_v15 = vmul.f32 %v8934_v50, %v11802_v3  ;;  %v3664_v53 = vpop.f32.mrb[43].mxu0 }
 0x43e   : > { %v3890_v52 = vadd.f32 %v11807_v44, %v3835_v43  ;;  %8977 = vmatprep.mubr.msk.bf16.mxu1 %vm388_vm1, %v12004_v45  ;;  %v13597_v53 = vshll.u32 %v11831_v27, 16 }
 0x43f   : > { %v3940_v42 = vmax.f32 %v3892_v8, 0.0  ;;  %v3893_v29 = vadd.f32 %v11807_v44, %v3838_v15 }
 0x440   : > { %v3938_v20 = vmax.f32 %v3890_v52, 0.0  ;;  %v13598_v52 = vshll.u32 %v11840_v35, 16 }
 0x441   : > { %4061 = vst.msk [vmem:[#allocation2 + $0x180] sm:$0xff] %vm388_vm1, %v3940_v42  ;;  %v3941_v9 = vmax.f32 %v3893_v29, 0.0  ;;  %v4107_v16 = vld [vmem:[#allocation2 + $0x150] sm:$0xff] }
 0x442   : > { %4059 = vst.msk [vmem:[#allocation2 + $0x170] sm:$0xff] %vm388_vm1, %v3938_v20  ;;  %v8937_v62 = vpop.f32.mrb[44].mxu0  ;;  %v12014_v31 = vpack.c.bf16 %v4107_v16, %v4106_v33  ;;  %v4110_v12 = vld [vmem:[#allocation2 + $0x168] sm:$0xff]  ;;  %v13596_v33 = vshrl.u32 %v11840_v35, 16  ;;  %v4112_v20 = vld [vmem:[#allocation2 + $0x178] sm:$0xff] }
 0x443   : > { %4062 = vst.msk [vmem:[#allocation2 + $0x188] sm:$0xff] %vm388_vm1, %v3941_v9  ;;  %v3841_v21 = vmul.f32 %v8937_v62, %v11802_v3  ;;  %v3677_v37 = vpop.f32.mrb[45].mxu0  ;;  %v4108_v2 = vld [vmem:[#allocation2 + $0x158] sm:$0xff]  ;;  %v12018_v23 = vpack.c.bf16 %v4110_v12, %v4109_v17 }
 0x444   : > { %v8938_v41 = vpop.f32.mrb[46].mxu0  ;;  %8978 = vmatmul.mubr.msk.bf16.gmra.mrb[36].mxu1 %vm388_vm1, %v12014_v31  ;;  %v12023_v43 = vpack.c.bf16 %v4108_v2, %v4107_v16  ;;  %v12025_v50 = vpack.c.bf16 %v4109_v17, %v4108_v2  ;;  %v4488_v17 = vrot.slane %v13595_v10, 3 }
 0x445   : > { %v3896_v8 = vadd.f32 %v11807_v44, %v3841_v21  ;;  %v3680_v15 = vpop.f32.mrb[47].mxu0  ;;  %v4479_v41 = vrot.slane %v13596_v33, 3  ;;  %v13940_v33 = vshll.u32 %v11882_v6, 16 }
 0x446   : > { %v3840_v42 = vmul.f32 %v11802_v3, %v3680_v15  ;;  %8981 = vmatprep.mubr.msk.bf16.mxu1 %vm388_vm1, %v12025_v50 }
 0x447   : > { %v3944_v29 = vmax.f32 %v3896_v8, 0.0  ;;  %v4491_v8 = vrot.slane %v13597_v53, 4  ;;  %v4518_v27 = vrot.slane %v13940_v33, 4  ;;  %v13619_v33 = vshrl.u32 %v11898_v54, 16 }
 0x448   : > { %v3895_v16 = vadd.f32 %v11807_v44, %v3840_v42  ;;  %v4113_v62 = vld [vmem:[#allocation2 + $0x180] sm:$0xff] }
 0x449   : > { %4065 = vst.msk [vmem:[#allocation2 + $0x1a0] sm:$0xff] %vm388_vm1, %v3944_v29  ;;  %v4111_v3 = vld [vmem:[#allocation2 + $0x170] sm:$0xff]  ;;  %v4482_v29 = vrot.slane %v13598_v52, 4  ;;  %v12054_v2 = vpack.c.bf16 %v4113_v62, %v4112_v20  ;;  %v4492_v30 = vor.u32 %v4491_v8, %v4488_v17  ;;  %v13620_v17 = vshll.u32 %v11898_v54, 16 }
 0x44a   : > { %v3943_v42 = vmax.f32 %v3895_v16, 0.0  ;;  %v12048_v10 = vpack.c.bf16 %v4111_v3, %v4110_v12  ;;  %v12050_v21 = vpack.c.bf16 %v4112_v20, %v4111_v3  ;;  %v4114_v37 = vld [vmem:[#allocation2 + $0x188] sm:$0xff]  ;;  %v13935_v12 = vshrl.u32 %v11854_v39, 16 }
 0x44b   : > { %v12056_v9 = vpack.c.bf16 %v4114_v37, %v4113_v62  ;;  %v13936_v3 = vshll.u32 %v11854_v39, 16  ;;  %v13937_v20 = vshrl.u32 %v11858_v55, 16  ;;  %v13938_v62 = vshll.u32 %v11858_v55, 16 }
 0x44c   : > { %4064 = vst.msk [vmem:[#allocation2 + $0x198] sm:$0xff] %vm388_vm1, %v3943_v42  ;;  %8982 = vmatmul.mubr.msk.bf16.gmra.mrb[40].mxu1 %vm388_vm1, %v12048_v10  ;;  %v4497_v16 = vrot.slane %v13935_v12, 3  ;;  %v13939_v42 = vshrl.u32 %v11882_v6, 16  ;;  %v4483_v35 = vor.u32 %v4482_v29, %v4479_v41  ;;  %v13621_v12 = vshrl.u32 %v11852_v38, 16 }
 0x44d   : > { %v4500_v44 = vrot.slane %v13936_v3, 4  ;;  %v4506_v52 = vrot.slane %v13937_v20, 3  ;;  %v4509_v15 = vrot.slane %v13938_v62, 4  ;;  %8985 = vmatprep.mubr.msk.bf16.mxu1 %vm388_vm1, %v12054_v2  ;;  %v12079_v3 = vld [vmem:[#allocation2 + $0x190] sm:$0xff]  ;;  %v13941_v20 = vshrl.u32 %v11871_v11, 16 }
 0x44e   : > { %v4515_v53 = vrot.slane %v13939_v42, 3  ;;  %v13942_v62 = vshll.u32 %v11871_v11, 16  ;;  %v13622_v42 = vshll.u32 %v11852_v38, 16  ;;  %v12089_v39 = vpack.c.bf16 %v12079_v3, %v4114_v37 }
 0x44f   : > { %v4524_v55 = vrot.slane %v13941_v20, 3  ;;  %v4501_v58 = vor.u32 %v4500_v44, %v4497_v16  ;;  %v4510_v57 = vor.u32 %v4509_v15, %v4506_v52  ;;  %v13944_v41 = vshrl.u32 %v11902_v63, 16 }
 0x450   : > { %v4527_v7 = vrot.slane %v13942_v62, 4  ;;  %v4519_v6 = vor.u32 %v4518_v27, %v4515_v53  ;;  %13943 = vst [vmem:[#allocation32_spill] sm:$0xff] %v12089_v39  ;;  %v13945_v20 = vshll.u32 %v11902_v63, 16  ;;  %v4484_v52 = vsel %vm690_vm2, %v11793_v34, %v4483_v35  ;;  %v12138_v16 = vld [vmem:[#allocation2 + $0x1a0] sm:$0xff] }
 0x451   : > { %v4533_v29 = vrot.slane %v13944_v41, 3  ;;  %v5215_v27 = vsel %vm461_vm0, %v11836_v48, 0  ;;  %v4493_v37 = vsel %vm690_vm2, %v4483_v35, %v4492_v30  ;;  %v12106_v8 = vsel %vm690_vm2, %v4492_v30, %v4501_v58 }
 0x452   : > { %v4536_v11 = vrot.slane %v13945_v20, 4  ;;  %v12100_v53 = vor.u32 %v4527_v7, %v4524_v55  ;;  %13946 = vst [vmem:[#allocation33_spill] sm:$0xff] %v12106_v8  ;;  %v12109_v15 = vsel %vm690_vm2, %v4501_v58, %v4510_v57  ;;  %v5736_v44 = vrot.slane %v13622_v42, 4 }
 0x453   : > { %13947 = vst [vmem:[#allocation34_spill] sm:$0xff] %v12109_v15  ;;  %v12113_v34 = vld [vmem:[#allocation2 + $0x198] sm:$0xff]  ;;  %v12118_v48 = vsel %vm690_vm2, %v4510_v57, %v4519_v6  ;;  %v12126_v55 = vrot.slane %v13619_v33, 3  ;;  %v5735_v58 = vrot.slane %v13621_v12, 3  ;;  %v12134_v7 = vrot.slane %v13620_v17, 4 }
 0x454   : > { %8986 = vmatmul.mubr.msk.bf16.gmra.mrb[44].mxu1 %vm388_vm1, %v12089_v39  ;;  %13948 = vst [vmem:[#allocation35_spill] sm:$0xff] %v12118_v48  ;;  %v12122_v35 = vsel %vm690_vm2, %v4519_v6, %v12100_v53  ;;  %v12130_v30 = vor.u32 %v4536_v11, %v4533_v29  ;;  %v13623_v41 = vshrl.u32 %v11894_v14, 16  ;;  %v12145_v11 = vpack.c.bf16 %v12138_v16, %v12113_v34  ;;  %v12162_v33 = vld [vmem:[%s13425_s4 + $0x8] sm:$0x3] }
 0x455   : > { %8991 = vmatprep.mubr.msk.bf16.mxu1 %vm388_vm1, %v11797_v13  ;;  %13949 = vst [vmem:[#allocation36_spill] sm:$0xff] %v12122_v35  ;;  %v13629_v17 = vshrl.u32 %v11912_v61, 16  ;;  %v12167_v6 = vor.u32 %v5736_v44, %v5735_v58  ;;  %v13954_v44 = vshll.u32 %v11912_v61, 16  ;;  %v13955_v58 = vshrl.u32 %v11916_v51, 16 }
 0x456   : > { %v5751_v29 = vrot.slane %v13623_v41, 3  ;;  %v13953_v41 = vshll.u32 %v11904_v49, 16  ;;  %v13959_v42 = vshrl.u32 %v11944_v5, 16 }
 0x457   : > { %13950 = vst [vmem:[#allocation37_spill] sm:$0xff] %v12167_v6  ;;  %v5760_v6 = vrot.slane %v13954_v44, 4  ;;  %v5763_v20 = vrot.slane %v13955_v58, 3  ;;  %v13960_v44 = vshll.u32 %v11944_v5, 16  ;;  %v13962_v58 = vshrl.u32 %v11954_v18, 16 }
 0x458   : > { %v5756_v13 = vrot.slane %v13953_v41, 4  ;;  %v13957_v41 = vshrl.u32 %v11934_v1, 16  ;;  %v5771_v61 = vrot.slane %v13959_v42, 3 }
 0x45a   : > { %v5767_v63 = vrot.slane %v13957_v41, 3 }
 0x45c   : > { %8992 = vmatmul.mubr.msk.bf16.vlgmr.msra.gmra.mrb[0].mxu1 %vm388_vm1, %v4484_v52 }
 0x45d   : > { %9040 = vmatpush3.bf16.msra.mxu1 %v5215_v27  ;;  %8995 = vmatprep.mubr.msk.bf16.mxu1 %vm388_vm1, %v4493_v37  ;;  %v13951_v27 = vshll.u32 %v11894_v14, 16  ;;  %v13952_v37 = vshrl.u32 %v11904_v49, 16  ;;  %v5772_v14 = vrot.slane %v13960_v44, 4  ;;  %v13965_v44 = vshrl.u32 %v11964_v26, 16 }
 0x45e   : > { %10169 = vmatprep.subr.msk.bf16.mxu1 %vm461_vm0, %v12162_v33 }
 0x45f   : > { %v5752_v57 = vrot.slane %v13951_v27, 4  ;;  %v5755_v12 = vrot.slane %v13952_v37, 3  ;;  %v5759_v27 = vrot.slane %v13629_v17, 3  ;;  %v13958_v37 = vshll.u32 %v11934_v1, 16 }
 0x460   : > { %v5773_v41 = vor.u32 %v5772_v14, %v5771_v61  ;;  %v5779_v62 = vrot.slane %v13965_v44, 3  ;;  %v13971_v14 = vshll.u32 %v11972_v47, 16 }
 0x461   : > { %v12193_v52 = vor.u32 %v5752_v57, %v5751_v29  ;;  %v5757_v57 = vor.u32 %v5756_v13, %v5755_v12  ;;  %v13956_v29 = vshll.u32 %v11916_v51, 16  ;;  %v5761_v17 = vor.u32 %v5760_v6, %v5759_v27 }
 0x462   : > { %v5768_v49 = vrot.slane %v13958_v37, 4  ;;  %v5775_v6 = vrot.slane %v13962_v58, 3  ;;  %v13963_v27 = vshll.u32 %v11954_v18, 16 }
 0x463   : > { %v5764_v54 = vrot.slane %v13956_v29, 4  ;;  %v12220_v12 = vsel %vm690_vm2, %v12193_v52, %v5757_v57  ;;  %v12229_v42 = vsel %vm690_vm2, %v5757_v57, %v5761_v17 }
 0x464   : > { %8996 = vmatmul.mubr.msk.bf16.gmra.mrb[4].mxu1 %vm388_vm1, %v12106_v8  ;;  %13961 = vst [vmem:[#allocation39_spill] sm:$0xff] %v12220_v12  ;;  %v5776_v37 = vrot.slane %v13963_v27, 4  ;;  %13964 = vst [vmem:[#allocation38_spill] sm:$0xff] %v12229_v42  ;;  %v5769_v29 = vor.u32 %v5768_v49, %v5767_v63  ;;  %v13968_v27 = vshrl.u32 %v11972_v47, 16  ;;  %v5784_v63 = vrot.slane %v13971_v14, 4 }
 0x465   : > { %v5765_v13 = vor.u32 %v5764_v54, %v5763_v20  ;;  %8999 = vmatprep.mubr.msk.bf16.mxu1 %vm388_vm1, %v12109_v15  ;;  %v13967_v20 = vshll.u32 %v11964_v26, 16  ;;  %v13972_v49 = vshrl.u32 %v11976_v60, 16 }
 0x466   : > { %v5777_v54 = vor.u32 %v5776_v37, %v5775_v6  ;;  %v5783_v12 = vrot.slane %v13968_v27, 3  ;;  %v12244_v57 = vsel %vm690_vm2, %v5769_v29, %v5773_v41  ;;  %v13974_v37 = vshll.u32 %v11976_v60, 16 }
 0x467   : > { %v12234_v8 = vsel %vm690_vm2, %v5761_v17, %v5765_v13  ;;  %v5780_v58 = vrot.slane %v13967_v20, 4  ;;  %v12241_v15 = vsel %vm690_vm2, %v5765_v13, %v5769_v29  ;;  %13970 = vst [vmem:[#allocation42_spill] sm:$0xff] %v12244_v57  ;;  %v5787_v61 = vrot.slane %v13972_v49, 3 }
 0x468   : > { %13966 = vst [vmem:[#allocation40_spill] sm:$0xff] %v12234_v8  ;;  %13969 = vst [vmem:[#allocation41_spill] sm:$0xff] %v12241_v15  ;;  %v12251_v17 = vsel %vm690_vm2, %v5773_v41, %v5777_v54  ;;  %v5788_v44 = vrot.slane %v13974_v37, 4  ;;  %v13975_v20 = vshrl.u32 %v11994_v40, 16  ;;  %v5785_v27 = vor.u32 %v5784_v63, %v5783_v12 }
 0x469   : > { %13973 = vst [vmem:[#allocation43_spill] sm:$0xff] %v12251_v17  ;;  %v5781_v6 = vor.u32 %v5780_v58, %v5779_v62  ;;  %v13976_v29 = vshll.u32 %v11994_v40, 16  ;;  %v13977_v15 = vshrl.u32 %v12004_v45, 16  ;;  %v13978_v8 = vshll.u32 %v12004_v45, 16 }
 0x46a   : > { %v5791_v13 = vrot.slane %v13975_v20, 3  ;;  %v5789_v62 = vor.u32 %v5788_v44, %v5787_v61  ;;  %v13979_v58 = vshrl.u32 %v12014_v31, 16  ;;  %v13980_v17 = vshll.u32 %v12014_v31, 16 }
 0x46b   : > { %v5792_v57 = vrot.slane %v13976_v29, 4  ;;  %v5795_v14 = vrot.slane %v13977_v15, 3  ;;  %v5796_v49 = vrot.slane %v13978_v8, 4  ;;  %v12264_v41 = vsel %vm690_vm2, %v5777_v54, %v5781_v6 }
 0x46c   : > { %v5799_v37 = vrot.slane %v13979_v58, 3  ;;  %v5800_v20 = vrot.slane %v13980_v17, 4  ;;  %v12271_v12 = vsel %vm690_vm2, %v5781_v6, %v5785_v27  ;;  %v13982_v15 = vshrl.u32 %v12025_v50, 16  ;;  %9000 = vmatmul.mubr.msk.bf16.gmra.mrb[8].mxu1 %vm388_vm1, %v12118_v48 }
 0x46d   : > { %13981 = vst [vmem:[#allocation44_spill] sm:$0xff] %v12271_v12  ;;  %v5793_v63 = vor.u32 %v5792_v57, %v5791_v13  ;;  %v5797_v29 = vor.u32 %v5796_v49, %v5795_v14  ;;  %v12278_v8 = vsel %vm690_vm2, %v5785_v27, %v5789_v62  ;;  %v13984_v61 = vshll.u32 %v12025_v50, 16  ;;  %9003 = vmatprep.mubr.msk.bf16.mxu1 %vm388_vm1, %v12122_v35 }
 0x46e   : > { %v5803_v42 = vrot.slane %v13982_v15, 3  ;;  %13983 = vst [vmem:[#allocation6_spill] sm:$0xff] %v12278_v8  ;;  %v5801_v54 = vor.u32 %v5800_v20, %v5799_v37  ;;  %v13985_v17 = vshrl.u32 %v12048_v10, 16  ;;  %v13988_v13 = vshll.u32 %v12048_v10, 16 }
 0x46f   : > { %v5804_v44 = vrot.slane %v13984_v61, 4  ;;  %v12287_v57 = vsel %vm690_vm2, %v5789_v62, %v5793_v63  ;;  %v12290_v6 = vsel %vm690_vm2, %v5793_v63, %v5797_v29  ;;  %v13989_v14 = vshrl.u32 %v12054_v2, 16 }
 0x470   : > { %v5807_v58 = vrot.slane %v13985_v17, 3  ;;  %13986 = vst [vmem:[#allocation7_spill] sm:$0xff] %v12287_v57  ;;  %13987 = vst [vmem:[#allocation8_spill] sm:$0xff] %v12290_v6  ;;  %v5808_v27 = vrot.slane %v13988_v13, 4  ;;  %v12297_v37 = vsel %vm690_vm2, %v5797_v29, %v5801_v54  ;;  %v13991_v15 = vshll.u32 %v12054_v2, 16 }
 0x471   : > { %v5811_v49 = vrot.slane %v13989_v14, 3  ;;  %13990 = vst [vmem:[#allocation9_spill] sm:$0xff] %v12297_v37  ;;  %v5805_v20 = vor.u32 %v5804_v44, %v5803_v42  ;;  %v13992_v17 = vshrl.u32 %v12089_v39, 16  ;;  %v4546_v63 = vor.u32 %v12134_v7, %v12126_v55 }
 0x472   : > { %v5812_v61 = vrot.slane %v13991_v15, 4  ;;  %v13640_v35 = vshll.u32 %v11918_v22, 16  ;;  %v5809_v48 = vor.u32 %v5808_v27, %v5807_v58  ;;  %v13993_v13 = vshll.u32 %v12089_v39, 16 }
 0x473   : > { %v5815_v62 = vrot.slane %v13992_v17, 3  ;;  %v13643_v14 = vshrl.u32 %v11942_v24, 16  ;;  %v12311_v42 = vsel %vm690_vm2, %v5801_v54, %v5805_v20  ;;  %v12316_v15 = vsel %vm690_vm2, %v12100_v53, %v12130_v30 }
 0x474   : > { %v5816_v6 = vrot.slane %v13993_v13, 4  ;;  %13994 = vst [vmem:[#allocation10_spill] sm:$0xff] %v12311_v42  ;;  %v5813_v44 = vor.u32 %v5812_v61, %v5811_v49  ;;  %13995 = vst [vmem:[#allocation11_spill] sm:$0xff] %v12316_v15  ;;  %v12319_v55 = vsel %vm690_vm2, %v5805_v20, %v5809_v48  ;;  %v13998_v58 = vshrl.u32 %v11914_v56, 16  ;;  %9004 = vmatmul.mubr.msk.bf16.gmra.mrb[12].mxu1 %vm388_vm1, %v12316_v15 }
 0x475   : > { %13996 = vst [vmem:[#allocation12_spill] sm:$0xff] %v12319_v55  ;;  %v13999_v17 = vshll.u32 %v11914_v56, 16  ;;  %v14000_v54 = vshrl.u32 %v11918_v22, 16  ;;  %v4563_v53 = vrot.slane %v13640_v35, 4  ;;  %v13644_v20 = vshrl.u32 %v11931_v0, 16 }
 0x476   : > { %v12321_v7 = vor.u32 %v5816_v6, %v5815_v62  ;;  %v4551_v27 = vrot.slane %v13998_v58, 3  ;;  %v12330_v49 = vsel %vm690_vm2, %v5809_v48, %v5813_v44  ;;  %v13645_v6 = vshll.u32 %v11931_v0, 16 }
 0x477   : > { %v4554_v13 = vrot.slane %v13999_v17, 4  ;;  %v4560_v29 = vrot.slane %v14000_v54, 3  ;;  %14001 = vst [vmem:[#allocation14_spill] sm:$0xff] %v12330_v49  ;;  %v12344_v62 = vsel %vm690_vm2, %v12130_v30, %v4546_v63  ;;  %v4569_v48 = vrot.slane %v13643_v14, 3 }
 0x478   : > { %13997 = vst [vmem:[#allocation13_spill] sm:$0xff] %v12321_v7  ;;  %v12338_v61 = vsel %vm690_vm2, %v5813_v44, %v12321_v7  ;;  %14003 = vst [vmem:[#allocation16_spill] sm:$0xff] %v12344_v62  ;;  %v14004_v58 = vshll.u32 %v11942_v24, 16  ;;  %9007 = vmatprep.mubr.msk.bf16.mxu1 %vm388_vm1, %v12344_v62  ;;  %v4578_v44 = vrot.slane %v13644_v20, 3  ;;  %v4581_v15 = vrot.slane %v13645_v6, 4  ;;  %v12386_v6 = vld [vmem:[#allocation2 + $0x1a8] sm:$0xff] }
 0x479   : > { %14002 = vst [vmem:[#allocation15_spill] sm:$0xff] %v12338_v61  ;;  %v4555_v54 = vor.u32 %v4554_v13, %v4551_v27  ;;  %v4564_v35 = vor.u32 %v4563_v53, %v4560_v29  ;;  %v13646_v30 = vshrl.u32 %v11958_v36, 16  ;;  %v13647_v61 = vshrl.u32 %v11962_v25, 16  ;;  %14008 = vst [vmem:[#allocation45_spill] sm:$0xff] %v12386_v6 }
 0x47a   : > { %v4572_v17 = vrot.slane %v14004_v58, 4  ;;  %v13648_v14 = vshll.u32 %v11962_v25, 16  ;;  %v13649_v58 = vshll.u32 %v11958_v36, 16  ;;  %v13652_v49 = vshll.u32 %v12002_v46, 16 }
 0x47b   : > { %v12362_v27 = vsel %vm690_vm2, %v4546_v63, %v4555_v54  ;;  %v12365_v29 = vsel %vm690_vm2, %v4555_v54, %v4564_v35  ;;  %v4582_v13 = vor.u32 %v4581_v15, %v4578_v44  ;;  %v4587_v15 = vrot.slane %v13647_v61, 3 }
 0x47c   : > { %v4573_v7 = vor.u32 %v4572_v17, %v4569_v48  ;;  %14005 = vst [vmem:[#allocation17_spill] sm:$0xff] %v12362_v27  ;;  %14006 = vst [vmem:[#allocation18_spill] sm:$0xff] %v12365_v29  ;;  %9008 = vmatmul.mubr.msk.bf16.gmra.mrb[16].mxu1 %vm388_vm1, %v12362_v27  ;;  %v4596_v17 = vrot.slane %v13646_v30, 3  ;;  %v4590_v54 = vrot.slane %v13648_v14, 4  ;;  %v4669_v44 = vshll.u32 %v12056_v9, 16 }
 0x47d   : > { %9011 = vmatprep.mubr.msk.bf16.mxu1 %vm388_vm1, %v12365_v29  ;;  %v13656_v30 = vshrl.u32 %v12002_v46, 16  ;;  %v4666_v20 = vshrl.u32 %v12056_v9, 16  ;;  %v12393_v53 = vrot.slane %v13652_v49, 1  ;;  %v14010_v29 = vshll.u32 %v12023_v43, 16 }
 0x47e   : > { %v12371_v48 = vsel %vm690_vm2, %v4564_v35, %v4573_v7  ;;  %v4599_v35 = vrot.slane %v13649_v58, 4  ;;  %v12399_v58 = vpack.c.bf16 %v12113_v34, %v12079_v3  ;;  %v12407_v63 = vpack.c.bf16 %v12386_v6, %v12138_v16 }
 0x47f   : > { %14007 = vst [vmem:[#allocation19_spill] sm:$0xff] %v12371_v48  ;;  %14009 = vst [vmem:[#allocation47_spill] sm:$0xff] %v12393_v53  ;;  %v12403_v27 = vrot.slane %v14010_v29, 1  ;;  %v12412_v49 = vor.u32 %v12393_v53, %v13656_v30  ;;  %v14012_v61 = vshll.u32 %v12018_v23, 16  ;;  %v14013_v62 = vshll.u32 %v12050_v21, 16 }
 0x480   : > { %v12419_v42 = vsel %vm690_vm2, %v4573_v7, %v4582_v13  ;;  %v4591_v29 = vor.u32 %v4590_v54, %v4587_v15  ;;  %v14015_v37 = vshrl.u32 %v12023_v43, 16  ;;  %v6186_v6 = vrot.slane %v4669_v44, 1  ;;  %v12434_v54 = vld [vmem:[#allocation2 + $0x1b0] sm:$0xff] }
 0x481   : > { %14011 = vst [vmem:[#allocation46_spill] sm:$0xff] %v12412_v49  ;;  %v6180_v14 = vrot.slane %v14012_v61, 1  ;;  %v6183_v55 = vrot.slane %v14013_v62, 1  ;;  %14014 = vst [vmem:[#allocation48_spill] sm:$0xff] %v12419_v42  ;;  %v4600_v57 = vor.u32 %v4599_v35, %v4596_v17  ;;  %v4668_v8 = vrot.slane %v4666_v20, 3 }
 0x482   : > { %v6179_v16 = vor.u32 %v12403_v27, %v14015_v37  ;;  %v14016_v30 = vshrl.u32 %v12018_v23, 16  ;;  %v14017_v53 = vshrl.u32 %v12050_v21, 16  ;;  %v4671_v12 = vrot.slane %v4669_v44, 4  ;;  %14019 = vst [vmem:[#allocation50_spill] sm:$0xff] %v12434_v54  ;;  %v12436_v37 = vld [vmem:[#allocation2 + $0x1b8] sm:$0xff] }
 0x483   : > { %v12431_v7 = vor.u32 %v6186_v6, %v4666_v20  ;;  %v13664_v15 = vshll.u32 %v12399_v58, 16  ;;  %14020 = vst [vmem:[#allocation51_spill] sm:$0xff] %v12436_v37  ;;  %v12451_v17 = vsel %vm690_vm2, %v4582_v13, %v4591_v29  ;;  %v14022_v35 = vshll.u32 %v12089_v39, 16 }
 0x484   : > { %v6182_v49 = vor.u32 %v6180_v14, %v14016_v30  ;;  %v6185_v61 = vor.u32 %v6183_v55, %v14017_v53  ;;  %v12429_v62 = vsel %vm1218_vm3, %v6179_v16, %v6180_v14  ;;  %9012 = vmatmul.mubr.msk.bf16.gmra.mrb[20].mxu1 %vm388_vm1, %v12371_v48  ;;  %v13663_v14 = vshrl.u32 %v12399_v58, 16 }
 0x485   : > { %14018 = vst [vmem:[#allocation49_spill] sm:$0xff] %v12431_v7  ;;  %9015 = vmatprep.mubr.msk.bf16.mxu1 %vm388_vm1, %v12419_v42  ;;  %v12455_v44 = vrot.slane %v14022_v35, 1  ;;  %v6556_v16 = vpack.c.bf16 %v12436_v37, %v12434_v54  ;;  %v6785_v13 = vrot.slane %v13664_v15, 4  ;;  %v12471_v48 = vor.u32 %v4671_v12, %v4668_v8 }
 0x486   : > { %v12441_v30 = vsel %vm1218_vm3, %v6182_v49, %v6183_v55  ;;  %v12444_v53 = vsel %vm1218_vm3, %v6185_v61, %v6186_v6  ;;  %v13665_v49 = vshrl.u32 %v12407_v63, 16  ;;  %v6784_v61 = vrot.slane %v13663_v14, 3 }
 0x487   : > { %14021 = vst [vmem:[#allocation52_spill] sm:$0xff] %v12444_v53  ;;  %v14023_v37 = vshll.u32 %v12407_v63, 16  ;;  %v6793_v54 = vshrl.u32 %v6556_v16, 16  ;;  %v14024_v14 = vshrl.u32 %v12089_v39, 16  ;;  %v6796_v35 = vshll.u32 %v6556_v16, 16 }
 0x488   : > { %v6788_v55 = vrot.slane %v13665_v49, 3  ;;  %v6786_v6 = vor.u32 %v6785_v13, %v6784_v61  ;;  %v14025_v42 = vshll.u32 %v12145_v11, 16  ;;  %v14026_v49 = vshrl.u32 %v11974_v28, 16 }
 0x489   : > { %v6789_v7 = vrot.slane %v14023_v37, 4  ;;  %v12478_v15 = vor.u32 %v14024_v14, %v12455_v44  ;;  %v6795_v61 = vrot.slane %v6793_v54, 3  ;;  %v14028_v13 = vshll.u32 %v11974_v28, 16 }
 0x48a   : > { %v7037_v53 = vrot.slane %v14025_v42, 1  ;;  %v4605_v12 = vrot.slane %v14026_v49, 3  ;;  %v12487_v8 = vsel %vm690_vm2, %v12471_v48, %v6786_v6  ;;  %v6798_v14 = vrot.slane %v6796_v35, 4 }
 0x48b   : > { %14027 = vst [vmem:[#allocation53_spill] sm:$0xff] %v12487_v8  ;;  %v6790_v37 = vor.u32 %v6789_v7, %v6788_v55  ;;  %v4608_v39 = vrot.slane %v14028_v13, 4  ;;  %v14030_v16 = vshrl.u32 %v12145_v11, 16  ;;  %v12502_v49 = vsel %vm690_vm2, %v4591_v29, %v4600_v57 }
 0x48c   : > { %v12493_v20 = vsel %vm1218_vm3, %v12478_v15, %v7037_v53  ;;  %9016 = vmatmul.mubr.msk.bf16.gmra.mrb[24].mxu1 %vm388_vm1, %v12451_v17  ;;  %v14032_v7 = vshrl.u32 %v11978_v32, 16  ;;  %v14033_v55 = vshll.u32 %v11978_v32, 16  ;;  %v14038_v8 = vshll.u32 %v12002_v46, 16 }
 0x48d   : > { %14029 = vst [vmem:[#allocation54_spill] sm:$0xff] %v12493_v20  ;;  %v12497_v42 = vor.u32 %v7037_v53, %v14030_v16  ;;  %v12509_v13 = vsel %vm690_vm2, %v6786_v6, %v6790_v37  ;;  %9019 = vmatprep.mubr.msk.bf16.mxu1 %vm388_vm1, %v12502_v49  ;;  %v12513_v53 = vor.u32 %v6798_v14, %v6795_v61  ;;  %v13667_v20 = vshrl.u32 %v11991_v4, 16 }
 0x48e   : > { %v4614_v54 = vrot.slane %v14032_v7, 3  ;;  %v4617_v35 = vrot.slane %v14033_v55, 4  ;;  %14034 = vst [vmem:[#allocation56_spill] sm:$0xff] %v12509_v13  ;;  %v4609_v16 = vor.u32 %v4608_v39, %v4605_v12  ;;  %v13668_v7 = vshll.u32 %v11991_v4, 16 }
 0x48f   : > { %14031 = vst [vmem:[#allocation55_spill] sm:$0xff] %v12497_v42  ;;  %v12517_v42 = vsel %vm690_vm2, %v6790_v37, %v12513_v53  ;;  %v14037_v6 = vshrl.u32 %v12002_v46, 16  ;;  %v4626_v61 = vrot.slane %v14038_v8, 4  ;;  %v4632_v12 = vrot.slane %v13667_v20, 3 }
 0x490   : > { %14035 = vst [vmem:[#allocation57_spill] sm:$0xff] %v12517_v42  ;;  %v4618_v29 = vor.u32 %v4617_v35, %v4614_v54  ;;  %v12522_v55 = vsel %vm690_vm2, %v4600_v57, %v4609_v16  ;;  %v4635_v57 = vrot.slane %v13668_v7, 4  ;;  %v14041_v8 = vshrl.u32 %v12023_v43, 16 }
 0x491   : > { %14036 = vst [vmem:[#allocation58_spill] sm:$0xff] %v12522_v55  ;;  %v4623_v13 = vrot.slane %v14037_v6, 3  ;;  %v14044_v20 = vshrl.u32 %v12018_v23, 16 }
 0x492   : > { %v12531_v39 = vsel %vm690_vm2, %v4609_v16, %v4618_v29  ;;  %v4636_v14 = vor.u32 %v4635_v57, %v4632_v12  ;;  %v4641_v35 = vrot.slane %v14041_v8, 3  ;;  %v14042_v16 = vshll.u32 %v12023_v43, 16 }
 0x493   : > { %14039 = vst [vmem:[#allocation59_spill] sm:$0xff] %v12531_v39  ;;  %v4627_v37 = vor.u32 %v4626_v61, %v4623_v13  ;;  %v4650_v7 = vrot.slane %v14044_v20, 3  ;;  %v14045_v13 = vshll.u32 %v12018_v23, 16  ;;  %v4147_v57 = vpack.c.bf16 %v12079_v3, %v12079_v3 }
 0x494   : > { %9020 = vmatmul.mubr.msk.bf16.gmra.mrb[28].mxu1 %vm388_vm1, %v12522_v55  ;;  %v4644_v6 = vrot.slane %v14042_v16, 4 }
 0x495   : > { %9023 = vmatprep.mubr.msk.bf16.mxu1 %vm388_vm1, %v12531_v39  ;;  %v12540_v54 = vsel %vm690_vm2, %v4618_v29, %v4627_v37  ;;  %v12549_v42 = vsel %vm690_vm2, %v4627_v37, %v4636_v14  ;;  %v4653_v61 = vrot.slane %v14045_v13, 4  ;;  %v14047_v37 = vshrl.u32 %v12050_v21, 16 }
 0x496   : > { %14040 = vst [vmem:[#allocation60_spill] sm:$0xff] %v12540_v54  ;;  %14043 = vst [vmem:[#allocation61_spill] sm:$0xff] %v12549_v42  ;;  %v4645_v29 = vor.u32 %v4644_v6, %v4641_v35  ;;  %v4675_v3 = vshrl.u32 %v4147_v57, 16  ;;  %v4678_v35 = vshll.u32 %v4147_v57, 16 }
 0x497   : > { %v4654_v12 = vor.u32 %v4653_v61, %v4650_v7  ;;  %v4659_v16 = vrot.slane %v14047_v37, 3 }
 0x498   : > { %v12560_v8 = vsel %vm690_vm2, %v4636_v14, %v4645_v29  ;;  %v4972_v14 = vshll.u32 %v11785_v19, 16  ;;  %v4677_v61 = vrot.slane %v4675_v3, 3  ;;  %v4680_v37 = vrot.slane %v4678_v35, 4  ;;  %v14052_v3 = vld [vmem:[#allocation5_spill] sm:$0xff] }
 0x499   : > { %14046 = vst [vmem:[#allocation62_spill] sm:$0xff] %v12560_v8  ;;  %v12569_v13 = vsel %vm690_vm2, %v4645_v29, %v4654_v12 }
 0x49a   : > { %14049 = vst [vmem:[#allocation63_spill] sm:$0xff] %v12569_v13  ;;  %v4681_v57 = vor.u32 %v4680_v37, %v4677_v61  ;;  %v13676_v37 = vshrl.u32 %v14052_v3, 16 }
 0x49c   : > { %9024 = vmatmul.mubr.msk.bf16.gmra.mrb[32].mxu1 %vm388_vm1, %v12540_v54  ;;  %v14048_v54 = vshll.u32 %v12050_v21, 16  ;;  %v4682_v35 = vsel %vm690_vm2, %v12471_v48, %v4681_v57 }
 0x49d   : > { %9027 = vmatprep.mubr.msk.bf16.mxu1 %vm388_vm1, %v12549_v42  ;;  %v4974_v42 = vrot.slane %v4972_v14, 1  ;;  %v13673_v14 = vshrl.u32 %v11826_v59, 16 }
 0x49e   : > { %v4662_v20 = vrot.slane %v14048_v54, 4  ;;  %v4970_v54 = vshrl.u32 %v11785_v19, 16  ;;  %v13672_v19 = vshll.u32 %v14052_v3, 16 }
 0x4a0   : > { %v4663_v7 = vor.u32 %v4662_v20, %v4659_v16  ;;  %v13671_v16 = vshll.u32 %v11826_v59, 16  ;;  %v4985_v61 = vrot.slane %v13672_v19, 1  ;;  %v12612_v19 = vld [vmem:[%s13425_s4 + $0x6] sm:$0x3] }
 0x4a2   : > { %v12575_v6 = vsel %vm690_vm2, %v4654_v12, %v4663_v7  ;;  %v12582_v29 = vsel %vm690_vm2, %v4663_v7, %v12471_v48  ;;  %v4975_v12 = vor.u32 %v4974_v42, %v4970_v54  ;;  %v4978_v20 = vrot.slane %v13671_v16, 1  ;;  %v14054_v48 = vld [vmem:[#allocation21_spill] sm:$0xff] }
 0x4a3   : > { %14050 = vst [vmem:[#allocation64_spill] sm:$0xff] %v12575_v6  ;;  %14051 = vst [vmem:[#allocation65_spill] sm:$0xff] %v12582_v29  ;;  %v14053_v54 = vshll.u32 %v11852_v38, 16  ;;  %v13675_v57 = vshll.u32 %v14054_v48, 16 }
 0x4a4   : > { %9028 = vmatmul.mubr.msk.bf16.gmra.mrb[36].mxu1 %vm388_vm1, %v12560_v8  ;;  %v4979_v7 = vsel %vm1218_vm3, %v4975_v12, %v4978_v20  ;;  %v4982_v42 = vor.u32 %v13673_v14, %v4978_v20  ;;  %v5517_v12 = vsel %vm461_vm0, %v12162_v33, 0  ;;  %v14055_v14 = vld [vmem:[#allocation24_spill] sm:$0xff]  ;;  %v13678_v33 = vshrl.u32 %v14054_v48, 16  ;;  %v14067_v8 = vld [vmem:[#allocation31_spill] sm:$0xff] }
 0x4a5   : > { %9031 = vmatprep.mubr.msk.bf16.mxu1 %vm388_vm1, %v12569_v13  ;;  %v4992_v16 = vrot.slane %v14053_v54, 1  ;;  %v4999_v54 = vrot.slane %v13675_v57, 1  ;;  %v14057_v57 = vld [vmem:[#allocation26_spill] sm:$0xff] }
 0x4ac   : > { %9032 = vmatmul.mubr.msk.bf16.gmra.mrb[40].mxu1 %vm388_vm1, %v12575_v6 }
 0x4ad   : > { %9035 = vmatprep.mubr.msk.bf16.mxu1 %vm388_vm1, %v12582_v29  ;;  %v13677_v29 = vshll.u32 %v14055_v14, 16 }
 0x4b4   : > { %9036 = vmatmul.mubr.msk.bf16.gmra.mrb[44].mxu1 %vm388_vm1, %v4682_v35  ;;  %v4989_v35 = vor.u32 %v13676_v37, %v4985_v61  ;;  %v13681_v37 = vshll.u32 %v14057_v57, 16 }
 0x4b5   : > { %9041 = vmatprep.mubr.msk.bf16.mxu1 %vm388_vm1, %v4979_v7  ;;  %v4986_v7 = vsel %vm1218_vm3, %v4982_v42, %v4985_v61  ;;  %v14056_v61 = vshrl.u32 %v11852_v38, 16 }
 0x4b6   : > { %v4993_v20 = vsel %vm1218_vm3, %v4989_v35, %v4992_v16  ;;  %v5006_v35 = vrot.slane %v13677_v29, 1  ;;  %v13686_v29 = vshrl.u32 %v14057_v57, 16 }
 0x4b7   : > { %v4996_v42 = vor.u32 %v14056_v61, %v4992_v16  ;;  %v5013_v16 = vrot.slane %v13681_v37, 1  ;;  %v13684_v61 = vshrl.u32 %v14055_v14, 16 }
 0x4bc   : > { %9042 = vmatmul.mubr.msk.bf16.vlgmr.msra.gmra.mrb[0].mxu1 %vm388_vm1, %v4986_v7  ;;  %v5003_v7 = vor.u32 %v13678_v33, %v4999_v54  ;;  %v14060_v33 = vld [vmem:[#allocation27_spill] sm:$0xff] }
 0x4bd   : > { %9090 = vmatpush3.bf16.msra.mxu1 %v5517_v12  ;;  %9045 = vmatprep.mubr.msk.bf16.mxu1 %vm388_vm1, %v4993_v20  ;;  %v12631_v12 = vsel %vm1218_vm3, %v4996_v42, %v4999_v54  ;;  %v14061_v6 = vshll.u32 %v14060_v33, 16  ;;  %v5010_v42 = vor.u32 %v13684_v61, %v5006_v35 }
 0x4be   : > { %10170 = vmatprep.subr.msk.bf16.mxu1 %vm461_vm0, %v12612_v19  ;;  %14058 = vst [vmem:[#allocation5_spill] sm:$0xff] %v12631_v12  ;;  %v12636_v20 = vsel %vm1218_vm3, %v5003_v7, %v5006_v35  ;;  %v5017_v7 = vor.u32 %v13686_v29, %v5013_v16  ;;  %v14066_v35 = vshrl.u32 %v14060_v33, 16  ;;  %v14068_v29 = vshll.u32 %v14067_v8, 16 }
 0x4bf   : > { %14059 = vst [vmem:[#allocation21_spill] sm:$0xff] %v12636_v20  ;;  %v5020_v54 = vrot.slane %v14061_v6, 1 }
 0x4c0   : > { %v5034_v39 = vrot.slane %v14068_v29, 1  ;;  %v14073_v29 = vshrl.u32 %v14067_v8, 16 }
 0x4c1   : > { %v12656_v37 = vsel %vm1218_vm3, %v5017_v7, %v5020_v54  ;;  %v5024_v61 = vor.u32 %v14066_v35, %v5020_v54  ;;  %v14074_v35 = vshrl.u32 %v11916_v51, 16 }
 0x4c2   : > { %14063 = vst [vmem:[#allocation26_spill] sm:$0xff] %v12656_v37  ;;  %v5038_v54 = vor.u32 %v14073_v29, %v5034_v39  ;;  %v14079_v29 = vshll.u32 %v11954_v18, 16 }
 0x4c4   : > { %9046 = vmatmul.mubr.msk.bf16.gmra.mrb[4].mxu1 %vm388_vm1, %v12631_v12  ;;  %v12651_v12 = vsel %vm1218_vm3, %v5010_v42, %v5013_v16 }
 0x4c5   : > { %9049 = vmatprep.mubr.msk.bf16.mxu1 %vm388_vm1, %v12636_v20  ;;  %14062 = vst [vmem:[#allocation24_spill] sm:$0xff] %v12651_v12  ;;  %v14064_v20 = vld [vmem:[#allocation30_spill] sm:$0xff] }
 0x4c6   : > { %v14065_v6 = vshll.u32 %v14064_v20, 16  ;;  %v14069_v16 = vshrl.u32 %v14064_v20, 16 }
 0x4c8   : > { %v5027_v13 = vrot.slane %v14065_v6, 1  ;;  %v14072_v6 = vshll.u32 %v11916_v51, 16 }
 0x4ca   : > { %v5031_v42 = vor.u32 %v14069_v16, %v5027_v13 }
 0x4cc   : > { %9050 = vmatmul.mubr.msk.bf16.gmra.mrb[8].mxu1 %vm388_vm1, %v12651_v12  ;;  %v12669_v12 = vsel %vm1218_vm3, %v5024_v61, %v5027_v13  ;;  %v12674_v7 = vsel %vm1218_vm3, %v5031_v42, %v5034_v39  ;;  %v14075_v13 = vshll.u32 %v11934_v1, 16  ;;  %v14078_v39 = vshll.u32 %v11944_v5, 16 }
 0x4cd   : > { %9053 = vmatprep.mubr.msk.bf16.mxu1 %vm388_vm1, %v12656_v37  ;;  %14070 = vst [vmem:[#allocation27_spill] sm:$0xff] %v12669_v12  ;;  %14071 = vst [vmem:[#allocation30_spill] sm:$0xff] %v12674_v7  ;;  %v5041_v37 = vrot.slane %v14072_v6, 1 }
 0x4ce   : > { %v5048_v61 = vrot.slane %v14075_v13, 1  ;;  %v5055_v6 = vrot.slane %v14078_v39, 1  ;;  %v14080_v13 = vshrl.u32 %v11934_v1, 16  ;;  %v14084_v39 = vshll.u32 %v11964_v26, 16 }
 0x4cf   : > { %v5045_v16 = vor.u32 %v14074_v35, %v5041_v37  ;;  %v5062_v35 = vrot.slane %v14079_v29, 1 }
 0x4d0   : > { %v5069_v29 = vrot.slane %v14084_v39, 1  ;;  %v14090_v39 = vshll.u32 %v11976_v60, 16 }
 0x4d1   : > { %v12692_v42 = vsel %vm1218_vm3, %v5045_v16, %v5048_v61 }
 0x4d2   : > { %14077 = vst [vmem:[#allocation66_spill] sm:$0xff] %v12692_v42 }
 0x4d4   : > { %9054 = vmatmul.mubr.msk.bf16.gmra.mrb[12].mxu1 %vm388_vm1, %v12669_v12  ;;  %v12687_v12 = vsel %vm1218_vm3, %v5038_v54, %v5041_v37  ;;  %v14081_v37 = vshrl.u32 %v11944_v5, 16 }
 0x4d5   : > { %9057 = vmatprep.mubr.msk.bf16.mxu1 %vm388_vm1, %v12674_v7  ;;  %14076 = vst [vmem:[#allocation31_spill] sm:$0xff] %v12687_v12  ;;  %v5052_v7 = vor.u32 %v14080_v13, %v5048_v61  ;;  %v14085_v61 = vshrl.u32 %v11954_v18, 16 }
 0x4d6   : > { %v5059_v54 = vor.u32 %v14081_v37, %v5055_v6  ;;  %v14086_v37 = vshll.u32 %v11972_v47, 16 }
 0x4d7   : > { %v5066_v13 = vor.u32 %v14085_v61, %v5062_v35 }
 0x4d8   : > { %v12710_v16 = vsel %vm1218_vm3, %v5059_v54, %v5062_v35  ;;  %v14091_v35 = vshrl.u32 %v11972_v47, 16 }
 0x4d9   : > { %14083 = vst [vmem:[#allocation68_spill] sm:$0xff] %v12710_v16 }
 0x4dc   : > { %9058 = vmatmul.mubr.msk.bf16.gmra.mrb[16].mxu1 %vm388_vm1, %v12687_v12  ;;  %v12705_v12 = vsel %vm1218_vm3, %v5052_v7, %v5055_v6  ;;  %v14087_v7 = vshrl.u32 %v11964_v26, 16 }
 0x4dd   : > { %9061 = vmatprep.mubr.msk.bf16.mxu1 %vm388_vm1, %v12692_v42  ;;  %14082 = vst [vmem:[#allocation67_spill] sm:$0xff] %v12705_v12  ;;  %v5076_v42 = vrot.slane %v14086_v37, 1  ;;  %v14092_v37 = vshrl.u32 %v11976_v60, 16 }
 0x4de   : > { %v5073_v6 = vor.u32 %v14087_v7, %v5069_v29 }
 0x4df   : > { %v5080_v61 = vor.u32 %v14091_v35, %v5076_v42  ;;  %v14097_v35 = vshll.u32 %v12014_v31, 16 }
 0x4e0   : > { %v12728_v54 = vsel %vm1218_vm3, %v5073_v6, %v5076_v42  ;;  %v14096_v42 = vshll.u32 %v12004_v45, 16 }
 0x4e1   : > { %14089 = vst [vmem:[#allocation70_spill] sm:$0xff] %v12728_v54 }
 0x4e4   : > { %9062 = vmatmul.mubr.msk.bf16.gmra.mrb[20].mxu1 %vm388_vm1, %v12705_v12  ;;  %v12723_v12 = vsel %vm1218_vm3, %v5066_v13, %v5069_v29  ;;  %v14093_v29 = vshll.u32 %v11994_v40, 16 }
 0x4e5   : > { %9065 = vmatprep.mubr.msk.bf16.mxu1 %vm388_vm1, %v12710_v16  ;;  %14088 = vst [vmem:[#allocation69_spill] sm:$0xff] %v12723_v12  ;;  %v5083_v16 = vrot.slane %v14090_v39, 1  ;;  %v5097_v39 = vrot.slane %v14096_v42, 1  ;;  %v14102_v42 = vshll.u32 %v12025_v50, 16 }
 0x4e6   : > { %v5090_v13 = vrot.slane %v14093_v29, 1  ;;  %v14098_v29 = vshrl.u32 %v11994_v40, 16 }
 0x4e7   : > { %v5087_v7 = vor.u32 %v14092_v37, %v5083_v16  ;;  %v5104_v37 = vrot.slane %v14097_v35, 1  ;;  %v5111_v35 = vrot.slane %v14102_v42, 1  ;;  %v14108_v42 = vshll.u32 %v12054_v2, 16 }
 0x4e9   : > { %v12746_v6 = vsel %vm1218_vm3, %v5087_v7, %v5090_v13 }
 0x4ea   : > { %14095 = vst [vmem:[#allocation72_spill] sm:$0xff] %v12746_v6 }
 0x4ec   : > { %9066 = vmatmul.mubr.msk.bf16.gmra.mrb[24].mxu1 %vm388_vm1, %v12723_v12  ;;  %v12741_v12 = vsel %vm1218_vm3, %v5080_v61, %v5083_v16  ;;  %v14099_v16 = vshrl.u32 %v12004_v45, 16 }
 0x4ed   : > { %9069 = vmatprep.mubr.msk.bf16.mxu1 %vm388_vm1, %v12728_v54  ;;  %14094 = vst [vmem:[#allocation71_spill] sm:$0xff] %v12741_v12  ;;  %v5094_v54 = vor.u32 %v14098_v29, %v5090_v13  ;;  %v14103_v13 = vshrl.u32 %v12014_v31, 16 }
 0x4ee   : > { %v5101_v61 = vor.u32 %v14099_v16, %v5097_v39  ;;  %v14104_v16 = vshll.u32 %v12048_v10, 16 }
 0x4ef   : > { %v5108_v29 = vor.u32 %v14103_v13, %v5104_v37 }
 0x4f0   : > { %v12764_v7 = vsel %vm1218_vm3, %v5101_v61, %v5104_v37  ;;  %v14109_v37 = vshrl.u32 %v12048_v10, 16 }
 0x4f1   : > { %14101 = vst [vmem:[#allocation74_spill] sm:$0xff] %v12764_v7 }
 0x4f4   : > { %9070 = vmatmul.mubr.msk.bf16.gmra.mrb[28].mxu1 %vm388_vm1, %v12741_v12  ;;  %v12759_v12 = vsel %vm1218_vm3, %v5094_v54, %v5097_v39  ;;  %v14105_v54 = vshrl.u32 %v12025_v50, 16 }
 0x4f5   : > { %9073 = vmatprep.mubr.msk.bf16.mxu1 %vm388_vm1, %v12746_v6  ;;  %14100 = vst [vmem:[#allocation73_spill] sm:$0xff] %v12759_v12  ;;  %v5118_v6 = vrot.slane %v14104_v16, 1  ;;  %v4967_v16 = vpack.c.bf16 %v12113_v34, %v12113_v34 }
 0x4f6   : > { %v5115_v39 = vor.u32 %v14105_v54, %v5111_v35 }
 0x4f7   : > { %v5122_v13 = vor.u32 %v14109_v37, %v5118_v6  ;;  %v14113_v37 = vld [vmem:[#allocation4_spill] sm:$0xff] }
 0x4f8   : > { %v12782_v61 = vsel %vm1218_vm3, %v5115_v39, %v5118_v6  ;;  %v5138_v39 = vshll.u32 %v4967_v16, 16  ;;  %v14115_v16 = vld [vmem:[#allocation20_spill] sm:$0xff] }
 0x4f9   : > { %14107 = vst [vmem:[#allocation76_spill] sm:$0xff] %v12782_v61 }
 0x4fa   : > { %v5140_v6 = vrot.slane %v5138_v39, 1  ;;  %v14120_v39 = vld [vmem:[#allocation28_spill] sm:$0xff] }
 0x4fc   : > { %9074 = vmatmul.mubr.msk.bf16.gmra.mrb[32].mxu1 %vm388_vm1, %v12759_v12  ;;  %v12777_v12 = vsel %vm1218_vm3, %v5108_v29, %v5111_v35  ;;  %v14110_v35 = vshrl.u32 %v12054_v2, 16  ;;  %v5141_v34 = vsel %vm1218_vm3, %v12478_v15, %v5140_v6  ;;  %v14116_v15 = vld [vmem:[#allocation22_spill] sm:$0xff]  ;;  %v14121_v6 = vshrl.u32 %v14052_v3, 16 }
 0x4fd   : > { %9077 = vmatprep.mubr.msk.bf16.mxu1 %vm388_vm1, %v12764_v7  ;;  %14106 = vst [vmem:[#allocation75_spill] sm:$0xff] %v12777_v12  ;;  %v5125_v7 = vrot.slane %v14108_v42, 1 }
 0x4ff   : > { %v5129_v29 = vor.u32 %v14110_v35, %v5125_v7  ;;  %v12795_v54 = vsel %vm1218_vm3, %v5122_v13, %v5125_v7  ;;  %v5910_v7 = vsel %vm461_vm0, %v12612_v19, 0  ;;  %v14114_v13 = vld [vmem:[#allocation3_spill] sm:$0xff]  ;;  %v14117_v35 = vld [vmem:[#allocation25_spill] sm:$0xff] }
 0x500   : > { %14111 = vst [vmem:[#allocation77_spill] sm:$0xff] %v12795_v54  ;;  %v14118_v19 = vld [vmem:[#allocation23_spill] sm:$0xff] }
 0x501   : > { %v12801_v42 = vsel %vm1218_vm3, %v5129_v29, %v12455_v44  ;;  %v7934_v44 = vld [vmem:[%s13425_s4 + $0xa] sm:$0x3]  ;;  %v14119_v29 = vld [vmem:[#allocation29_spill] sm:$0xff] }
 0x502   : > { %14112 = vst [vmem:[#allocation78_spill] sm:$0xff] %v12801_v42 }
 0x504   : > { %9078 = vmatmul.mubr.msk.bf16.gmra.mrb[36].mxu1 %vm388_vm1, %v12777_v12 }
 0x505   : > { %9081 = vmatprep.mubr.msk.bf16.mxu1 %vm388_vm1, %v12782_v61 }
 0x50c   : > { %9082 = vmatmul.mubr.msk.bf16.gmra.mrb[40].mxu1 %vm388_vm1, %v12795_v54 }
 0x50d   : > { %9085 = vmatprep.mubr.msk.bf16.mxu1 %vm388_vm1, %v12801_v42 }
 0x514   : > { %9086 = vmatmul.mubr.msk.bf16.gmra.mrb[44].mxu1 %vm388_vm1, %v5141_v34  ;;  %v5731_v34 = vrot.slane %v14121_v6, 3  ;;  %v14125_v6 = vshrl.u32 %v14054_v48, 16 }
 0x515   : > { %9091 = vmatprep.mubr.msk.bf16.mxu1 %vm388_vm1, %v14113_v37 }
 0x51c   : > { %9092 = vmatmul.mubr.msk.bf16.vlgmr.msra.gmra.mrb[0].mxu1 %vm388_vm1, %v14114_v13 }
 0x51d   : > { %9140 = vmatpush3.bf16.msra.mxu1 %v5910_v7  ;;  %9095 = vmatprep.mubr.msk.bf16.mxu1 %vm388_vm1, %v14115_v16 }
 0x51e   : > { %10171 = vmatprep.subr.msk.bf16.mxu1 %vm461_vm0, %v7934_v44 }
 0x524   : > { %9096 = vmatmul.mubr.msk.bf16.gmra.mrb[4].mxu1 %vm388_vm1, %v14116_v15 }
 0x525   : > { %9099 = vmatprep.mubr.msk.bf16.mxu1 %vm388_vm1, %v14117_v35 }
 0x52c   : > { %9100 = vmatmul.mubr.msk.bf16.gmra.mrb[8].mxu1 %vm388_vm1, %v14118_v19 }
 0x52d   : > { %9103 = vmatprep.mubr.msk.bf16.mxu1 %vm388_vm1, %v14119_v29 }
 0x534   : > { %9104 = vmatmul.mubr.msk.bf16.gmra.mrb[12].mxu1 %vm388_vm1, %v14120_v39 }
 0x535   : > { %9107 = vmatprep.mubr.msk.bf16.mxu1 %vm388_vm1, %v11914_v56 }
 0x53c   : > { %9108 = vmatmul.mubr.msk.bf16.gmra.mrb[16].mxu1 %vm388_vm1, %v11918_v22 }
 0x53d   : > { %9111 = vmatprep.mubr.msk.bf16.mxu1 %vm388_vm1, %v11942_v24 }
 0x544   : > { %9112 = vmatmul.mubr.msk.bf16.gmra.mrb[20].mxu1 %vm388_vm1, %v11931_v0 }
 0x545   : > { %9115 = vmatprep.mubr.msk.bf16.mxu1 %vm388_vm1, %v11962_v25 }
 0x54c   : > { %9116 = vmatmul.mubr.msk.bf16.gmra.mrb[24].mxu1 %vm388_vm1, %v11958_v36 }
 0x54d   : > { %9119 = vmatprep.mubr.msk.bf16.mxu1 %vm388_vm1, %v11974_v28 }
 0x554   : > { %9120 = vmatmul.mubr.msk.bf16.gmra.mrb[28].mxu1 %vm388_vm1, %v11978_v32 }
 0x555   : > { %9123 = vmatprep.mubr.msk.bf16.mxu1 %vm388_vm1, %v12002_v46  ;;  %v14122_v46 = vshll.u32 %v14052_v3, 16  ;;  %v5739_v3 = vrot.slane %v14125_v6, 3 }
 0x557   : > { %v5732_v7 = vrot.slane %v14122_v46, 4  ;;  %v14126_v46 = vshll.u32 %v14054_v48, 16 }
 0x559   : > { %v5733_v61 = vor.u32 %v5732_v7, %v5731_v34  ;;  %v5740_v12 = vrot.slane %v14126_v46, 4  ;;  %v14129_v7 = vshll.u32 %v14055_v14, 16 }
 0x55b   : > { %v5741_v55 = vor.u32 %v5740_v12, %v5739_v3 }
 0x55c   : > { %9124 = vmatmul.mubr.msk.bf16.gmra.mrb[32].mxu1 %vm388_vm1, %v11991_v4 }
 0x55d   : > { %9127 = vmatprep.mubr.msk.bf16.mxu1 %vm388_vm1, %v12023_v43  ;;  %v14123_v43 = vshrl.u32 %v11826_v59, 16 }
 0x55f   : > { %v5728_v42 = vrot.slane %v14123_v43, 3  ;;  %v6281_v43 = vsel %vm461_vm0, %v7934_v44, 0  ;;  %v14130_v44 = vshrl.u32 %v14057_v57, 16 }
 0x564   : > { %9128 = vmatmul.mubr.msk.bf16.gmra.mrb[36].mxu1 %vm388_vm1, %v12018_v23  ;;  %v14124_v23 = vshll.u32 %v11826_v59, 16  ;;  %v14127_v59 = vld [vmem:[#allocation37_spill] sm:$0xff] }
 0x565   : > { %9131 = vmatprep.mubr.msk.bf16.mxu1 %vm388_vm1, %v12050_v21  ;;  %v5738_v34 = vsel %vm690_vm2, %v5733_v61, %v14127_v59  ;;  %v5742_v12 = vsel %vm690_vm2, %v14127_v59, %v5741_v55 }
 0x566   : > { %v5729_v54 = vrot.slane %v14124_v23, 4  ;;  %v5744_v23 = vrot.slane %v14129_v7, 4  ;;  %v14133_v7 = vld [vmem:[#allocation38_spill] sm:$0xff] }
 0x568   : > { %v5730_v21 = vor.u32 %v5729_v54, %v5728_v42  ;;  %v14128_v54 = vshrl.u32 %v14055_v14, 16 }
 0x56a   : > { %v5743_v42 = vrot.slane %v14128_v54, 3 }
 0x56c   : > { %9132 = vmatmul.mubr.msk.bf16.gmra.mrb[40].mxu1 %vm388_vm1, %v12056_v9  ;;  %v5734_v9 = vsel %vm690_vm2, %v5730_v21, %v5733_v61  ;;  %v7960_v21 = vld [vmem:[%s13425_s4 + $0xe] sm:$0x3]  ;;  %v14131_v61 = vshll.u32 %v14057_v57, 16  ;;  %v5745_v3 = vor.u32 %v5744_v23, %v5743_v42  ;;  %v14136_v23 = vld [vmem:[#allocation42_spill] sm:$0xff] }
 0x56d   : > { %9135 = vmatprep.mubr.msk.bf16.mxu1 %vm388_vm1, %v12399_v58  ;;  %v14134_v42 = vld [vmem:[#allocation40_spill] sm:$0xff] }
 0x56e   : > { %v5748_v6 = vrot.slane %v14131_v61, 4  ;;  %v5746_v54 = vsel %vm690_vm2, %v5741_v55, %v5745_v3  ;;  %v14135_v55 = vld [vmem:[#allocation41_spill] sm:$0xff]  ;;  %v14141_v61 = vld [vmem:[#allocation8_spill] sm:$0xff] }
 0x574   : > { %9136 = vmatmul.mubr.msk.bf16.gmra.mrb[44].mxu1 %vm388_vm1, %v12407_v63 }
 0x575   : > { %9141 = vmatprep.mubr.msk.bf16.mxu1 %vm388_vm1, %v5734_v9  ;;  %v5747_v9 = vrot.slane %v14130_v44, 3  ;;  %v14139_v44 = vld [vmem:[#allocation6_spill] sm:$0xff] }
 0x577   : > { %v5749_v46 = vor.u32 %v5748_v6, %v5747_v9  ;;  %v14140_v9 = vld [vmem:[#allocation7_spill] sm:$0xff]  ;;  %v14142_v6 = vld [vmem:[#allocation9_spill] sm:$0xff] }
 0x579   : > { %v5754_v59 = vsel %vm690_vm2, %v5749_v46, %v12193_v52  ;;  %v14138_v52 = vld [vmem:[#allocation44_spill] sm:$0xff] }
 0x57c   : > { %9142 = vmatmul.mubr.msk.bf16.vlgmr.msra.gmra.mrb[0].mxu1 %vm388_vm1, %v5738_v34  ;;  %v5750_v34 = vsel %vm690_vm2, %v5745_v3, %v5749_v46  ;;  %v14143_v3 = vld [vmem:[#allocation10_spill] sm:$0xff]  ;;  %v14144_v46 = vld [vmem:[#allocation45_spill] sm:$0xff] }
 0x57d   : > { %9190 = vmatpush3.bf16.msra.mxu1 %v6281_v43  ;;  %9145 = vmatprep.mubr.msk.bf16.mxu1 %vm388_vm1, %v5742_v12  ;;  %v14132_v43 = vld [vmem:[#allocation39_spill] sm:$0xff] }
 0x57e   : > { %10172 = vmatprep.subr.msk.bf16.mxu1 %vm461_vm0, %v7960_v21  ;;  %v14137_v12 = vld [vmem:[#allocation43_spill] sm:$0xff] }
 0x584   : > { %9146 = vmatmul.mubr.msk.bf16.gmra.mrb[4].mxu1 %vm388_vm1, %v5746_v54  ;;  %v14145_v54 = vld [vmem:[#allocation12_spill] sm:$0xff] }
 0x585   : > { %9149 = vmatprep.mubr.msk.bf16.mxu1 %vm388_vm1, %v5750_v34  ;;  %v14146_v34 = vshrl.u32 %v12145_v11, 16 }
 0x58c   : > { %9150 = vmatmul.mubr.msk.bf16.gmra.mrb[8].mxu1 %vm388_vm1, %v5754_v59  ;;  %v5822_v59 = vrot.slane %v14146_v34, 3 }
 0x58d   : > { %9153 = vmatprep.mubr.msk.bf16.mxu1 %vm388_vm1, %v14132_v43  ;;  %v14147_v43 = vshll.u32 %v12145_v11, 16 }
 0x594   : > { %9154 = vmatmul.mubr.msk.bf16.gmra.mrb[12].mxu1 %vm388_vm1, %v14133_v7  ;;  %v5825_v7 = vrot.slane %v14147_v43, 4  ;;  %v14152_v43 = vshrl.u32 %v14113_v37, 16 }
 0x595   : > { %9157 = vmatprep.mubr.msk.bf16.mxu1 %vm388_vm1, %v14134_v42  ;;  %v14148_v42 = vld [vmem:[#allocation14_spill] sm:$0xff] }
 0x59c   : > { %9158 = vmatmul.mubr.msk.bf16.gmra.mrb[16].mxu1 %vm388_vm1, %v14135_v55 }
 0x59d   : > { %9161 = vmatprep.mubr.msk.bf16.mxu1 %vm388_vm1, %v14136_v23 }
 0x5a4   : > { %9162 = vmatmul.mubr.msk.bf16.gmra.mrb[20].mxu1 %vm388_vm1, %v14137_v12  ;;  %v5826_v12 = vor.u32 %v5825_v7, %v5822_v59 }
 0x5a5   : > { %9165 = vmatprep.mubr.msk.bf16.mxu1 %vm388_vm1, %v12264_v41  ;;  %v5459_v41 = vpack.c.bf16 %v14144_v46, %v14144_v46 }
 0x5a7   : > { %v5829_v55 = vshrl.u32 %v5459_v41, 16  ;;  %v5832_v23 = vshll.u32 %v5459_v41, 16  ;;  %v14153_v41 = vshll.u32 %v14114_v13, 16 }
 0x5a9   : > { %v6126_v59 = vrot.slane %v14153_v41, 1  ;;  %v14160_v41 = vshrl.u32 %v14116_v15, 16 }
 0x5ac   : > { %9166 = vmatmul.mubr.msk.bf16.gmra.mrb[24].mxu1 %vm388_vm1, %v14138_v52  ;;  %v5831_v52 = vrot.slane %v5829_v55, 3 }
 0x5ad   : > { %9169 = vmatprep.mubr.msk.bf16.mxu1 %vm388_vm1, %v14139_v44  ;;  %v5834_v44 = vrot.slane %v5832_v23, 4  ;;  %v14154_v23 = vshll.u32 %v14115_v16, 16 }
 0x5af   : > { %v5835_v34 = vor.u32 %v5834_v44, %v5831_v52 }
 0x5b1   : > { %v5836_v7 = vsel %vm690_vm2, %v5826_v12, %v5835_v34  ;;  %v12966_v34 = vld [vmem:[%s13425_s4 + $0xc] sm:$0x3] }
 0x5b4   : > { %9170 = vmatmul.mubr.msk.bf16.gmra.mrb[28].mxu1 %vm388_vm1, %v14140_v9  ;;  %v14149_v9 = vld [vmem:[#allocation15_spill] sm:$0xff] }
 0x5b5   : > { %9173 = vmatprep.mubr.msk.bf16.mxu1 %vm388_vm1, %v14141_v61  ;;  %v14150_v61 = vld [vmem:[#allocation13_spill] sm:$0xff] }
 0x5bc   : > { %9174 = vmatmul.mubr.msk.bf16.gmra.mrb[32].mxu1 %vm388_vm1, %v14142_v6  ;;  %v5827_v6 = vsel %vm690_vm2, %v14150_v61, %v5826_v12  ;;  %v14155_v61 = vshrl.u32 %v14115_v16, 16  ;;  %v6573_v12 = vsel %vm461_vm0, %v7960_v21, 0 }
 0x5bd   : > { %9177 = vmatprep.mubr.msk.bf16.mxu1 %vm388_vm1, %v14143_v3  ;;  %v14151_v3 = vshll.u32 %v14113_v37, 16  ;;  %v14156_v37 = vshll.u32 %v14116_v15, 16  ;;  %v14164_v15 = vshrl.u32 %v14118_v19, 16 }
 0x5bf   : > { %v6132_v44 = vrot.slane %v14156_v37, 1 }
 0x5c4   : > { %9178 = vmatmul.mubr.msk.bf16.gmra.mrb[36].mxu1 %vm388_vm1, %v14145_v54  ;;  %v6124_v54 = vrot.slane %v14151_v3, 1 }
 0x5c5   : > { %9181 = vmatprep.mubr.msk.bf16.mxu1 %vm388_vm1, %v14148_v42 }
 0x5c6   : > { %v6125_v42 = vor.u32 %v6124_v54, %v14152_v43  ;;  %v14158_v43 = vshll.u32 %v14117_v35, 16 }
 0x5c8   : > { %v6127_v55 = vsel %vm1218_vm3, %v6125_v42, %v6126_v59  ;;  %v6135_v42 = vrot.slane %v14158_v43, 1 }
 0x5cc   : > { %9182 = vmatmul.mubr.msk.bf16.gmra.mrb[40].mxu1 %vm388_vm1, %v14149_v9  ;;  %v6129_v9 = vrot.slane %v14154_v23, 1 }
 0x5cd   : > { %9185 = vmatprep.mubr.msk.bf16.mxu1 %vm388_vm1, %v5827_v6  ;;  %v14157_v6 = vshrl.u32 %v14114_v13, 16  ;;  %v14159_v13 = vshrl.u32 %v14117_v35, 16  ;;  %v14163_v35 = vshrl.u32 %v14119_v29, 16 }
 0x5ce   : > { %v6131_v52 = vor.u32 %v6129_v9, %v14155_v61  ;;  %v14162_v61 = vshll.u32 %v14119_v29, 16  ;;  %v14167_v29 = vshrl.u32 %v11914_v56, 16 }
 0x5cf   : > { %v6128_v3 = vor.u32 %v6126_v59, %v14157_v6  ;;  %v6137_v21 = vor.u32 %v6135_v42, %v14159_v13  ;;  %v6134_v59 = vor.u32 %v6132_v44, %v14160_v41  ;;  %v14165_v6 = vshll.u32 %v14120_v39, 16 }
 0x5d0   : > { %v6133_v16 = vsel %vm1218_vm3, %v6131_v52, %v6132_v44  ;;  %v6141_v52 = vrot.slane %v14162_v61, 1  ;;  %v14172_v61 = vshrl.u32 %v11918_v22, 16 }
 0x5d1   : > { %v6130_v54 = vsel %vm1218_vm3, %v6128_v3, %v6129_v9  ;;  %v6136_v23 = vsel %vm1218_vm3, %v6134_v59, %v6135_v42  ;;  %v6144_v3 = vrot.slane %v14165_v6, 1 }
 0x5d2   : > { %v6143_v37 = vor.u32 %v6141_v52, %v14163_v35 }
 0x5d4   : > { %9186 = vmatmul.mubr.msk.bf16.gmra.mrb[44].mxu1 %vm388_vm1, %v5836_v7  ;;  %v14161_v7 = vshll.u32 %v14118_v19, 16  ;;  %v14168_v19 = vshll.u32 %v11918_v22, 16  ;;  %v14176_v22 = vshrl.u32 %v11931_v0, 16 }
 0x5d5   : > { %9191 = vmatprep.mubr.msk.bf16.mxu1 %vm388_vm1, %v6127_v55 }
 0x5d6   : > { %v6138_v55 = vrot.slane %v14161_v7, 1  ;;  %v6150_v13 = vrot.slane %v14168_v19, 1 }
 0x5d8   : > { %v6139_v9 = vsel %vm1218_vm3, %v6137_v21, %v6138_v55  ;;  %v6140_v44 = vor.u32 %v6138_v55, %v14164_v15  ;;  %v14169_v21 = vshrl.u32 %v14120_v39, 16  ;;  %v14170_v55 = vshll.u32 %v11942_v24, 16 }
 0x5d9   : > { %v14173_v39 = vshll.u32 %v11931_v0, 16  ;;  %v14180_v0 = vshll.u32 %v11978_v32, 16 }
 0x5da   : > { %v6146_v41 = vor.u32 %v6144_v3, %v14169_v21 }
 0x5db   : > { %v6156_v35 = vrot.slane %v14173_v39, 1  ;;  %v6168_v21 = vrot.slane %v14180_v0, 1  ;;  %v14209_v0 = vld [vmem:[#allocation61_spill] sm:$0xff] }
 0x5dc   : > { %9192 = vmatmul.mubr.msk.bf16.vlgmr.msra.gmra.mrb[0].mxu1 %vm388_vm1, %v6130_v54  ;;  %v6145_v54 = vsel %vm1218_vm3, %v6143_v37, %v6144_v3 }
 0x5dd   : > { %9240 = vmatpush3.bf16.msra.mxu1 %v6573_v12  ;;  %9195 = vmatprep.mubr.msk.bf16.mxu1 %vm388_vm1, %v6133_v16  ;;  %v6142_v12 = vsel %vm1218_vm3, %v6140_v44, %v6141_v52  ;;  %v14166_v16 = vshll.u32 %v11914_v56, 16  ;;  %v14171_v56 = vshrl.u32 %v11942_v24, 16  ;;  %v6152_v52 = vor.u32 %v6150_v13, %v14172_v61  ;;  %v14184_v61 = vld [vmem:[#allocation47_spill] sm:$0xff] }
 0x5de   : > { %10173 = vmatprep.subr.msk.bf16.mxu1 %vm461_vm0, %v12966_v34  ;;  %v14174_v44 = vshll.u32 %v11962_v25, 16  ;;  %v14175_v24 = vshrl.u32 %v11962_v25, 16  ;;  %v14179_v25 = vshrl.u32 %v11974_v28, 16 }
 0x5df   : > { %v6147_v43 = vrot.slane %v14166_v16, 1 }
 0x5e0   : > { %v6159_v6 = vrot.slane %v14174_v44, 1 }
 0x5e1   : > { %v6149_v42 = vor.u32 %v6147_v43, %v14167_v29  ;;  %v6148_v59 = vsel %vm1218_vm3, %v6146_v41, %v6147_v43  ;;  %v14181_v41 = vshrl.u32 %v11958_v36, 16 }
 0x5e2   : > { %v6161_v3 = vor.u32 %v6159_v6, %v14175_v24  ;;  %v14189_v24 = vld [vmem:[#allocation50_spill] sm:$0xff] }
 0x5e3   : > { %v6151_v7 = vsel %vm1218_vm3, %v6149_v42, %v6150_v13  ;;  %v14178_v42 = vshll.u32 %v11974_v28, 16  ;;  %v14183_v28 = vshll.u32 %v11991_v4, 16 }
 0x5e4   : > { %9196 = vmatmul.mubr.msk.bf16.gmra.mrb[4].mxu1 %vm388_vm1, %v6136_v23  ;;  %v6153_v23 = vrot.slane %v14170_v55, 1 }
 0x5e5   : > { %9199 = vmatprep.mubr.msk.bf16.mxu1 %vm388_vm1, %v6139_v9  ;;  %v6165_v19 = vrot.slane %v14178_v42, 1 }
 0x5e6   : > { %v6155_v9 = vor.u32 %v6153_v23, %v14171_v56  ;;  %v6154_v37 = vsel %vm1218_vm3, %v6152_v52, %v6153_v23  ;;  %v14182_v23 = vshrl.u32 %v11978_v32, 16 }
 0x5e7   : > { %v6167_v13 = vor.u32 %v6165_v19, %v14179_v25  ;;  %v8009_v25 = vld [vmem:[%s13425_s4 + $0x10] sm:$0x3] }
 0x5e8   : > { %v6157_v15 = vsel %vm1218_vm3, %v6155_v9, %v6156_v35  ;;  %v6170_v56 = vor.u32 %v6168_v21, %v14182_v23  ;;  %v6174_v9 = vrot.slane %v14183_v28, 1  ;;  %v14217_v23 = vld [vmem:[#allocation5_spill] sm:$0xff]  ;;  %v14219_v28 = vld [vmem:[#allocation24_spill] sm:$0xff] }
 0x5e9   : > { %v6169_v55 = vsel %vm1218_vm3, %v6167_v13, %v6168_v21  ;;  %v14208_v13 = vld [vmem:[#allocation60_spill] sm:$0xff]  ;;  %v14210_v21 = vld [vmem:[#allocation62_spill] sm:$0xff] }
 0x5ea   : > { %v6172_v52 = vsel %vm1218_vm3, %v6170_v56, %v14184_v61  ;;  %v14218_v56 = vld [vmem:[#allocation21_spill] sm:$0xff]  ;;  %v14221_v61 = vld [vmem:[#allocation27_spill] sm:$0xff] }
 0x5ec   : > { %9200 = vmatmul.mubr.msk.bf16.gmra.mrb[8].mxu1 %vm388_vm1, %v6142_v12  ;;  %v6158_v12 = vor.u32 %v6156_v35, %v14176_v22  ;;  %v14186_v35 = vshrl.u32 %v11991_v4, 16  ;;  %v6121_v4 = vpack.c.bf16 %v14189_v24, %v14189_v24  ;;  %v14191_v22 = vshll.u32 %v12407_v63, 16 }
 0x5ed   : > { %9203 = vmatprep.mubr.msk.bf16.mxu1 %vm388_vm1, %v6145_v54  ;;  %v14177_v54 = vshll.u32 %v11958_v36, 16  ;;  %v14185_v36 = vld [vmem:[#allocation46_spill] sm:$0xff] }
 0x5ee   : > { %v6160_v43 = vsel %vm1218_vm3, %v6158_v12, %v6159_v6  ;;  %v6175_v39 = vsel %vm1218_vm3, %v14185_v36, %v6174_v9  ;;  %v14188_v6 = vld [vmem:[#allocation52_spill] sm:$0xff]  ;;  %v6198_v12 = vrot.slane %v14191_v22, 1  ;;  %v14223_v36 = vld [vmem:[#allocation31_spill] sm:$0xff]  ;;  %v14235_v22 = vld [vmem:[#allocation77_spill] sm:$0xff] }
 0x5ef   : > { %v6162_v16 = vrot.slane %v14177_v54, 1  ;;  %v14192_v54 = vld [vmem:[#allocation49_spill] sm:$0xff] }
 0x5f1   : > { %v6163_v29 = vsel %vm1218_vm3, %v6161_v3, %v6162_v16  ;;  %v14190_v3 = vshrl.u32 %v12399_v58, 16 }
 0x5f4   : > { %9204 = vmatmul.mubr.msk.bf16.gmra.mrb[12].mxu1 %vm388_vm1, %v6148_v59  ;;  %v6164_v59 = vor.u32 %v6162_v16, %v14181_v41  ;;  %v6204_v16 = vshll.u32 %v6121_v4, 16  ;;  %v14211_v41 = vld [vmem:[#allocation63_spill] sm:$0xff]  ;;  %v14232_v4 = vld [vmem:[#allocation74_spill] sm:$0xff] }
 0x5f5   : > { %9207 = vmatprep.mubr.msk.bf16.mxu1 %vm388_vm1, %v6151_v7 }
 0x5f6   : > { %v6166_v7 = vsel %vm1218_vm3, %v6164_v59, %v6165_v19  ;;  %v6206_v42 = vrot.slane %v6204_v16, 1  ;;  %v6823_v19 = vsel %vm461_vm0, %v12966_v34, 0  ;;  %v14207_v34 = vld [vmem:[#allocation59_spill] sm:$0xff]  ;;  %v14214_v59 = vld [vmem:[#allocation53_spill] sm:$0xff]  ;;  %v4122_v16 = vld [vmem:[#allocation2 + $0x1c8] sm:$0xff] }
 0x5fc   : > { %9208 = vmatmul.mubr.msk.bf16.gmra.mrb[16].mxu1 %vm388_vm1, %v6154_v37  ;;  %v6176_v37 = vor.u32 %v6174_v9, %v14186_v35  ;;  %v14220_v9 = vld [vmem:[#allocation26_spill] sm:$0xff]  ;;  %v14225_v35 = vld [vmem:[#allocation67_spill] sm:$0xff] }
 0x5fd   : > { %9211 = vmatprep.mubr.msk.bf16.mxu1 %vm388_vm1, %v6157_v15  ;;  %v14187_v15 = vshll.u32 %v12399_v58, 16 }
 0x5fe   : > { %v6178_v32 = vsel %vm1218_vm3, %v6176_v37, %v12403_v27  ;;  %v14226_v37 = vld [vmem:[#allocation68_spill] sm:$0xff] }
 0x5ff   : > { %v6191_v44 = vrot.slane %v14187_v15, 1  ;;  %v14228_v15 = vld [vmem:[#allocation70_spill] sm:$0xff] }
 0x601   : > { %v6195_v27 = vor.u32 %v14190_v3, %v6191_v44  ;;  %v14233_v3 = vld [vmem:[#allocation75_spill] sm:$0xff] }
 0x604   : > { %9212 = vmatmul.mubr.msk.bf16.gmra.mrb[20].mxu1 %vm388_vm1, %v6160_v43  ;;  %v14193_v43 = vshrl.u32 %v12407_v63, 16 }
 0x605   : > { %9215 = vmatprep.mubr.msk.bf16.mxu1 %vm388_vm1, %v6163_v29 }
 0x606   : > { %v6202_v29 = vor.u32 %v14193_v43, %v6198_v12 }
 0x608   : > { %v6207_v58 = vsel %vm1218_vm3, %v6202_v29, %v6206_v42  ;;  %v14237_v29 = vld [vmem:[#allocation54_spill] sm:$0xff]  ;;  %v7034_v42 = vpack.c.bf16 %v4122_v16, %v4122_v16 }
 0x60c   : > { %9216 = vmatmul.mubr.msk.bf16.gmra.mrb[24].mxu1 %vm388_vm1, %v6166_v7  ;;  %v14215_v7 = vld [vmem:[#allocation56_spill] sm:$0xff] }
 0x60d   : > { %9219 = vmatprep.mubr.msk.bf16.mxu1 %vm388_vm1, %v6169_v55  ;;  %v14216_v55 = vld [vmem:[#allocation57_spill] sm:$0xff] }
 0x614   : > { %9220 = vmatmul.mubr.msk.bf16.gmra.mrb[28].mxu1 %vm388_vm1, %v6172_v52  ;;  %v14222_v52 = vld [vmem:[#allocation30_spill] sm:$0xff] }
 0x615   : > { %9223 = vmatprep.mubr.msk.bf16.mxu1 %vm388_vm1, %v6175_v39  ;;  %v14224_v39 = vld [vmem:[#allocation66_spill] sm:$0xff] }
 0x61c   : > { %9224 = vmatmul.mubr.msk.bf16.gmra.mrb[32].mxu1 %vm388_vm1, %v6178_v32  ;;  %v14227_v32 = vld [vmem:[#allocation69_spill] sm:$0xff] }
 0x61d   : > { %9227 = vmatprep.mubr.msk.bf16.mxu1 %vm388_vm1, %v12429_v62  ;;  %v6192_v62 = vsel %vm1218_vm3, %v14192_v54, %v6191_v44  ;;  %v14229_v44 = vld [vmem:[#allocation71_spill] sm:$0xff] }
 0x624   : > { %9228 = vmatmul.mubr.msk.bf16.gmra.mrb[36].mxu1 %vm388_vm1, %v12441_v30  ;;  %v6199_v30 = vsel %vm1218_vm3, %v6195_v27, %v6198_v12  ;;  %v14234_v27 = vld [vmem:[#allocation76_spill] sm:$0xff] }
 0x625   : > { %9231 = vmatprep.mubr.msk.bf16.mxu1 %vm388_vm1, %v14188_v6  ;;  %v14230_v6 = vld [vmem:[#allocation72_spill] sm:$0xff] }
 0x62c   : > { %9232 = vmatmul.mubr.msk.bf16.gmra.mrb[40].mxu1 %vm388_vm1, %v6192_v62 }
 0x62d   : > { %9235 = vmatprep.mubr.msk.bf16.mxu1 %vm388_vm1, %v6199_v30  ;;  %v14236_v30 = vld [vmem:[#allocation78_spill] sm:$0xff] }
 0x634   : > { %9236 = vmatmul.mubr.msk.bf16.gmra.mrb[44].mxu1 %vm388_vm1, %v6207_v58 }
 0x635   : > { %9241 = vmatprep.mubr.msk.bf16.mxu1 %vm388_vm1, %v11852_v38  ;;  %v4121_v38 = vld [vmem:[#allocation2 + $0x1c0] sm:$0xff] }
 0x636   : > { %v6557_v63 = vpack.c.bf16 %v4121_v38, %v4121_v38 }
 0x63c   : > { %9242 = vmatmul.mubr.msk.bf16.vlgmr.msra.gmra.mrb[0].mxu1 %vm388_vm1, %v14054_v48  ;;  %v14202_v48 = vld [vmem:[#allocation17_spill] sm:$0xff] }
 0x63d   : > { %9290 = vmatpush3.bf16.msra.mxu1 %v6823_v19  ;;  %9245 = vmatprep.mubr.msk.bf16.mxu1 %vm388_vm1, %v14055_v14 }
 0x63e   : > { %10174 = vmatprep.subr.msk.bf16.mxu1 %vm461_vm0, %v8009_v25 }
 0x644   : > { %9246 = vmatmul.mubr.msk.bf16.gmra.mrb[4].mxu1 %vm388_vm1, %v14057_v57  ;;  %v14203_v57 = vld [vmem:[#allocation18_spill] sm:$0xff] }
 0x645   : > { %9249 = vmatprep.mubr.msk.bf16.mxu1 %vm388_vm1, %v14060_v33  ;;  %v14204_v33 = vld [vmem:[#allocation19_spill] sm:$0xff] }
 0x64c   : > { %9250 = vmatmul.mubr.msk.bf16.gmra.mrb[8].mxu1 %vm388_vm1, %v14064_v20  ;;  %v14205_v20 = vld [vmem:[#allocation48_spill] sm:$0xff] }
 0x64d   : > { %9253 = vmatprep.mubr.msk.bf16.mxu1 %vm388_vm1, %v14067_v8 }
 0x654   : > { %9254 = vmatmul.mubr.msk.bf16.gmra.mrb[12].mxu1 %vm388_vm1, %v11916_v51  ;;  %v6802_v51 = vshrl.u32 %v6557_v63, 16 }
 0x655   : > { %9257 = vmatprep.mubr.msk.bf16.mxu1 %vm388_vm1, %v11934_v1  ;;  %v6805_v1 = vshll.u32 %v6557_v63, 16 }
 0x657   : > { %v6807_v8 = vrot.slane %v6805_v1, 4 }
 0x65c   : > { %9258 = vmatmul.mubr.msk.bf16.gmra.mrb[16].mxu1 %vm388_vm1, %v11944_v5  ;;  %v6804_v5 = vrot.slane %v6802_v51, 3  ;;  %v14238_v51 = vld [vmem:[#allocation55_spill] sm:$0xff] }
 0x65d   : > { %9261 = vmatprep.mubr.msk.bf16.mxu1 %vm388_vm1, %v11954_v18 }
 0x65e   : > { %v6808_v14 = vor.u32 %v6807_v8, %v6804_v5 }
 0x660   : > { %v6809_v18 = vsel %vm690_vm2, %v12513_v53, %v6808_v14  ;;  %v14201_v53 = vld [vmem:[#allocation16_spill] sm:$0xff] }
 0x664   : > { %9262 = vmatmul.mubr.msk.bf16.gmra.mrb[20].mxu1 %vm388_vm1, %v11964_v26  ;;  %v14194_v26 = vld [vmem:[#allocation32_spill] sm:$0xff] }
 0x665   : > { %9265 = vmatprep.mubr.msk.bf16.mxu1 %vm388_vm1, %v11972_v47  ;;  %v6560_v47 = vpack.c.bf16 %v14189_v24, %v14144_v46  ;;  %v14206_v46 = vld [vmem:[#allocation58_spill] sm:$0xff]  ;;  %v14231_v24 = vld [vmem:[#allocation73_spill] sm:$0xff] }
 0x667   : > { %v7040_v12 = vshll.u32 %v6560_v47, 16  ;;  %v7044_v54 = vshrl.u32 %v6560_v47, 16 }
 0x669   : > { %v7042_v43 = vrot.slane %v7040_v12, 1 }
 0x66b   : > { %v7046_v58 = vor.u32 %v7044_v54, %v7042_v43  ;;  %v7043_v1 = vsel %vm1218_vm3, %v14238_v51, %v7042_v43  ;;  %v10191_v54 = vld [vmem:[%s10289_s10 + $0x80] sm:$0xff]  ;;  %v10192_v43 = vld [vmem:[%s10289_s10 + $0x78] sm:$0xff] }
 0x66c   : > { %9266 = vmatmul.mubr.msk.bf16.gmra.mrb[24].mxu1 %vm388_vm1, %v11976_v60  ;;  %v14195_v60 = vld [vmem:[#allocation51_spill] sm:$0xff] }
 0x66d   : > { %9269 = vmatprep.mubr.msk.bf16.mxu1 %vm388_vm1, %v11994_v40  ;;  %v13139_v40 = vpack.c.bf16 %v4121_v38, %v14195_v60  ;;  %v7055_v38 = vshll.u32 %v7034_v42, 16  ;;  %v13250_v60 = vld [vmem:[%s13427_s6] ss:$0 sm:$0xff] }
 0x66f   : > { %v7047_v62 = vshll.u32 %v13139_v40, 16  ;;  %v7057_v8 = vrot.slane %v7055_v38, 1 }
 0x671   : > { %v7049_v19 = vrot.slane %v7047_v62, 1 }
 0x673   : > { %v7050_v63 = vsel %vm1218_vm3, %v7046_v58, %v7049_v19 }
 0x674   : > { %9270 = vmatmul.mubr.msk.bf16.gmra.mrb[28].mxu1 %vm388_vm1, %v12004_v45  ;;  %v14196_v45 = vld [vmem:[#allocation33_spill] sm:$0xff] }
 0x675   : > { %9273 = vmatprep.mubr.msk.bf16.mxu1 %vm388_vm1, %v12014_v31  ;;  %v7072_v31 = vsel %vm461_vm0, %v8009_v25, 0  ;;  %v7051_v25 = vshrl.u32 %v13139_v40, 16 }
 0x677   : > { %v7053_v5 = vor.u32 %v7051_v25, %v7049_v19 }
 0x679   : > { %v7058_v14 = vsel %vm1218_vm3, %v7053_v5, %v7057_v8 }
 0x67c   : > { %9274 = vmatmul.mubr.msk.bf16.gmra.mrb[32].mxu1 %vm388_vm1, %v12025_v50  ;;  %v14198_v50 = vld [vmem:[#allocation35_spill] sm:$0xff] }
 0x67d   : > { %9277 = vmatprep.mubr.msk.bf16.mxu1 %vm388_vm1, %v12048_v10  ;;  %v14197_v10 = vld [vmem:[#allocation34_spill] sm:$0xff] }
 0x684   : > { %9278 = vmatmul.mubr.msk.bf16.gmra.mrb[36].mxu1 %vm388_vm1, %v12054_v2  ;;  %v14199_v2 = vld [vmem:[#allocation36_spill] sm:$0xff] }
 0x685   : > { %9281 = vmatprep.mubr.msk.bf16.mxu1 %vm388_vm1, %v14194_v26 }
 0x68c   : > { %9282 = vmatmul.mubr.msk.bf16.gmra.mrb[40].mxu1 %vm388_vm1, %v12145_v11  ;;  %v14200_v11 = vld [vmem:[#allocation11_spill] sm:$0xff] }
 0x68d   : > { %9285 = vmatprep.mubr.msk.bf16.mxu1 %vm388_vm1, %v6560_v47 }
 0x694   : > { %9286 = vmatmul.mubr.msk.bf16.gmra.mrb[44].mxu1 %vm388_vm1, %v13139_v40 }
 0x695   : > { %9291 = vmatprep.mubr.msk.bf16.mxu1 %vm388_vm1, %v14196_v45 }
 0x69c   : > { %9292 = vmatmul.mubr.msk.bf16.vlgmr.msra.gmra.mrb[0].mxu1 %vm388_vm1, %v14197_v10 }
 0x69d   : > { %9340 = vmatpush3.bf16.msra.mxu1 %v7072_v31  ;;  %9295 = vmatprep.mubr.msk.bf16.mxu1 %vm388_vm1, %v14198_v50 }
 0x6a4   : > { %9296 = vmatmul.mubr.msk.bf16.gmra.mrb[4].mxu1 %vm388_vm1, %v14199_v2 }
 0x6a5   : > { %9299 = vmatprep.mubr.msk.bf16.mxu1 %vm388_vm1, %v14200_v11 }
 0x6ac   : > { %9300 = vmatmul.mubr.msk.bf16.gmra.mrb[8].mxu1 %vm388_vm1, %v14201_v53  ;;  %v10185_v53 = vld [vmem:[%s10289_s10 + $0x30] sm:$0xff] }
 0x6ad   : > { %9303 = vmatprep.mubr.msk.bf16.mxu1 %vm388_vm1, %v14202_v48 }
 0x6b4   : > { %9304 = vmatmul.mubr.msk.bf16.gmra.mrb[12].mxu1 %vm388_vm1, %v14203_v57 }
 0x6b5   : > { %9307 = vmatprep.mubr.msk.bf16.mxu1 %vm388_vm1, %v14204_v33  ;;  %v10186_v33 = vld [vmem:[%s10289_s10 + $0x48] sm:$0xff] }
 0x6bc   : > { %9308 = vmatmul.mubr.msk.bf16.gmra.mrb[16].mxu1 %vm388_vm1, %v14205_v20 }
 0x6bd   : > { %9311 = vmatprep.mubr.msk.bf16.mxu1 %vm388_vm1, %v12451_v17  ;;  %v14212_v17 = vld [vmem:[#allocation64_spill] sm:$0xff] }
 0x6c4   : > { %9312 = vmatmul.mubr.msk.bf16.gmra.mrb[20].mxu1 %vm388_vm1, %v12502_v49  ;;  %v14213_v49 = vld [vmem:[#allocation65_spill] sm:$0xff] }
 0x6c5   : > { %9315 = vmatprep.mubr.msk.bf16.mxu1 %vm388_vm1, %v14206_v46 }
 0x6cc   : > { %9316 = vmatmul.mubr.msk.bf16.gmra.mrb[24].mxu1 %vm388_vm1, %v14207_v34  ;;  %v10187_v34 = vld [vmem:[%s10289_s10 + $0x38] sm:$0xff] }
 0x6cd   : > { %9319 = vmatprep.mubr.msk.bf16.mxu1 %vm388_vm1, %v14208_v13 }
 0x6d4   : > { %9320 = vmatmul.mubr.msk.bf16.gmra.mrb[28].mxu1 %vm388_vm1, %v14209_v0 }
 0x6d5   : > { %9323 = vmatprep.mubr.msk.bf16.mxu1 %vm388_vm1, %v14210_v21 }
 0x6dc   : > { %9324 = vmatmul.mubr.msk.bf16.gmra.mrb[32].mxu1 %vm388_vm1, %v14211_v41 }
 0x6dd   : > { %9327 = vmatprep.mubr.msk.bf16.mxu1 %vm388_vm1, %v14212_v17 }
 0x6e4   : > { %9328 = vmatmul.mubr.msk.bf16.gmra.mrb[36].mxu1 %vm388_vm1, %v14213_v49 }
 0x6e5   : > { %9331 = vmatprep.mubr.msk.bf16.mxu1 %vm388_vm1, %v14214_v59 }
 0x6ec   : > { %9332 = vmatmul.mubr.msk.bf16.gmra.mrb[40].mxu1 %vm388_vm1, %v14215_v7 }
 0x6ed   : > { %9335 = vmatprep.mubr.msk.bf16.mxu1 %vm388_vm1, %v14216_v55 }
 0x6f4   : > { %9336 = vmatmul.mubr.msk.bf16.gmra.mrb[44].mxu1 %vm388_vm1, %v6809_v18  ;;  %v13245_v18 = vld [vmem:[%s13426_s5] ss:$0 sm:$0xff] }
 0x6f5   : > { %9341 = vmatprep.mubr.msk.bf16.mxu1 %vm388_vm1, %v14217_v23 }
 0x6fc   : > { %9342 = vmatmul.mubr.msk.bf16.vlgmr.msra.gmra.mrb[0].mxu1 %vm388_vm1, %v14218_v56 }
 0x6fd   : > { %9345 = vmatprep.mubr.msk.bf16.mxu1 %vm388_vm1, %v14219_v28 }
 0x704   : > { %9346 = vmatmul.mubr.msk.bf16.gmra.mrb[4].mxu1 %vm388_vm1, %v14220_v9  ;;  %v10188_v9 = vld [vmem:[%s10289_s10 + $0x60] sm:$0xff] }
 0x705   : > { %9349 = vmatprep.mubr.msk.bf16.mxu1 %vm388_vm1, %v14221_v61 }
 0x70c   : > { %9350 = vmatmul.mubr.msk.bf16.gmra.mrb[8].mxu1 %vm388_vm1, %v14222_v52 }
 0x70d   : > { %9353 = vmatprep.mubr.msk.bf16.mxu1 %vm388_vm1, %v14223_v36  ;;  %v10189_v36 = vld [vmem:[%s10289_s10 + $0x50] sm:$0xff] }
 0x714   : > { %9354 = vmatmul.mubr.msk.bf16.gmra.mrb[12].mxu1 %vm388_vm1, %v14224_v39 }
 0x715   : > { %9357 = vmatprep.mubr.msk.bf16.mxu1 %vm388_vm1, %v14225_v35 }
 0x71c   : > { %9358 = vmatmul.mubr.msk.bf16.gmra.mrb[16].mxu1 %vm388_vm1, %v14226_v37  ;;  %v10190_v37 = vld [vmem:[%s10289_s10 + $0x68] sm:$0xff] }
 0x71d   : > { %9361 = vmatprep.mubr.msk.bf16.mxu1 %vm388_vm1, %v14227_v32 }
 0x724   : > { %9362 = vmatmul.mubr.msk.bf16.gmra.mrb[20].mxu1 %vm388_vm1, %v14228_v15 }
 0x725   : > { %9365 = vmatprep.mubr.msk.bf16.mxu1 %vm388_vm1, %v14229_v44 }
 0x72c   : > { %9366 = vmatmul.mubr.msk.bf16.gmra.mrb[24].mxu1 %vm388_vm1, %v14230_v6 }
 0x72d   : > { %9369 = vmatprep.mubr.msk.bf16.mxu1 %vm388_vm1, %v14231_v24 }
 0x734   : > { %9370 = vmatmul.mubr.msk.bf16.gmra.mrb[28].mxu1 %vm388_vm1, %v14232_v4 }
 0x735   : > { %9373 = vmatprep.mubr.msk.bf16.mxu1 %vm388_vm1, %v14233_v3 }
 0x73c   : > { %9374 = vmatmul.mubr.msk.bf16.gmra.mrb[32].mxu1 %vm388_vm1, %v14234_v27 }
 0x73d   : > { %9377 = vmatprep.mubr.msk.bf16.mxu1 %vm388_vm1, %v14235_v22 }
 0x744   : > { %9378 = vmatmul.mubr.msk.bf16.gmra.mrb[36].mxu1 %vm388_vm1, %v14236_v30 }
 0x745   : > { %9381 = vmatprep.mubr.msk.bf16.mxu1 %vm388_vm1, %v14237_v29 }
 0x74c   : > { %9382 = vmatmul.mubr.msk.bf16.gmra.mrb[40].mxu1 %vm388_vm1, %v7043_v1 }
 0x74d   : > { %9385 = vmatprep.mubr.msk.bf16.mxu1 %vm388_vm1, %v7050_v63 }
 0x754   : > { %9386 = vmatmul.mubr.msk.bf16.gmra.mrb[44].mxu1 %vm388_vm1, %v7058_v14  ;;  %v10193_v14 = vld [vmem:[%s10289_s10 + $0x90] sm:$0xff] }
 0x7cf   : > { %v9343_v26 = vpop.f32.mrb[0].mxu1 }
 0x7d0   : > { %v7108_v47 = vpop.f32.mrb[1].mxu1 }
 0x7d1   : > { %v7354_v40 = vmul.f32 %v13245_v18, %v7108_v47  ;;  %v9344_v45 = vpop.f32.mrb[2].mxu1 }
 0x7d2   : > { %v7356_v31 = vmul.f32 %v9344_v45, %v13245_v18  ;;  %v7111_v10 = vpop.f32.mrb[3].mxu1 }
 0x7d3   : > { %v7393_v50 = vadd.f32 %v13250_v60, %v7354_v40  ;;  %v7355_v2 = vmul.f32 %v13245_v18, %v7111_v10  ;;  %v10194_v40 = vld [vmem:[%s10289_s10 + $0xa8] sm:$0xff]  ;;  %v10195_v10 = vld [vmem:[%s10289_s10 + $0x98] sm:$0xff] }
 0x7d4   : > { %v7395_v11 = vadd.f32 %v13250_v60, %v7356_v31 }
 0x7d5   : > { %v7425_v48 = vadd.f32 %v10185_v53, %v7393_v50  ;;  %v7394_v57 = vadd.f32 %v13250_v60, %v7355_v2 }
 0x7d6   : > { %v7427_v20 = vadd.f32 %v10186_v33, %v7395_v11 }
 0x7d7   : > { %v7457_v46 = vmax.f32 %v7425_v48, 0.0  ;;  %v7426_v13 = vadd.f32 %v10187_v34, %v7394_v57  ;;  %v9347_v0 = vpop.f32.mrb[4].mxu1 }
 0x7d8   : > { %v7459_v21 = vmax.f32 %v7427_v20, 0.0  ;;  %v7358_v41 = vmul.f32 %v9347_v0, %v13245_v18  ;;  %v7123_v17 = vpop.f32.mrb[5].mxu1 }
 0x7d9   : > { %7489 = vst.msk [vmem:[%s13263_s14] sm:$0xff] %vm388_vm1, %v7457_v46  ;;  %v7458_v49 = vmax.f32 %v7426_v13, 0.0  ;;  %v7357_v59 = vmul.f32 %v13245_v18, %v7123_v17  ;;  %v9348_v7 = vpop.f32.mrb[6].mxu1 }
 0x7da   : > { %7491 = vst.msk [vmem:[%s13263_s14 + $0x10] sm:$0xff] %vm388_vm1, %v7459_v21  ;;  %v7397_v55 = vadd.f32 %v13250_v60, %v7358_v41  ;;  %v7359_v23 = vmul.f32 %v9348_v7, %v13245_v18  ;;  %v7126_v56 = vpop.f32.mrb[7].mxu1  ;;  %v10196_v21 = vld [vmem:[%s10289_s10 + $0xc0] sm:$0xff] }
 0x7db   : > { %7490 = vst.msk [vmem:[%s13263_s14 + $0x8] sm:$0xff] %vm388_vm1, %v7458_v49  ;;  %v7396_v28 = vadd.f32 %v13250_v60, %v7357_v59  ;;  %v10197_v49 = vld [vmem:[%s10289_s10 + $0xb0] sm:$0xff] }
 0x7dc   : > { %v7429_v61 = vadd.f32 %v10188_v9, %v7397_v55  ;;  %v7398_v52 = vadd.f32 %v13250_v60, %v7359_v23  ;;  %v10198_v55 = vld [vmem:[%s10289_s10 + $0xc8] sm:$0xff] }
 0x7dd   : > { %v7428_v39 = vadd.f32 %v10189_v36, %v7396_v28 }
 0x7de   : > { %v7461_v35 = vmax.f32 %v7429_v61, 0.0  ;;  %v7430_v32 = vadd.f32 %v10190_v37, %v7398_v52 }
 0x7df   : > { %v7460_v15 = vmax.f32 %v7428_v39, 0.0  ;;  %v9351_v44 = vpop.f32.mrb[8].mxu1 }
 0x7e0   : > { %7493 = vst.msk [vmem:[%s13263_s14 + $0x20] sm:$0xff] %vm388_vm1, %v7461_v35  ;;  %v7462_v6 = vmax.f32 %v7430_v32, 0.0  ;;  %v7361_v24 = vmul.f32 %v9351_v44, %v13245_v18  ;;  %v7138_v4 = vpop.f32.mrb[9].mxu1  ;;  %v10199_v32 = vld [vmem:[%s10289_s10 + $0xe0] sm:$0xff] }
 0x7e1   : > { %7492 = vst.msk [vmem:[%s13263_s14 + $0x18] sm:$0xff] %vm388_vm1, %v7460_v15  ;;  %v9352_v3 = vpop.f32.mrb[10].mxu1 }
 0x7e2   : > { %7494 = vst.msk [vmem:[%s13263_s14 + $0x28] sm:$0xff] %vm388_vm1, %v7462_v6  ;;  %v7400_v27 = vadd.f32 %v13250_v60, %v7361_v24  ;;  %v7140_v22 = vpop.f32.mrb[11].mxu1  ;;  %v10200_v24 = vld [vmem:[%s10289_s10 + $0xd8] sm:$0xff] }
 0x7e3   : > { %v7360_v12 = vmul.f32 %v13245_v18, %v7140_v22 }
 0x7e4   : > { %v7432_v62 = vadd.f32 %v10191_v54, %v7400_v27 }
 0x7e5   : > { %v7399_v16 = vadd.f32 %v13250_v60, %v7360_v12 }
 0x7e6   : > { %v7464_v30 = vmax.f32 %v7432_v62, 0.0 }
 0x7e7   : > { %v7431_v29 = vadd.f32 %v10192_v43, %v7399_v16  ;;  %v9355_v42 = vpop.f32.mrb[12].mxu1 }
 0x7e8   : > { %7496 = vst.msk [vmem:[%s13263_s14 + $0x38] sm:$0xff] %vm388_vm1, %v7464_v30  ;;  %v7152_v58 = vpop.f32.mrb[13].mxu1  ;;  %v10201_v42 = vld [vmem:[%s10289_s10 + $0xf0] sm:$0xff] }
 0x7e9   : > { %v7463_v19 = vmax.f32 %v7431_v29, 0.0  ;;  %v7362_v25 = vmul.f32 %v13245_v18, %v7152_v58  ;;  %v9356_v38 = vpop.f32.mrb[14].mxu1 }
 0x7ea   : > { %v7364_v63 = vmul.f32 %v9356_v38, %v13245_v18  ;;  %v7155_v51 = vpop.f32.mrb[15].mxu1 }
 0x7eb   : > { %7495 = vst.msk [vmem:[%s13263_s14 + $0x30] sm:$0xff] %vm388_vm1, %v7463_v19  ;;  %v7401_v1 = vadd.f32 %v13250_v60, %v7362_v25  ;;  %v7363_v5 = vmul.f32 %v13245_v18, %v7155_v51  ;;  %v10202_v25 = vld [vmem:[%s10289_s10 + $0x108] sm:$0xff]  ;;  %v10203_v51 = vld [vmem:[%s10289_s10 + $0xf8] sm:$0xff] }
 0x7ec   : > { %v7403_v8 = vadd.f32 %v13250_v60, %v7364_v63 }
 0x7ed   : > { %v7433_v26 = vadd.f32 %v10193_v14, %v7401_v1  ;;  %v7402_v47 = vadd.f32 %v13250_v60, %v7363_v5 }
 0x7ee   : > { %v7435_v45 = vadd.f32 %v10194_v40, %v7403_v8 }
 0x7ef   : > { %v7465_v31 = vmax.f32 %v7433_v26, 0.0  ;;  %v7434_v50 = vadd.f32 %v10195_v10, %v7402_v47  ;;  %v9359_v2 = vpop.f32.mrb[16].mxu1 }
 0x7f0   : > { %v7467_v11 = vmax.f32 %v7435_v45, 0.0  ;;  %v7366_v53 = vmul.f32 %v9359_v2, %v13245_v18  ;;  %v7167_v48 = vpop.f32.mrb[17].mxu1 }
 0x7f1   : > { %7497 = vst.msk [vmem:[%s13263_s14 + $0x40] sm:$0xff] %vm388_vm1, %v7465_v31  ;;  %v7466_v57 = vmax.f32 %v7434_v50, 0.0  ;;  %v7365_v33 = vmul.f32 %v13245_v18, %v7167_v48  ;;  %v9360_v20 = vpop.f32.mrb[18].mxu1 }
 0x7f2   : > { %7499 = vst.msk [vmem:[%s13263_s14 + $0x50] sm:$0xff] %vm388_vm1, %v7467_v11  ;;  %v7405_v46 = vadd.f32 %v13250_v60, %v7366_v53  ;;  %v7367_v34 = vmul.f32 %v9360_v20, %v13245_v18  ;;  %v7170_v13 = vpop.f32.mrb[19].mxu1  ;;  %v10204_v11 = vld [vmem:[%s10289_s10 + $0x120] sm:$0xff] }
 0x7f3   : > { %7498 = vst.msk [vmem:[%s13263_s14 + $0x48] sm:$0xff] %vm388_vm1, %v7466_v57  ;;  %v7404_v0 = vadd.f32 %v13250_v60, %v7365_v33  ;;  %v10205_v57 = vld [vmem:[%s10289_s10 + $0x110] sm:$0xff] }
 0x7f4   : > { %v7437_v41 = vadd.f32 %v10196_v21, %v7405_v46  ;;  %v7406_v17 = vadd.f32 %v13250_v60, %v7367_v34  ;;  %v10206_v46 = vld [vmem:[%s10289_s10 + $0x128] sm:$0xff] }
 0x7f5   : > { %v7436_v59 = vadd.f32 %v10197_v49, %v7404_v0 }
 0x7f6   : > { %v7469_v7 = vmax.f32 %v7437_v41, 0.0  ;;  %v7438_v23 = vadd.f32 %v10198_v55, %v7406_v17 }
 0x7f7   : > { %v7468_v56 = vmax.f32 %v7436_v59, 0.0  ;;  %v9363_v28 = vpop.f32.mrb[20].mxu1 }
 0x7f8   : > { %7501 = vst.msk [vmem:[%s13263_s14 + $0x60] sm:$0xff] %vm388_vm1, %v7469_v7  ;;  %v7470_v9 = vmax.f32 %v7438_v23, 0.0  ;;  %v7369_v61 = vmul.f32 %v9363_v28, %v13245_v18  ;;  %v7182_v52 = vpop.f32.mrb[21].mxu1  ;;  %v10207_v23 = vld [vmem:[%s10289_s10 + $0x140] sm:$0xff] }
 0x7f9   : > { %7500 = vst.msk [vmem:[%s13263_s14 + $0x58] sm:$0xff] %vm388_vm1, %v7468_v56  ;;  %v9364_v36 = vpop.f32.mrb[22].mxu1 }
 0x7fa   : > { %7502 = vst.msk [vmem:[%s13263_s14 + $0x68] sm:$0xff] %vm388_vm1, %v7470_v9  ;;  %v7408_v39 = vadd.f32 %v13250_v60, %v7369_v61  ;;  %v7184_v35 = vpop.f32.mrb[23].mxu1  ;;  %v10208_v61 = vld [vmem:[%s10289_s10 + $0x138] sm:$0xff] }
 0x7fb   : > { %v7368_v37 = vmul.f32 %v13245_v18, %v7184_v35 }
 0x7fc   : > { %v7440_v15 = vadd.f32 %v10199_v32, %v7408_v39 }
 0x7fd   : > { %v7407_v44 = vadd.f32 %v13250_v60, %v7368_v37 }
 0x7fe   : > { %v7472_v6 = vmax.f32 %v7440_v15, 0.0 }
 0x7ff   : > { %v7439_v4 = vadd.f32 %v10200_v24, %v7407_v44  ;;  %v9367_v3 = vpop.f32.mrb[24].mxu1 }
 0x800   : > { %7504 = vst.msk [vmem:[%s13263_s14 + $0x78] sm:$0xff] %vm388_vm1, %v7472_v6  ;;  %v7196_v27 = vpop.f32.mrb[25].mxu1  ;;  %v10209_v3 = vld [vmem:[%s10289_s10 + $0x150] sm:$0xff] }
 0x801   : > { %v7471_v22 = vmax.f32 %v7439_v4, 0.0  ;;  %v7370_v12 = vmul.f32 %v13245_v18, %v7196_v27  ;;  %v9368_v54 = vpop.f32.mrb[26].mxu1 }
 0x802   : > { %v7372_v62 = vmul.f32 %v9368_v54, %v13245_v18  ;;  %v7199_v16 = vpop.f32.mrb[27].mxu1 }
 0x803   : > { %7503 = vst.msk [vmem:[%s13263_s14 + $0x70] sm:$0xff] %vm388_vm1, %v7471_v22  ;;  %v7409_v30 = vadd.f32 %v13250_v60, %v7370_v12  ;;  %v7371_v43 = vmul.f32 %v13245_v18, %v7199_v16  ;;  %v10210_v12 = vld [vmem:[%s10289_s10 + $0x168] sm:$0xff]  ;;  %v10211_v16 = vld [vmem:[%s10289_s10 + $0x158] sm:$0xff] }
 0x804   : > { %v7411_v29 = vadd.f32 %v13250_v60, %v7372_v62 }
 0x805   : > { %v7441_v58 = vadd.f32 %v10201_v42, %v7409_v30  ;;  %v7410_v19 = vadd.f32 %v13250_v60, %v7371_v43 }
 0x806   : > { %v7443_v38 = vadd.f32 %v10202_v25, %v7411_v29 }
 0x807   : > { %v7473_v63 = vmax.f32 %v7441_v58, 0.0  ;;  %v7442_v1 = vadd.f32 %v10203_v51, %v7410_v19  ;;  %v9371_v5 = vpop.f32.mrb[28].mxu1 }
 0x808   : > { %v7475_v8 = vmax.f32 %v7443_v38, 0.0  ;;  %v7374_v14 = vmul.f32 %v9371_v5, %v13245_v18  ;;  %v7211_v26 = vpop.f32.mrb[29].mxu1 }
 0x809   : > { %7505 = vst.msk [vmem:[%s13263_s14 + $0x80] sm:$0xff] %vm388_vm1, %v7473_v63  ;;  %v7474_v47 = vmax.f32 %v7442_v1, 0.0  ;;  %v7373_v40 = vmul.f32 %v13245_v18, %v7211_v26  ;;  %v9372_v45 = vpop.f32.mrb[30].mxu1 }
 0x80a   : > { %7507 = vst.msk [vmem:[%s13263_s14 + $0x90] sm:$0xff] %vm388_vm1, %v7475_v8  ;;  %v7413_v31 = vadd.f32 %v13250_v60, %v7374_v14  ;;  %v7375_v10 = vmul.f32 %v9372_v45, %v13245_v18  ;;  %v7214_v50 = vpop.f32.mrb[31].mxu1  ;;  %v10212_v8 = vld [vmem:[%s10289_s10 + $0x180] sm:$0xff] }
 0x80b   : > { %7506 = vst.msk [vmem:[%s13263_s14 + $0x88] sm:$0xff] %vm388_vm1, %v7474_v47  ;;  %v7412_v2 = vadd.f32 %v13250_v60, %v7373_v40  ;;  %v10213_v47 = vld [vmem:[%s10289_s10 + $0x170] sm:$0xff] }
 0x80c   : > { %v7445_v53 = vadd.f32 %v10204_v11, %v7413_v31  ;;  %v7414_v48 = vadd.f32 %v13250_v60, %v7375_v10  ;;  %v10214_v31 = vld [vmem:[%s10289_s10 + $0x188] sm:$0xff] }
 0x80d   : > { %v7444_v33 = vadd.f32 %v10205_v57, %v7412_v2 }
 0x80e   : > { %v7477_v20 = vmax.f32 %v7445_v53, 0.0  ;;  %v7446_v34 = vadd.f32 %v10206_v46, %v7414_v48 }
 0x80f   : > { %v7476_v13 = vmax.f32 %v7444_v33, 0.0  ;;  %v9375_v0 = vpop.f32.mrb[32].mxu1 }
 0x810   : > { %7509 = vst.msk [vmem:[%s13263_s14 + $0xa0] sm:$0xff] %vm388_vm1, %v7477_v20  ;;  %v7478_v21 = vmax.f32 %v7446_v34, 0.0  ;;  %v7377_v41 = vmul.f32 %v9375_v0, %v13245_v18  ;;  %v7226_v17 = vpop.f32.mrb[33].mxu1  ;;  %v10215_v34 = vld [vmem:[%s10289_s10 + $0x1a0] sm:$0xff] }
 0x811   : > { %7508 = vst.msk [vmem:[%s13263_s14 + $0x98] sm:$0xff] %vm388_vm1, %v7476_v13  ;;  %v9376_v49 = vpop.f32.mrb[34].mxu1 }
 0x812   : > { %7510 = vst.msk [vmem:[%s13263_s14 + $0xa8] sm:$0xff] %vm388_vm1, %v7478_v21  ;;  %v7416_v59 = vadd.f32 %v13250_v60, %v7377_v41  ;;  %v7228_v7 = vpop.f32.mrb[35].mxu1  ;;  %v10216_v41 = vld [vmem:[%s10289_s10 + $0x198] sm:$0xff] }
 0x813   : > { %v7376_v55 = vmul.f32 %v13245_v18, %v7228_v7 }
 0x814   : > { %v7448_v56 = vadd.f32 %v10207_v23, %v7416_v59 }
 0x815   : > { %v7415_v28 = vadd.f32 %v13250_v60, %v7376_v55 }
 0x816   : > { %v7480_v9 = vmax.f32 %v7448_v56, 0.0 }
 0x817   : > { %v7447_v52 = vadd.f32 %v10208_v61, %v7415_v28  ;;  %v9379_v36 = vpop.f32.mrb[36].mxu1 }
 0x818   : > { %7512 = vst.msk [vmem:[%s13263_s14 + $0xb8] sm:$0xff] %vm388_vm1, %v7480_v9  ;;  %v7240_v39 = vpop.f32.mrb[37].mxu1 }
 0x819   : > { %v7479_v35 = vmax.f32 %v7447_v52, 0.0  ;;  %v7378_v37 = vmul.f32 %v13245_v18, %v7240_v39  ;;  %v9380_v32 = vpop.f32.mrb[38].mxu1 }
 0x81a   : > { %v7380_v15 = vmul.f32 %v9380_v32, %v13245_v18  ;;  %v7243_v44 = vpop.f32.mrb[39].mxu1 }
 0x81b   : > { %7511 = vst.msk [vmem:[%s13263_s14 + $0xb0] sm:$0xff] %vm388_vm1, %v7479_v35  ;;  %v7417_v6 = vadd.f32 %v13250_v60, %v7378_v37  ;;  %v7379_v24 = vmul.f32 %v13245_v18, %v7243_v44 }
 0x81c   : > { %v7419_v4 = vadd.f32 %v13250_v60, %v7380_v15 }
 0x81d   : > { %v7449_v27 = vadd.f32 %v10209_v3, %v7417_v6  ;;  %v7418_v22 = vadd.f32 %v13250_v60, %v7379_v24 }
 0x81e   : > { %v7451_v54 = vadd.f32 %v10210_v12, %v7419_v4 }
 0x81f   : > { %v7481_v62 = vmax.f32 %v7449_v27, 0.0  ;;  %v7450_v30 = vadd.f32 %v10211_v16, %v7418_v22  ;;  %v9383_v43 = vpop.f32.mrb[40].mxu1 }
 0x820   : > { %v7483_v29 = vmax.f32 %v7451_v54, 0.0  ;;  %v7382_v42 = vmul.f32 %v9383_v43, %v13245_v18  ;;  %v7255_v58 = vpop.f32.mrb[41].mxu1 }
 0x821   : > { %7513 = vst.msk [vmem:[%s13263_s14 + $0xc0] sm:$0xff] %vm388_vm1, %v7481_v62  ;;  %v7482_v19 = vmax.f32 %v7450_v30, 0.0  ;;  %v7381_v25 = vmul.f32 %v13245_v18, %v7255_v58  ;;  %v9384_v38 = vpop.f32.mrb[42].mxu1 }
 0x822   : > { %7515 = vst.msk [vmem:[%s13263_s14 + $0xd0] sm:$0xff] %vm388_vm1, %v7483_v29  ;;  %v7421_v63 = vadd.f32 %v13250_v60, %v7382_v42  ;;  %v7383_v51 = vmul.f32 %v9384_v38, %v13245_v18  ;;  %v7258_v1 = vpop.f32.mrb[43].mxu1 }
 0x823   : > { %7514 = vst.msk [vmem:[%s13263_s14 + $0xc8] sm:$0xff] %vm388_vm1, %v7482_v19  ;;  %v7420_v5 = vadd.f32 %v13250_v60, %v7381_v25 }
 0x824   : > { %v7453_v14 = vadd.f32 %v10212_v8, %v7421_v63  ;;  %v7422_v26 = vadd.f32 %v13250_v60, %v7383_v51 }
 0x825   : > { %v7452_v40 = vadd.f32 %v10213_v47, %v7420_v5 }
 0x826   : > { %v7485_v45 = vmax.f32 %v7453_v14, 0.0  ;;  %v7454_v10 = vadd.f32 %v10214_v31, %v7422_v26 }
 0x827   : > { %v7484_v50 = vmax.f32 %v7452_v40, 0.0  ;;  %v9387_v2 = vpop.f32.mrb[44].mxu1 }
 0x828   : > { %7517 = vst.msk [vmem:[%s13263_s14 + $0xe0] sm:$0xff] %vm388_vm1, %v7485_v45  ;;  %v7486_v11 = vmax.f32 %v7454_v10, 0.0  ;;  %v7385_v53 = vmul.f32 %v9387_v2, %v13245_v18  ;;  %v7270_v48 = vpop.f32.mrb[45].mxu1 }
 0x829   : > { %7516 = vst.msk [vmem:[%s13263_s14 + $0xd8] sm:$0xff] %vm388_vm1, %v7484_v50  ;;  %v9388_v57 = vpop.f32.mrb[46].mxu1 }
 0x82a   : > { %7518 = vst.msk [vmem:[%s13263_s14 + $0xe8] sm:$0xff] %vm388_vm1, %v7486_v11  ;;  %v7424_v33 = vadd.f32 %v13250_v60, %v7385_v53  ;;  %v7272_v20 = vpop.f32.mrb[47].mxu1 }
 0x82b   : > { %v7384_v46 = vmul.f32 %v13245_v18, %v7272_v20 }
 0x82c   : > { %v7456_v13 = vadd.f32 %v10215_v34, %v7424_v33 }
 0x82d   : > { %v7423_v0 = vadd.f32 %v13250_v60, %v7384_v46 }
 0x82e   : > { %v7488_v21 = vmax.f32 %v7456_v13, 0.0 }
 0x82f   : > { %v7455_v17 = vadd.f32 %v10216_v41, %v7423_v0 }
 0x830   : > { %7520 = vst.msk [vmem:[%s13263_s14 + $0xf8] sm:$0xff] %vm388_vm1, %v7488_v21 }
 0x831   : > { %v7487_v49 = vmax.f32 %v7455_v17, 0.0 }
 0x833   : > { %7519 = vst.msk [vmem:[%s13263_s14 + $0xf0] sm:$0xff] %vm388_vm1, %v7487_v49 }
 0x834 PF: > { %s17_s24 = sadd.s32 1, %s10223_s24  }
 0x835   : > { %p14_p4 = scmp.ge.s32.totalorder %s17_s24, 4  }
 0x837   :  { %16 = sbr.rel (!%p14_p4) target bundleno = 1 (0x1), region = 94 }

</bundles_post_ra>
